<compile_context>
chip_gen: v6e
topology: v6e:2x2x1
jax: 0.10.0
libtpu: 0.0.40
codegen_flags: <defaults>
</compile_context>

<pallas_src>
import functools

import jax
import jax.numpy as jnp
from jax import lax
from jax.experimental import pallas as pl
from jax.experimental.pallas import tpu as pltpu

NUM_CLASSES = 10
CPAD = 128                      # channel padding -> lane-dense activations / stores
OPERAND_DTYPE = jnp.bfloat16    # MXU operand + activation storage dtype (f32 accumulate)


# ----------------------------------------------------------------------------
# Pallas kernels
# ----------------------------------------------------------------------------
def _apply_act(y, act_start):
    """act_start: None -> no activation; 0 -> ReLU everywhere;
    k > 0 -> ReLU only on output columns >= k (used by the merged stage-0 conv)."""
    if act_start is None:
        return y
    if act_start == 0:
        return jnp.maximum(y, 0.0)
    col = lax.broadcasted_iota(jnp.int32, y.shape, 1)
    return jnp.where(col >= act_start, jnp.maximum(y, 0.0), y)


def _matmul_bias_act_kernel(a_ref, w_ref, b_ref, o_ref, *, act_start):
    acc = jnp.dot(a_ref[...], w_ref[...], preferred_element_type=jnp.float32)
    y = _apply_act(acc + b_ref[...], act_start)
    o_ref[...] = y.astype(o_ref.dtype)


def _matmul_bias_res_act_kernel(a_ref, w_ref, b_ref, sc_ref, o_ref, *, act_start):
    acc = jnp.dot(a_ref[...], w_ref[...], preferred_element_type=jnp.float32)
    y = acc + b_ref[...] + sc_ref[...].astype(jnp.float32)   # residual in f32 epilogue
    y = _apply_act(y, act_start)
    o_ref[...] = y.astype(o_ref.dtype)


def _gap_fc_kernel(x_ref, w_ref, b_ref, o_ref, *, inv_hw):
    # global average pool over the flattened spatial axis (sum * 1/HW), then FC -> logits
    pooled = jnp.sum(x_ref[...].astype(jnp.float32), axis=1) * inv_hw   # (B, C) f32
    logits = jnp.dot(pooled, w_ref[...], preferred_element_type=jnp.float32)
    o_ref[...] = logits + b_ref[...]


# ----------------------------------------------------------------------------
# Kernel wrappers
# ----------------------------------------------------------------------------
def matmul_bias_act(a, w, bias, *, act_start, shortcut=None, out_dtype=OPERAND_DTYPE):
    """y = act?( a @ w + bias [+ shortcut] ).  a:(M,K), w:(K,N) (BN scale pre-folded).
    Tiled over M (pipelined, 'parallel' for megacore); K and N stay full blocks."""
    M, K = a.shape
    _, N = w.shape
    tm = M if M <= 256 else 256
    grid_m = pl.cdiv(M, tm)

    a_op = a.astype(OPERAND_DTYPE)
    w_op = w.astype(OPERAND_DTYPE)
    b2 = bias.reshape(1, N).astype(jnp.float32)

    out_bytes = jnp.dtype(out_dtype).itemsize
    bytes_accessed = M * K * 2 + K * N * 2 + M * N * out_bytes + N * 4
    if shortcut is not None:
        bytes_accessed += M * N * 2
    cost = pl.CostEstimate(flops=2 * M * K * N, transcendentals=0,
                           bytes_accessed=bytes_accessed)

    a_spec = pl.BlockSpec((tm, K), lambda i: (i, 0))
    w_spec = pl.BlockSpec((K, N), lambda i: (0, 0))
    b_spec = pl.BlockSpec((1, N), lambda i: (0, 0))
    o_spec = pl.BlockSpec((tm, N), lambda i: (i, 0))

    if shortcut is None:
        kernel = functools.partial(_matmul_bias_act_kernel, act_start=act_start)
        in_specs = [a_spec, w_spec, b_spec]
        args = (a_op, w_op, b2)
    else:
        kernel = functools.partial(_matmul_bias_res_act_kernel, act_start=act_start)
        in_specs = [a_spec, w_spec, b_spec, pl.BlockSpec((tm, N), lambda i: (i, 0))]
        args = (a_op, w_op, b2, shortcut.astype(OPERAND_DTYPE))

    return pl.pallas_call(
        kernel,
        out_shape=jax.ShapeDtypeStruct((M, N), out_dtype),
        grid=(grid_m,),
        in_specs=in_specs,
        out_specs=o_spec,
        compiler_params=pltpu.CompilerParams(dimension_semantics=("parallel",)),
        cost_estimate=cost,
    )(*args)


def gap_fc(x_bsc, w, b):
    """Fused global-average-pool + linear head.  x:(B, HW, C) bf16, w:(C, n_cls)."""
    B, HW, C = x_bsc.shape
    N = w.shape[1]
    cost = pl.CostEstimate(flops=B * HW * C + 2 * B * C * N, transcendentals=0,
                           bytes_accessed=B * HW * C * 2 + C * N * 4 + N * 4 + B * N * 4)
    return pl.pallas_call(
        functools.partial(_gap_fc_kernel, inv_hw=1.0 / HW),
        out_shape=jax.ShapeDtypeStruct((B, N), jnp.float32),
        grid=(1,),
        in_specs=[
            pl.BlockSpec((B, HW, C), lambda i: (0, 0, 0)),
            pl.BlockSpec((C, N), lambda i: (0, 0)),
            pl.BlockSpec((1, N), lambda i: (0, 0)),
        ],
        out_specs=pl.BlockSpec((B, N), lambda i: (0, 0)),
        cost_estimate=cost,
    )(x_bsc.astype(OPERAND_DTYPE), w.astype(jnp.float32),
      b.reshape(1, N).astype(jnp.float32))


# ----------------------------------------------------------------------------
# Conv-BN-Act (+ optional fused residual) via im2col + fused Pallas matmul
# ----------------------------------------------------------------------------
def conv_bn_act(x_nhwc, p, *, stride, act_start, shortcut=None):
    """p['w']: (kh, kw, Cin_pad, Cout_pad) with BN scale folded in; p['bias']: (Cout_pad,).
    stride is a static Python int.  Optional `shortcut` (NHWC, same output shape, bf16)
    is added before the activation inside the kernel epilogue."""
    w = p["w"]
    kh, kw, cin, cout = w.shape
    B, H, W, _ = x_nhwc.shape
    pad = ((stride - 1) + (kh - 1)) // 2  # timm 'same'-style padding (odd k, dilation 1)
    Ho = (H + 2 * pad - kh) // stride + 1
    Wo = (W + 2 * pad - kw) // stride + 1

    if kh == 1 and kw == 1:
        a = x_nhwc[:, ::stride, ::stride, :][:, :Ho, :Wo, :].reshape(B * Ho * Wo, cin)
    else:
        xp = jnp.pad(x_nhwc, ((0, 0), (pad, pad), (pad, pad), (0, 0)))
        cols = [
            xp[:, i: i + stride * Ho: stride, j: j + stride * Wo: stride, :]
            for i in range(kh)
            for j in range(kw)
        ]
        a = jnp.concatenate(cols, axis=-1).reshape(B * Ho * Wo, kh * kw * cin)

    wm = w.reshape(kh * kw * cin, cout)
    sc = None if shortcut is None else shortcut.reshape(B * Ho * Wo, cout)
    out = matmul_bias_act(a, wm, p["bias"], act_start=act_start, shortcut=sc)
    return out.reshape(B, Ho, Wo, cout)


# ----------------------------------------------------------------------------
# Parameters (deterministic synthetic init; BN scale folded; channels padded to CPAD)
# ----------------------------------------------------------------------------
def make_conv_bn(key, cin, cout, k, zero_gamma=False):
    """Returns BN-folded (w[k,k,cin,cout], bias[cout]) in f32 (eval-mode BN)."""
    kw_key, g_key, b_key = jax.random.split(key, 3)
    fan_out = k * k * cout
    w = jax.random.normal(kw_key, (k, k, cin, cout), jnp.float32) * (2.0 / fan_out) ** 0.5
    if zero_gamma:  # zero_init_last_bn in Basic/Bottleneck blocks
        gamma = jnp.zeros((cout,), jnp.float32)
    else:
        gamma = 1.0 + 0.1 * jax.random.normal(g_key, (cout,), jnp.float32)
    beta = 0.1 * jax.random.normal(b_key, (cout,), jnp.float32)
    mean = jnp.zeros((cout,), jnp.float32)
    var = jnp.ones((cout,), jnp.float32)
    scale = gamma / jnp.sqrt(var + 1e-5)
    bias = beta - mean * scale
    return w * scale, bias


def pad_conv(w, bias, cin_pad=None, cout_pad=CPAD):
    """Zero-pad Cin/Cout to lane-dense sizes; padded channels carry exact zeros."""
    kh, kw, cin, cout = w.shape
    cin_pad = cin if cin_pad is None else cin_pad
    wp = jnp.zeros((kh, kw, cin_pad, cout_pad), jnp.float32).at[:, :, :cin, :cout].set(w)
    bp = jnp.zeros((cout_pad,), jnp.float32).at[:cout].set(bias)
    return dict(w=wp, bias=bp)


def build_params(key):
    keys = iter(jax.random.split(key, 32))
    params = {}

    # stem: ConvBnAct(3 -> 8, 3x3, stride 2); Cout padded to 128
    w, b = make_conv_bn(next(keys), 3, 8, 3)
    params["stem"] = pad_conv(w, b, cin_pad=3, cout_pad=CPAD)

    # stage 0: BasicBlock(8 -> 16, stride 2, conv1x1 downsample)
    #   merged conv = [shortcut 1x1 (center tap of 3x3) | conv1 3x3] along Cout (N = 256);
    #   ReLU applied only to the conv1 half (columns >= CPAD) in the epilogue.
    w_sc, b_sc = make_conv_bn(next(keys), 8, 16, 1)
    w_c1, b_c1 = make_conv_bn(next(keys), 8, 16, 3)
    wm = jnp.zeros((3, 3, CPAD, 2 * CPAD), jnp.float32)
    wm = wm.at[1, 1, :8, :16].set(w_sc[0, 0])
    wm = wm.at[:, :, :8, CPAD:CPAD + 16].set(w_c1)
    bm = jnp.zeros((2 * CPAD,), jnp.float32).at[:16].set(b_sc).at[CPAD:CPAD + 16].set(b_c1)
    w_c2, b_c2 = make_conv_bn(next(keys), 16, 16, 3, zero_gamma=True)
    params["s0b0"] = dict(
        merged=dict(w=wm, bias=bm),
        conv2=pad_conv(w_c2, b_c2, cin_pad=CPAD, cout_pad=CPAD),
    )

    # stage 1: BottleneckBlock(16 -> 32, stride 2, bottle_ratio 0.5 -> mid 16)
    w_s, b_s = make_conv_bn(next(keys), 16, 32, 1)
    w1, b1 = make_conv_bn(next(keys), 16, 16, 1)
    w2, b2 = make_conv_bn(next(keys), 16, 16, 3)
    w3, b3 = make_conv_bn(next(keys), 16, 32, 1, zero_gamma=True)
    params["s1b0"] = dict(
        shortcut=pad_conv(w_s, b_s, cin_pad=CPAD, cout_pad=CPAD),
        conv1=pad_conv(w1, b1, cin_pad=CPAD, cout_pad=CPAD),
        conv2=pad_conv(w2, b2, cin_pad=CPAD, cout_pad=CPAD),
        conv3=pad_conv(w3, b3, cin_pad=CPAD, cout_pad=CPAD),
    )

    # stage 2: RepVggBlock(32 -> 32, stride 2), no identity (stride != 1).
    # Reparameterized at build time: conv_1x1 folded into conv_kxk's center tap.
    w_k, b_k = make_conv_bn(next(keys), 32, 32, 3)
    w_1, b_1 = make_conv_bn(next(keys), 32, 32, 1)
    w_rep = w_k.at[1, 1].add(w_1[0, 0])
    b_rep = b_k + b_1
    params["s2b0"] = dict(rep=pad_conv(w_rep, b_rep, cin_pad=CPAD, cout_pad=CPAD))

    # head: ClassifierHead -> Linear(32 -> NUM_CLASSES); weight rows padded to 128 Cin
    w_fc = 0.01 * jax.random.normal(next(keys), (32, NUM_CLASSES), jnp.float32)
    w_fc_p = jnp.zeros((CPAD, NUM_CLASSES), jnp.float32).at[:32, :].set(w_fc)
    params["fc"] = dict(w=w_fc_p, b=jnp.zeros((NUM_CLASSES,), jnp.float32))
    return params


# ----------------------------------------------------------------------------
# ByobNet forward
# ----------------------------------------------------------------------------
def byobnet_forward(params, x_nchw):
    # NCHW -> NHWC, bf16 activations throughout
    x = jnp.transpose(x_nchw, (0, 2, 3, 1)).astype(OPERAND_DTYPE)

    # stem: conv-bn-relu (3x3, stride 2)
    x = conv_bn_act(x, params["stem"], stride=2, act_start=0)

    # stage 0: BasicBlock — shortcut 1x1 and conv1 3x3 merged into one matmul;
    # residual add + ReLU fused into conv2's epilogue.
    p = params["s0b0"]
    m = conv_bn_act(x, p["merged"], stride=2, act_start=CPAD)   # (B, Ho, Wo, 2*CPAD)
    sc = m[..., :CPAD]          # downsample branch (no act)
    y = m[..., CPAD:]           # conv1 branch (ReLU already applied)
    x = conv_bn_act(y, p["conv2"], stride=1, act_start=0, shortcut=sc)

    # stage 1: BottleneckBlock — residual add + ReLU fused into conv3's epilogue
    p = params["s1b0"]
    sc = conv_bn_act(x, p["shortcut"], stride=2, act_start=None)
    y = conv_bn_act(x, p["conv1"], stride=1, act_start=0)
    y = conv_bn_act(y, p["conv2"], stride=2, act_start=0)
    x = conv_bn_act(y, p["conv3"], stride=1, act_start=0, shortcut=sc)

    # stage 2: RepVggBlock (reparameterized) -> single conv-bn + ReLU
    p = params["s2b0"]
    x = conv_bn_act(x, p["rep"], stride=2, act_start=0)

    # final_conv = Identity (cfg.num_features == 0)

    # head: fused global avg pool + linear (dropout rate = 0 -> identity)
    B, H, W, C = x.shape
    fc = params["fc"]
    return gap_fc(x.reshape(B, H * W, C), fc["w"], fc["b"])


if __name__ == "__main__":
    key = jax.random.PRNGKey(0)
    pkey, xkey = jax.random.split(key)
    params = build_params(pkey)
    x = jax.random.normal(xkey, (2, 3, 32, 32), jnp.float32)  # NCHW input

    fwd = jax.jit(byobnet_forward)
    logits = fwd(params, x)
    jax.block_until_ready(logits)
    assert logits.shape == (2, NUM_CLASSES), logits.shape
    print("KERNEL_OK")
</pallas_src>

<mosaic_0001>
module attributes {stable_mosaic.version = 11 : i64} {
  func.func @_matmul_bias_act_kernel(%arg0: i32, %arg1: memref<256x27xbf16, #tpu.memory_space<vmem>>, %arg2: memref<27x128xbf16, #tpu.memory_space<vmem>>, %arg3: memref<1x128xf32, #tpu.memory_space<vmem>>, %arg4: memref<256x128xbf16, #tpu.memory_space<vmem>>) attributes {dimension_semantics = [#tpu.dimension_semantics<parallel>], iteration_bounds = array<i64: 2>, scalar_prefetch = 0 : i64, scratch_operands = 0 : i64, tpu.core_type = #tpu.core_type<tc>, window_params = [{transform_indices = @transform_0, window_bounds = array<i64: 256, 27>}, {pipeline_mode = #tpu.pipeline_mode<synchronous>, transform_indices = @transform_1, window_bounds = array<i64: 27, 128>}, {pipeline_mode = #tpu.pipeline_mode<synchronous>, transform_indices = @transform_2, window_bounds = array<i64: 1, 128>}, {transform_indices = @transform_3, window_bounds = array<i64: 256, 128>}]} {
    %c0 = arith.constant 0 : index
    %c0_0 = arith.constant 0 : index
    %0 = vector.load %arg1[%c0, %c0_0] : memref<256x27xbf16, #tpu.memory_space<vmem>>, vector<256x27xbf16>
    %c0_1 = arith.constant 0 : index
    %c0_2 = arith.constant 0 : index
    %1 = vector.load %arg2[%c0_1, %c0_2] : memref<27x128xbf16, #tpu.memory_space<vmem>>, vector<27x128xbf16>
    %cst = arith.constant dense<0.000000e+00> : vector<256x128xf32>
    %2 = tpu.matmul %0, %1, %cst {dimension_numbers = #tpu.dot_dimension_numbers<[1], [0], [0], [1], [0, 0, 1, 1], [], []>} : vector<256x27xbf16>, vector<27x128xbf16>, vector<256x128xf32> -> vector<256x128xf32>
    %c0_3 = arith.constant 0 : index
    %c0_4 = arith.constant 0 : index
    %3 = vector.load %arg3[%c0_3, %c0_4] : memref<1x128xf32, #tpu.memory_space<vmem>>, vector<1x128xf32>
    %4 = vector.broadcast %3 : vector<1x128xf32> to vector<256x128xf32>
    %5 = arith.addf %2, %4 : vector<256x128xf32>
    %cst_5 = arith.constant 0.000000e+00 : f32
    %6 = vector.broadcast %cst_5 : f32 to vector<256x128xf32>
    %7 = arith.maximumf %5, %6 : vector<256x128xf32>
    %8 = arith.truncf %7 : vector<256x128xf32> to vector<256x128xbf16>
    %c0_6 = arith.constant 0 : index
    %c0_7 = arith.constant 0 : index
    %9 = vector.load %arg4[%c0_6, %c0_7] : memref<256x128xbf16, #tpu.memory_space<vmem>>, vector<256x128xbf16>
    tpu.vector_store %arg4[%c0_6, %c0_7], %8 {strides = array<i32>} : memref<256x128xbf16, #tpu.memory_space<vmem>>, vector<256x128xbf16>,
    return
  }
  func.func @transform_0(%arg0: i32) -> (i32, i32) {
    %c0_i32 = arith.constant 0 : i32
    %c0_i32_0 = arith.constant 0 : i32
    return %arg0, %c0_i32 : i32, i32
  }
  func.func @transform_1(%arg0: i32) -> (i32, i32) {
    %c0_i32 = arith.constant 0 : i32
    %c0_i32_0 = arith.constant 0 : i32
    %c0_i32_1 = arith.constant 0 : i32
    return %c0_i32, %c0_i32_0 : i32, i32
  }
  func.func @transform_2(%arg0: i32) -> (i32, i32) {
    %c0_i32 = arith.constant 0 : i32
    %c0_i32_0 = arith.constant 0 : i32
    %c0_i32_1 = arith.constant 0 : i32
    return %c0_i32, %c0_i32_0 : i32, i32
  }
  func.func @transform_3(%arg0: i32) -> (i32, i32) {
    %c0_i32 = arith.constant 0 : i32
    %c0_i32_0 = arith.constant 0 : i32
    return %arg0, %c0_i32 : i32, i32
  }
}

module attributes {stable_mosaic.version = 11 : i64} {
  func.func @_matmul_bias_act_kernel(%arg0: i32, %arg1: memref<128x1152xbf16, #tpu.memory_space<vmem>>, %arg2: memref<1152x256xbf16, #tpu.memory_space<vmem>>, %arg3: memref<1x256xf32, #tpu.memory_space<vmem>>, %arg4: memref<128x256xbf16, #tpu.memory_space<vmem>>) attributes {dimension_semantics = [#tpu.dimension_semantics<parallel>], iteration_bounds = array<i64: 1>, scalar_prefetch = 0 : i64, scratch_operands = 0 : i64, tpu.core_type = #tpu.core_type<tc>, window_params = [{transform_indices = @transform_0, window_bounds = array<i64: 128, 1152>}, {pipeline_mode = #tpu.pipeline_mode<synchronous>, transform_indices = @transform_1, window_bounds = array<i64: 1152, 256>}, {pipeline_mode = #tpu.pipeline_mode<synchronous>, transform_indices = @transform_2, window_bounds = array<i64: 1, 256>}, {transform_indices = @transform_3, window_bounds = array<i64: 128, 256>}]} {
    %c0 = arith.constant 0 : index
    %c0_0 = arith.constant 0 : index
    %0 = vector.load %arg1[%c0, %c0_0] : memref<128x1152xbf16, #tpu.memory_space<vmem>>, vector<128x1152xbf16>
    %c0_1 = arith.constant 0 : index
    %c0_2 = arith.constant 0 : index
    %1 = vector.load %arg2[%c0_1, %c0_2] : memref<1152x256xbf16, #tpu.memory_space<vmem>>, vector<1152x256xbf16>
    %cst = arith.constant dense<0.000000e+00> : vector<128x256xf32>
    %2 = tpu.matmul %0, %1, %cst {dimension_numbers = #tpu.dot_dimension_numbers<[1], [0], [0], [1], [0, 0, 1, 1], [], []>} : vector<128x1152xbf16>, vector<1152x256xbf16>, vector<128x256xf32> -> vector<128x256xf32>
    %c0_3 = arith.constant 0 : index
    %c0_4 = arith.constant 0 : index
    %3 = vector.load %arg3[%c0_3, %c0_4] : memref<1x256xf32, #tpu.memory_space<vmem>>, vector<1x256xf32>
    %4 = vector.broadcast %3 : vector<1x256xf32> to vector<128x256xf32>
    %5 = arith.addf %2, %4 : vector<128x256xf32>
    %6 = tpu.iota {dimensions = array<i32: 1>} : vector<128x256xi32>
    %c128_i32 = arith.constant 128 : i32
    %7 = vector.broadcast %c128_i32 : i32 to vector<128x256xi32>
    %8 = arith.cmpi sge, %6, %7 : vector<128x256xi32>
    %cst_5 = arith.constant 0.000000e+00 : f32
    %9 = vector.broadcast %cst_5 : f32 to vector<128x256xf32>
    %10 = arith.maximumf %5, %9 : vector<128x256xf32>
    %11 = arith.select %8, %10, %5 : vector<128x256xi1>, vector<128x256xf32>
    %12 = arith.truncf %11 : vector<128x256xf32> to vector<128x256xbf16>
    %c0_6 = arith.constant 0 : index
    %c0_7 = arith.constant 0 : index
    %13 = vector.load %arg4[%c0_6, %c0_7] : memref<128x256xbf16, #tpu.memory_space<vmem>>, vector<128x256xbf16>
    tpu.vector_store %arg4[%c0_6, %c0_7], %12 {strides = array<i32>} : memref<128x256xbf16, #tpu.memory_space<vmem>>, vector<128x256xbf16>,
    return
  }
  func.func @transform_0(%arg0: i32) -> (i32, i32) {
    %c0_i32 = arith.constant 0 : i32
    %c0_i32_0 = arith.constant 0 : i32
    return %arg0, %c0_i32 : i32, i32
  }
  func.func @transform_1(%arg0: i32) -> (i32, i32) {
    %c0_i32 = arith.constant 0 : i32
    %c0_i32_0 = arith.constant 0 : i32
    %c0_i32_1 = arith.constant 0 : i32
    return %c0_i32, %c0_i32_0 : i32, i32
  }
  func.func @transform_2(%arg0: i32) -> (i32, i32) {
    %c0_i32 = arith.constant 0 : i32
    %c0_i32_0 = arith.constant 0 : i32
    %c0_i32_1 = arith.constant 0 : i32
    return %c0_i32, %c0_i32_0 : i32, i32
  }
  func.func @transform_3(%arg0: i32) -> (i32, i32) {
    %c0_i32 = arith.constant 0 : i32
    %c0_i32_0 = arith.constant 0 : i32
    return %arg0, %c0_i32 : i32, i32
  }
}

module attributes {stable_mosaic.version = 11 : i64} {
  func.func @_matmul_bias_res_act_kernel(%arg0: i32, %arg1: memref<128x1152xbf16, #tpu.memory_space<vmem>>, %arg2: memref<1152x128xbf16, #tpu.memory_space<vmem>>, %arg3: memref<1x128xf32, #tpu.memory_space<vmem>>, %arg4: memref<128x128xbf16, #tpu.memory_space<vmem>>, %arg5: memref<128x128xbf16, #tpu.memory_space<vmem>>) attributes {dimension_semantics = [#tpu.dimension_semantics<parallel>], iteration_bounds = array<i64: 1>, scalar_prefetch = 0 : i64, scratch_operands = 0 : i64, tpu.core_type = #tpu.core_type<tc>, window_params = [{transform_indices = @transform_0, window_bounds = array<i64: 128, 1152>}, {pipeline_mode = #tpu.pipeline_mode<synchronous>, transform_indices = @transform_1, window_bounds = array<i64: 1152, 128>}, {pipeline_mode = #tpu.pipeline_mode<synchronous>, transform_indices = @transform_2, window_bounds = array<i64: 1, 128>}, {transform_indices = @transform_3, window_bounds = array<i64: 128, 128>}, {transform_indices = @transform_4, window_bounds = array<i64: 128, 128>}]} {
    %c0 = arith.constant 0 : index
    %c0_0 = arith.constant 0 : index
    %0 = vector.load %arg1[%c0, %c0_0] : memref<128x1152xbf16, #tpu.memory_space<vmem>>, vector<128x1152xbf16>
    %c0_1 = arith.constant 0 : index
    %c0_2 = arith.constant 0 : index
    %1 = vector.load %arg2[%c0_1, %c0_2] : memref<1152x128xbf16, #tpu.memory_space<vmem>>, vector<1152x128xbf16>
    %cst = arith.constant dense<0.000000e+00> : vector<128x128xf32>
    %2 = tpu.matmul %0, %1, %cst {dimension_numbers = #tpu.dot_dimension_numbers<[1], [0], [0], [1], [0, 0, 1, 1], [], []>} : vector<128x1152xbf16>, vector<1152x128xbf16>, vector<128x128xf32> -> vector<128x128xf32>
    %c0_3 = arith.constant 0 : index
    %c0_4 = arith.constant 0 : index
    %3 = vector.load %arg3[%c0_3, %c0_4] : memref<1x128xf32, #tpu.memory_space<vmem>>, vector<1x128xf32>
    %4 = vector.broadcast %3 : vector<1x128xf32> to vector<128x128xf32>
    %5 = arith.addf %2, %4 : vector<128x128xf32>
    %c0_5 = arith.constant 0 : index
    %c0_6 = arith.constant 0 : index
    %6 = vector.load %arg4[%c0_5, %c0_6] : memref<128x128xbf16, #tpu.memory_space<vmem>>, vector<128x128xbf16>
    %7 = arith.extf %6 : vector<128x128xbf16> to vector<128x128xf32>
    %8 = arith.addf %5, %7 : vector<128x128xf32>
    %cst_7 = arith.constant 0.000000e+00 : f32
    %9 = vector.broadcast %cst_7 : f32 to vector<128x128xf32>
    %10 = arith.maximumf %8, %9 : vector<128x128xf32>
    %11 = arith.truncf %10 : vector<128x128xf32> to vector<128x128xbf16>
    %c0_8 = arith.constant 0 : index
    %c0_9 = arith.constant 0 : index
    %12 = vector.load %arg5[%c0_8, %c0_9] : memref<128x128xbf16, #tpu.memory_space<vmem>>, vector<128x128xbf16>
    tpu.vector_store %arg5[%c0_8, %c0_9], %11 {strides = array<i32>} : memref<128x128xbf16, #tpu.memory_space<vmem>>, vector<128x128xbf16>,
    return
  }
  func.func @transform_0(%arg0: i32) -> (i32, i32) {
    %c0_i32 = arith.constant 0 : i32
    %c0_i32_0 = arith.constant 0 : i32
    return %arg0, %c0_i32 : i32, i32
  }
  func.func @transform_1(%arg0: i32) -> (i32, i32) {
    %c0_i32 = arith.constant 0 : i32
    %c0_i32_0 = arith.constant 0 : i32
    %c0_i32_1 = arith.constant 0 : i32
    return %c0_i32, %c0_i32_0 : i32, i32
  }
  func.func @transform_2(%arg0: i32) -> (i32, i32) {
    %c0_i32 = arith.constant 0 : i32
    %c0_i32_0 = arith.constant 0 : i32
    %c0_i32_1 = arith.constant 0 : i32
    return %c0_i32, %c0_i32_0 : i32, i32
  }
  func.func @transform_3(%arg0: i32) -> (i32, i32) {
    %c0_i32 = arith.constant 0 : i32
    %c0_i32_0 = arith.constant 0 : i32
    return %arg0, %c0_i32 : i32, i32
  }
  func.func @transform_4(%arg0: i32) -> (i32, i32) {
    %c0_i32 = arith.constant 0 : i32
    %c0_i32_0 = arith.constant 0 : i32
    return %arg0, %c0_i32 : i32, i32
  }
}

module attributes {stable_mosaic.version = 11 : i64} {
  func.func @_matmul_bias_act_kernel(%arg0: i32, %arg1: memref<128x128xbf16, #tpu.memory_space<vmem>>, %arg2: memref<128x128xbf16, #tpu.memory_space<vmem>>, %arg3: memref<1x128xf32, #tpu.memory_space<vmem>>, %arg4: memref<128x128xbf16, #tpu.memory_space<vmem>>) attributes {dimension_semantics = [#tpu.dimension_semantics<parallel>], iteration_bounds = array<i64: 1>, scalar_prefetch = 0 : i64, scratch_operands = 0 : i64, tpu.core_type = #tpu.core_type<tc>, window_params = [{transform_indices = @transform_0, window_bounds = array<i64: 128, 128>}, {pipeline_mode = #tpu.pipeline_mode<synchronous>, transform_indices = @transform_1, window_bounds = array<i64: 128, 128>}, {pipeline_mode = #tpu.pipeline_mode<synchronous>, transform_indices = @transform_2, window_bounds = array<i64: 1, 128>}, {transform_indices = @transform_3, window_bounds = array<i64: 128, 128>}]} {
    %c0 = arith.constant 0 : index
    %c0_0 = arith.constant 0 : index
    %0 = vector.load %arg1[%c0, %c0_0] : memref<128x128xbf16, #tpu.memory_space<vmem>>, vector<128x128xbf16>
    %c0_1 = arith.constant 0 : index
    %c0_2 = arith.constant 0 : index
    %1 = vector.load %arg2[%c0_1, %c0_2] : memref<128x128xbf16, #tpu.memory_space<vmem>>, vector<128x128xbf16>
    %cst = arith.constant dense<0.000000e+00> : vector<128x128xf32>
    %2 = tpu.matmul %0, %1, %cst {dimension_numbers = #tpu.dot_dimension_numbers<[1], [0], [0], [1], [0, 0, 1, 1], [], []>} : vector<128x128xbf16>, vector<128x128xbf16>, vector<128x128xf32> -> vector<128x128xf32>
    %c0_3 = arith.constant 0 : index
    %c0_4 = arith.constant 0 : index
    %3 = vector.load %arg3[%c0_3, %c0_4] : memref<1x128xf32, #tpu.memory_space<vmem>>, vector<1x128xf32>
    %4 = vector.broadcast %3 : vector<1x128xf32> to vector<128x128xf32>
    %5 = arith.addf %2, %4 : vector<128x128xf32>
    %cst_5 = arith.constant 0.000000e+00 : f32
    %6 = vector.broadcast %cst_5 : f32 to vector<128x128xf32>
    %7 = arith.maximumf %5, %6 : vector<128x128xf32>
    %8 = arith.truncf %7 : vector<128x128xf32> to vector<128x128xbf16>
    %c0_6 = arith.constant 0 : index
    %c0_7 = arith.constant 0 : index
    %9 = vector.load %arg4[%c0_6, %c0_7] : memref<128x128xbf16, #tpu.memory_space<vmem>>, vector<128x128xbf16>
    tpu.vector_store %arg4[%c0_6, %c0_7], %8 {strides = array<i32>} : memref<128x128xbf16, #tpu.memory_space<vmem>>, vector<128x128xbf16>,
    return
  }
  func.func @transform_0(%arg0: i32) -> (i32, i32) {
    %c0_i32 = arith.constant 0 : i32
    %c0_i32_0 = arith.constant 0 : i32
    return %arg0, %c0_i32 : i32, i32
  }
  func.func @transform_1(%arg0: i32) -> (i32, i32) {
    %c0_i32 = arith.constant 0 : i32
    %c0_i32_0 = arith.constant 0 : i32
    %c0_i32_1 = arith.constant 0 : i32
    return %c0_i32, %c0_i32_0 : i32, i32
  }
  func.func @transform_2(%arg0: i32) -> (i32, i32) {
    %c0_i32 = arith.constant 0 : i32
    %c0_i32_0 = arith.constant 0 : i32
    %c0_i32_1 = arith.constant 0 : i32
    return %c0_i32, %c0_i32_0 : i32, i32
  }
  func.func @transform_3(%arg0: i32) -> (i32, i32) {
    %c0_i32 = arith.constant 0 : i32
    %c0_i32_0 = arith.constant 0 : i32
    return %arg0, %c0_i32 : i32, i32
  }
}

module attributes {stable_mosaic.version = 11 : i64} {
  func.func @_matmul_bias_act_kernel(%arg0: i32, %arg1: memref<32x128xbf16, #tpu.memory_space<vmem>>, %arg2: memref<128x128xbf16, #tpu.memory_space<vmem>>, %arg3: memref<1x128xf32, #tpu.memory_space<vmem>>, %arg4: memref<32x128xbf16, #tpu.memory_space<vmem>>) attributes {dimension_semantics = [#tpu.dimension_semantics<parallel>], iteration_bounds = array<i64: 1>, scalar_prefetch = 0 : i64, scratch_operands = 0 : i64, tpu.core_type = #tpu.core_type<tc>, window_params = [{transform_indices = @transform_0, window_bounds = array<i64: 32, 128>}, {pipeline_mode = #tpu.pipeline_mode<synchronous>, transform_indices = @transform_1, window_bounds = array<i64: 128, 128>}, {pipeline_mode = #tpu.pipeline_mode<synchronous>, transform_indices = @transform_2, window_bounds = array<i64: 1, 128>}, {transform_indices = @transform_3, window_bounds = array<i64: 32, 128>}]} {
    %c0 = arith.constant 0 : index
    %c0_0 = arith.constant 0 : index
    %0 = vector.load %arg1[%c0, %c0_0] : memref<32x128xbf16, #tpu.memory_space<vmem>>, vector<32x128xbf16>
    %c0_1 = arith.constant 0 : index
    %c0_2 = arith.constant 0 : index
    %1 = vector.load %arg2[%c0_1, %c0_2] : memref<128x128xbf16, #tpu.memory_space<vmem>>, vector<128x128xbf16>
    %cst = arith.constant dense<0.000000e+00> : vector<32x128xf32>
    %2 = tpu.matmul %0, %1, %cst {dimension_numbers = #tpu.dot_dimension_numbers<[1], [0], [0], [1], [0, 0, 1, 1], [], []>} : vector<32x128xbf16>, vector<128x128xbf16>, vector<32x128xf32> -> vector<32x128xf32>
    %c0_3 = arith.constant 0 : index
    %c0_4 = arith.constant 0 : index
    %3 = vector.load %arg3[%c0_3, %c0_4] : memref<1x128xf32, #tpu.memory_space<vmem>>, vector<1x128xf32>
    %4 = vector.broadcast %3 : vector<1x128xf32> to vector<32x128xf32>
    %5 = arith.addf %2, %4 : vector<32x128xf32>
    %6 = arith.truncf %5 : vector<32x128xf32> to vector<32x128xbf16>
    %c0_5 = arith.constant 0 : index
    %c0_6 = arith.constant 0 : index
    %7 = vector.load %arg4[%c0_5, %c0_6] : memref<32x128xbf16, #tpu.memory_space<vmem>>, vector<32x128xbf16>
    tpu.vector_store %arg4[%c0_5, %c0_6], %6 {strides = array<i32>} : memref<32x128xbf16, #tpu.memory_space<vmem>>, vector<32x128xbf16>,
    return
  }
  func.func @transform_0(%arg0: i32) -> (i32, i32) {
    %c0_i32 = arith.constant 0 : i32
    %c0_i32_0 = arith.constant 0 : i32
    return %arg0, %c0_i32 : i32, i32
  }
  func.func @transform_1(%arg0: i32) -> (i32, i32) {
    %c0_i32 = arith.constant 0 : i32
    %c0_i32_0 = arith.constant 0 : i32
    %c0_i32_1 = arith.constant 0 : i32
    return %c0_i32, %c0_i32_0 : i32, i32
  }
  func.func @transform_2(%arg0: i32) -> (i32, i32) {
    %c0_i32 = arith.constant 0 : i32
    %c0_i32_0 = arith.constant 0 : i32
    %c0_i32_1 = arith.constant 0 : i32
    return %c0_i32, %c0_i32_0 : i32, i32
  }
  func.func @transform_3(%arg0: i32) -> (i32, i32) {
    %c0_i32 = arith.constant 0 : i32
    %c0_i32_0 = arith.constant 0 : i32
    return %arg0, %c0_i32 : i32, i32
  }
}

module attributes {stable_mosaic.version = 11 : i64} {
  func.func @_matmul_bias_act_kernel(%arg0: i32, %arg1: memref<32x1152xbf16, #tpu.memory_space<vmem>>, %arg2: memref<1152x128xbf16, #tpu.memory_space<vmem>>, %arg3: memref<1x128xf32, #tpu.memory_space<vmem>>, %arg4: memref<32x128xbf16, #tpu.memory_space<vmem>>) attributes {dimension_semantics = [#tpu.dimension_semantics<parallel>], iteration_bounds = array<i64: 1>, scalar_prefetch = 0 : i64, scratch_operands = 0 : i64, tpu.core_type = #tpu.core_type<tc>, window_params = [{transform_indices = @transform_0, window_bounds = array<i64: 32, 1152>}, {pipeline_mode = #tpu.pipeline_mode<synchronous>, transform_indices = @transform_1, window_bounds = array<i64: 1152, 128>}, {pipeline_mode = #tpu.pipeline_mode<synchronous>, transform_indices = @transform_2, window_bounds = array<i64: 1, 128>}, {transform_indices = @transform_3, window_bounds = array<i64: 32, 128>}]} {
    %c0 = arith.constant 0 : index
    %c0_0 = arith.constant 0 : index
    %0 = vector.load %arg1[%c0, %c0_0] : memref<32x1152xbf16, #tpu.memory_space<vmem>>, vector<32x1152xbf16>
    %c0_1 = arith.constant 0 : index
    %c0_2 = arith.constant 0 : index
    %1 = vector.load %arg2[%c0_1, %c0_2] : memref<1152x128xbf16, #tpu.memory_space<vmem>>, vector<1152x128xbf16>
    %cst = arith.constant dense<0.000000e+00> : vector<32x128xf32>
    %2 = tpu.matmul %0, %1, %cst {dimension_numbers = #tpu.dot_dimension_numbers<[1], [0], [0], [1], [0, 0, 1, 1], [], []>} : vector<32x1152xbf16>, vector<1152x128xbf16>, vector<32x128xf32> -> vector<32x128xf32>
    %c0_3 = arith.constant 0 : index
    %c0_4 = arith.constant 0 : index
    %3 = vector.load %arg3[%c0_3, %c0_4] : memref<1x128xf32, #tpu.memory_space<vmem>>, vector<1x128xf32>
    %4 = vector.broadcast %3 : vector<1x128xf32> to vector<32x128xf32>
    %5 = arith.addf %2, %4 : vector<32x128xf32>
    %cst_5 = arith.constant 0.000000e+00 : f32
    %6 = vector.broadcast %cst_5 : f32 to vector<32x128xf32>
    %7 = arith.maximumf %5, %6 : vector<32x128xf32>
    %8 = arith.truncf %7 : vector<32x128xf32> to vector<32x128xbf16>
    %c0_6 = arith.constant 0 : index
    %c0_7 = arith.constant 0 : index
    %9 = vector.load %arg4[%c0_6, %c0_7] : memref<32x128xbf16, #tpu.memory_space<vmem>>, vector<32x128xbf16>
    tpu.vector_store %arg4[%c0_6, %c0_7], %8 {strides = array<i32>} : memref<32x128xbf16, #tpu.memory_space<vmem>>, vector<32x128xbf16>,
    return
  }
  func.func @transform_0(%arg0: i32) -> (i32, i32) {
    %c0_i32 = arith.constant 0 : i32
    %c0_i32_0 = arith.constant 0 : i32
    return %arg0, %c0_i32 : i32, i32
  }
  func.func @transform_1(%arg0: i32) -> (i32, i32) {
    %c0_i32 = arith.constant 0 : i32
    %c0_i32_0 = arith.constant 0 : i32
    %c0_i32_1 = arith.constant 0 : i32
    return %c0_i32, %c0_i32_0 : i32, i32
  }
  func.func @transform_2(%arg0: i32) -> (i32, i32) {
    %c0_i32 = arith.constant 0 : i32
    %c0_i32_0 = arith.constant 0 : i32
    %c0_i32_1 = arith.constant 0 : i32
    return %c0_i32, %c0_i32_0 : i32, i32
  }
  func.func @transform_3(%arg0: i32) -> (i32, i32) {
    %c0_i32 = arith.constant 0 : i32
    %c0_i32_0 = arith.constant 0 : i32
    return %arg0, %c0_i32 : i32, i32
  }
}

module attributes {stable_mosaic.version = 11 : i64} {
  func.func @_matmul_bias_res_act_kernel(%arg0: i32, %arg1: memref<32x128xbf16, #tpu.memory_space<vmem>>, %arg2: memref<128x128xbf16, #tpu.memory_space<vmem>>, %arg3: memref<1x128xf32, #tpu.memory_space<vmem>>, %arg4: memref<32x128xbf16, #tpu.memory_space<vmem>>, %arg5: memref<32x128xbf16, #tpu.memory_space<vmem>>) attributes {dimension_semantics = [#tpu.dimension_semantics<parallel>], iteration_bounds = array<i64: 1>, scalar_prefetch = 0 : i64, scratch_operands = 0 : i64, tpu.core_type = #tpu.core_type<tc>, window_params = [{transform_indices = @transform_0, window_bounds = array<i64: 32, 128>}, {pipeline_mode = #tpu.pipeline_mode<synchronous>, transform_indices = @transform_1, window_bounds = array<i64: 128, 128>}, {pipeline_mode = #tpu.pipeline_mode<synchronous>, transform_indices = @transform_2, window_bounds = array<i64: 1, 128>}, {transform_indices = @transform_3, window_bounds = array<i64: 32, 128>}, {transform_indices = @transform_4, window_bounds = array<i64: 32, 128>}]} {
    %c0 = arith.constant 0 : index
    %c0_0 = arith.constant 0 : index
    %0 = vector.load %arg1[%c0, %c0_0] : memref<32x128xbf16, #tpu.memory_space<vmem>>, vector<32x128xbf16>
    %c0_1 = arith.constant 0 : index
    %c0_2 = arith.constant 0 : index
    %1 = vector.load %arg2[%c0_1, %c0_2] : memref<128x128xbf16, #tpu.memory_space<vmem>>, vector<128x128xbf16>
    %cst = arith.constant dense<0.000000e+00> : vector<32x128xf32>
    %2 = tpu.matmul %0, %1, %cst {dimension_numbers = #tpu.dot_dimension_numbers<[1], [0], [0], [1], [0, 0, 1, 1], [], []>} : vector<32x128xbf16>, vector<128x128xbf16>, vector<32x128xf32> -> vector<32x128xf32>
    %c0_3 = arith.constant 0 : index
    %c0_4 = arith.constant 0 : index
    %3 = vector.load %arg3[%c0_3, %c0_4] : memref<1x128xf32, #tpu.memory_space<vmem>>, vector<1x128xf32>
    %4 = vector.broadcast %3 : vector<1x128xf32> to vector<32x128xf32>
    %5 = arith.addf %2, %4 : vector<32x128xf32>
    %c0_5 = arith.constant 0 : index
    %c0_6 = arith.constant 0 : index
    %6 = vector.load %arg4[%c0_5, %c0_6] : memref<32x128xbf16, #tpu.memory_space<vmem>>, vector<32x128xbf16>
    %7 = arith.extf %6 : vector<32x128xbf16> to vector<32x128xf32>
    %8 = arith.addf %5, %7 : vector<32x128xf32>
    %cst_7 = arith.constant 0.000000e+00 : f32
    %9 = vector.broadcast %cst_7 : f32 to vector<32x128xf32>
    %10 = arith.maximumf %8, %9 : vector<32x128xf32>
    %11 = arith.truncf %10 : vector<32x128xf32> to vector<32x128xbf16>
    %c0_8 = arith.constant 0 : index
    %c0_9 = arith.constant 0 : index
    %12 = vector.load %arg5[%c0_8, %c0_9] : memref<32x128xbf16, #tpu.memory_space<vmem>>, vector<32x128xbf16>
    tpu.vector_store %arg5[%c0_8, %c0_9], %11 {strides = array<i32>} : memref<32x128xbf16, #tpu.memory_space<vmem>>, vector<32x128xbf16>,
    return
  }
  func.func @transform_0(%arg0: i32) -> (i32, i32) {
    %c0_i32 = arith.constant 0 : i32
    %c0_i32_0 = arith.constant 0 : i32
    return %arg0, %c0_i32 : i32, i32
  }
  func.func @transform_1(%arg0: i32) -> (i32, i32) {
    %c0_i32 = arith.constant 0 : i32
    %c0_i32_0 = arith.constant 0 : i32
    %c0_i32_1 = arith.constant 0 : i32
    return %c0_i32, %c0_i32_0 : i32, i32
  }
  func.func @transform_2(%arg0: i32) -> (i32, i32) {
    %c0_i32 = arith.constant 0 : i32
    %c0_i32_0 = arith.constant 0 : i32
    %c0_i32_1 = arith.constant 0 : i32
    return %c0_i32, %c0_i32_0 : i32, i32
  }
  func.func @transform_3(%arg0: i32) -> (i32, i32) {
    %c0_i32 = arith.constant 0 : i32
    %c0_i32_0 = arith.constant 0 : i32
    return %arg0, %c0_i32 : i32, i32
  }
  func.func @transform_4(%arg0: i32) -> (i32, i32) {
    %c0_i32 = arith.constant 0 : i32
    %c0_i32_0 = arith.constant 0 : i32
    return %arg0, %c0_i32 : i32, i32
  }
}

module attributes {stable_mosaic.version = 11 : i64} {
  func.func @_matmul_bias_act_kernel(%arg0: i32, %arg1: memref<8x1152xbf16, #tpu.memory_space<vmem>>, %arg2: memref<1152x128xbf16, #tpu.memory_space<vmem>>, %arg3: memref<1x128xf32, #tpu.memory_space<vmem>>, %arg4: memref<8x128xbf16, #tpu.memory_space<vmem>>) attributes {dimension_semantics = [#tpu.dimension_semantics<parallel>], iteration_bounds = array<i64: 1>, scalar_prefetch = 0 : i64, scratch_operands = 0 : i64, tpu.core_type = #tpu.core_type<tc>, window_params = [{transform_indices = @transform_0, window_bounds = array<i64: 8, 1152>}, {pipeline_mode = #tpu.pipeline_mode<synchronous>, transform_indices = @transform_1, window_bounds = array<i64: 1152, 128>}, {pipeline_mode = #tpu.pipeline_mode<synchronous>, transform_indices = @transform_2, window_bounds = array<i64: 1, 128>}, {transform_indices = @transform_3, window_bounds = array<i64: 8, 128>}]} {
    %c0 = arith.constant 0 : index
    %c0_0 = arith.constant 0 : index
    %0 = vector.load %arg1[%c0, %c0_0] : memref<8x1152xbf16, #tpu.memory_space<vmem>>, vector<8x1152xbf16>
    %c0_1 = arith.constant 0 : index
    %c0_2 = arith.constant 0 : index
    %1 = vector.load %arg2[%c0_1, %c0_2] : memref<1152x128xbf16, #tpu.memory_space<vmem>>, vector<1152x128xbf16>
    %cst = arith.constant dense<0.000000e+00> : vector<8x128xf32>
    %2 = tpu.matmul %0, %1, %cst {dimension_numbers = #tpu.dot_dimension_numbers<[1], [0], [0], [1], [0, 0, 1, 1], [], []>} : vector<8x1152xbf16>, vector<1152x128xbf16>, vector<8x128xf32> -> vector<8x128xf32>
    %c0_3 = arith.constant 0 : index
    %c0_4 = arith.constant 0 : index
    %3 = vector.load %arg3[%c0_3, %c0_4] : memref<1x128xf32, #tpu.memory_space<vmem>>, vector<1x128xf32>
    %4 = vector.broadcast %3 : vector<1x128xf32> to vector<8x128xf32>
    %5 = arith.addf %2, %4 : vector<8x128xf32>
    %cst_5 = arith.constant 0.000000e+00 : f32
    %6 = vector.broadcast %cst_5 : f32 to vector<8x128xf32>
    %7 = arith.maximumf %5, %6 : vector<8x128xf32>
    %8 = arith.truncf %7 : vector<8x128xf32> to vector<8x128xbf16>
    %c0_6 = arith.constant 0 : index
    %c0_7 = arith.constant 0 : index
    %9 = vector.load %arg4[%c0_6, %c0_7] : memref<8x128xbf16, #tpu.memory_space<vmem>>, vector<8x128xbf16>
    tpu.vector_store %arg4[%c0_6, %c0_7], %8 {strides = array<i32>} : memref<8x128xbf16, #tpu.memory_space<vmem>>, vector<8x128xbf16>,
    return
  }
  func.func @transform_0(%arg0: i32) -> (i32, i32) {
    %c0_i32 = arith.constant 0 : i32
    %c0_i32_0 = arith.constant 0 : i32
    return %arg0, %c0_i32 : i32, i32
  }
  func.func @transform_1(%arg0: i32) -> (i32, i32) {
    %c0_i32 = arith.constant 0 : i32
    %c0_i32_0 = arith.constant 0 : i32
    %c0_i32_1 = arith.constant 0 : i32
    return %c0_i32, %c0_i32_0 : i32, i32
  }
  func.func @transform_2(%arg0: i32) -> (i32, i32) {
    %c0_i32 = arith.constant 0 : i32
    %c0_i32_0 = arith.constant 0 : i32
    %c0_i32_1 = arith.constant 0 : i32
    return %c0_i32, %c0_i32_0 : i32, i32
  }
  func.func @transform_3(%arg0: i32) -> (i32, i32) {
    %c0_i32 = arith.constant 0 : i32
    %c0_i32_0 = arith.constant 0 : i32
    return %arg0, %c0_i32 : i32, i32
  }
}

module attributes {stable_mosaic.version = 11 : i64} {
  func.func @_gap_fc_kernel(%arg0: i32, %arg1: memref<2x4x128xbf16, #tpu.memory_space<vmem>>, %arg2: memref<128x10xf32, #tpu.memory_space<vmem>>, %arg3: memref<1x10xf32, #tpu.memory_space<vmem>>, %arg4: memref<2x10xf32, #tpu.memory_space<vmem>>) attributes {dimension_semantics = [#tpu.dimension_semantics<arbitrary>], iteration_bounds = array<i64: 1>, scalar_prefetch = 0 : i64, scratch_operands = 0 : i64, tpu.core_type = #tpu.core_type<tc>, window_params = [{pipeline_mode = #tpu.pipeline_mode<synchronous>, transform_indices = @transform_0, window_bounds = array<i64: 2, 4, 128>}, {pipeline_mode = #tpu.pipeline_mode<synchronous>, transform_indices = @transform_1, window_bounds = array<i64: 128, 10>}, {pipeline_mode = #tpu.pipeline_mode<synchronous>, transform_indices = @transform_2, window_bounds = array<i64: 1, 10>}, {pipeline_mode = #tpu.pipeline_mode<synchronous>, transform_indices = @transform_3, window_bounds = array<i64: 2, 10>}]} {
    %c0 = arith.constant 0 : index
    %c0_0 = arith.constant 0 : index
    %c0_1 = arith.constant 0 : index
    %0 = vector.load %arg1[%c0, %c0_0, %c0_1] : memref<2x4x128xbf16, #tpu.memory_space<vmem>>, vector<2x4x128xbf16>
    %1 = arith.extf %0 : vector<2x4x128xbf16> to vector<2x4x128xf32>
    %cst = arith.constant dense<0.000000e+00> : vector<2x128xf32>
    %2 = vector.multi_reduction <add>, %1, %cst [1] : vector<2x4x128xf32> to vector<2x128xf32>
    %cst_2 = arith.constant 2.500000e-01 : f32
    %3 = vector.broadcast %cst_2 : f32 to vector<2x128xf32>
    %4 = arith.mulf %2, %3 : vector<2x128xf32>
    %c0_3 = arith.constant 0 : index
    %c0_4 = arith.constant 0 : index
    %5 = vector.load %arg2[%c0_3, %c0_4] : memref<128x10xf32, #tpu.memory_space<vmem>>, vector<128x10xf32>
    %cst_5 = arith.constant dense<0.000000e+00> : vector<2x10xf32>
    %6 = tpu.matmul %4, %5, %cst_5 {dimension_numbers = #tpu.dot_dimension_numbers<[1], [0], [0], [1], [0, 0, 1, 1], [], []>} : vector<2x128xf32>, vector<128x10xf32>, vector<2x10xf32> -> vector<2x10xf32>
    %c0_6 = arith.constant 0 : index
    %c0_7 = arith.constant 0 : index
    %7 = vector.load %arg3[%c0_6, %c0_7] : memref<1x10xf32, #tpu.memory_space<vmem>>, vector<1x10xf32>
    %8 = vector.broadcast %7 : vector<1x10xf32> to vector<2x10xf32>
    %9 = arith.addf %6, %8 : vector<2x10xf32>
    %c0_8 = arith.constant 0 : index
    %c0_9 = arith.constant 0 : index
    %10 = vector.load %arg4[%c0_8, %c0_9] : memref<2x10xf32, #tpu.memory_space<vmem>>, vector<2x10xf32>
    tpu.vector_store %arg4[%c0_8, %c0_9], %9 {strides = array<i32>} : memref<2x10xf32, #tpu.memory_space<vmem>>, vector<2x10xf32>,
    return
  }
  func.func @transform_0(%arg0: i32) -> (i32, i32, i32) {
    %c0_i32 = arith.constant 0 : i32
    %c0_i32_0 = arith.constant 0 : i32
    %c0_i32_1 = arith.constant 0 : i32
    %c0_i32_2 = arith.constant 0 : i32
    return %c0_i32, %c0_i32_0, %c0_i32_1 : i32, i32, i32
  }
  func.func @transform_1(%arg0: i32) -> (i32, i32) {
    %c0_i32 = arith.constant 0 : i32
    %c0_i32_0 = arith.constant 0 : i32
    %c0_i32_1 = arith.constant 0 : i32
    return %c0_i32, %c0_i32_0 : i32, i32
  }
  func.func @transform_2(%arg0: i32) -> (i32, i32) {
    %c0_i32 = arith.constant 0 : i32
    %c0_i32_0 = arith.constant 0 : i32
    %c0_i32_1 = arith.constant 0 : i32
    return %c0_i32, %c0_i32_0 : i32, i32
  }
  func.func @transform_3(%arg0: i32) -> (i32, i32) {
    %c0_i32 = arith.constant 0 : i32
    %c0_i32_0 = arith.constant 0 : i32
    %c0_i32_1 = arith.constant 0 : i32
    return %c0_i32, %c0_i32_0 : i32, i32
  }
}

</mosaic_0001>

<bundles_post_ra>
// kernel: byobnet_forward.9
= control target key start
LH: loop header
LB: loop body
LE: loop exit
PB: predicated region body
PF: predicated region fallthrough
CT: control target
= control target key end

     0   :  { %s1093_s12 = smov 0   ;;  %s1212_s0 = inlined_call_operand.vmem [shape: bf16[512,27], index: 0, kind: input, shape index: {}]   ;;  %s1213_s1 = inlined_call_operand.vmem [shape: bf16[27,128], index: 1, kind: input, shape index: {}]   ;;  %s1214_s2 = inlined_call_operand.vmem [shape: f32[1,128], index: 2, kind: input, shape index: {}]   ;;  %s1215_s3 = inlined_call_operand.vmem [shape: bf16[512,128], index: 3, kind: output, shape index: {}]  }
   0x1 LB: > { %s774_s13 = sadd.s32 4294967295, %s1070_s12   ;;  %p778_p0 = scmp.ge.s32.totalorder %s1070_s12, 1  ;;  %s1070_s12 = sphi %s1093_s12, %s13_s12  }
   0x2   : > { %p138_p1 = scmp.lt.s32.totalorder %s1070_s12, 3 }
   0x4   : > { %p139_p2 = pnand %p778_p0, %p138_p1 }
   0x5   : > { %s779_s16 = sshll.u32 (!%p139_p2), %s774_s13, 5 }
   0x6   : > { %142 = sbr.rel (%p139_p2) target bundleno = 254 (0xfe), region = 32  ;;  %p163_p3 = scmp.lt.s32.totalorder (!%p139_p2), %s779_s16, 63 }
   0xb   : > { %v1046_v0 = vld [vmem:[%s1213_s1 + $0x8] sm:$0x3f]   ;;  %vm358_vm0 = vcmask 1044480   ;;  %vm359_vm1 = vcmask 1045504   ;;  %v1072_v1 = vmov 65535   ;;  %v1047_v5 = vld [vmem:[%s1213_s1] sm:$0xff]  }
   0xc   : > { %v360_v2 = vsel %vm358_vm0, 4294967295, %v1072_v1  ;;  %s1217_s16 = smov (!%p163_p3, %s779_s16), 63  ;;  %vm309_vm2 = vcmask 220160   ;;  %v1152_v22 = vld [vmem:[%s1214_s2] ss:$0 sm:$0xff] }
   0xd   : > { %v361_v3 = vsel %vm359_vm1, %v360_v2, 0  ;;  %s780_s19 = sshll.u32 %s1217_s16, 2 }
   0xe   : > { %v363_v4 = vand.u32 %v1046_v0, %v361_v3  ;;  %s1115_s22 = scalar_lea.vmem %s1212_s0, %s780_s19  ;;  %s1167_s27 = scalar_lea.vmem %s1215_s3, %s780_s19 }
   0xf   : > { %v1048_v6 = vld [vmem:[%s1115_s22] sm:$0xff]   ;;  %v1050_v8 = vld [vmem:[%s1115_s22 + $0x8] sm:$0xff]   ;;  %v1052_v10 = vld [vmem:[%s1115_s22 + $0x10] sm:$0xff]  }
  0x10   : > { %997 = vmatprep.subr.bf16.mxu0 %v363_v4  ;;  %1033 = vmatprep.subr.bf16.mxu1 %v363_v4  ;;  %v1049_v7 = vld [vmem:[%s1115_s22 + $0x40] sm:$0xff]   ;;  %v1051_v9 = vld [vmem:[%s1115_s22 + $0x48] sm:$0xff]   ;;  %v1053_v11 = vld [vmem:[%s1115_s22 + $0x50] sm:$0xff]  }
  0x11   : > { %998 = vmatpush3.bf16.msra.mxu0 %v363_v4  ;;  %1035 = vmatpush3.bf16.msra.mxu1 %v363_v4  ;;  %v1054_v12 = vld [vmem:[%s1115_s22 + $0x18] sm:$0xff]   ;;  %v1056_v14 = vld [vmem:[%s1115_s22 + $0x20] sm:$0xff]   ;;  %v1058_v16 = vld [vmem:[%s1115_s22 + $0x28] sm:$0xff]  }
  0x12   : > { %999 = vmatprep.subr.bf16.mxu0 %v1047_v5  ;;  %1034 = vmatprep.subr.bf16.mxu1 %v1047_v5  ;;  %v1055_v13 = vld [vmem:[%s1115_s22 + $0x58] sm:$0xff]   ;;  %v1057_v15 = vld [vmem:[%s1115_s22 + $0x60] sm:$0xff]   ;;  %v1059_v17 = vld [vmem:[%s1115_s22 + $0x68] sm:$0xff]  }
  0x13   : > { %1001 = vmatprep.mubr.msk.bf16.mxu0 %vm309_vm2, %v1048_v6  ;;  %1017 = vmatprep.mubr.msk.bf16.mxu1 %vm309_vm2, %v1049_v7  ;;  %v1060_v18 = vld [vmem:[%s1115_s22 + $0x30] sm:$0xff]   ;;  %v1062_v20 = vld [vmem:[%s1115_s22 + $0x38] sm:$0xff]  }
  0x14   : > { %v1061_v19 = vld [vmem:[%s1115_s22 + $0x70] sm:$0xff]   ;;  %v1063_v21 = vld [vmem:[%s1115_s22 + $0x78] sm:$0xff]  }
  0x15   : > { %1000 = vmatpush3.bf16.msra.mxu0 %v1047_v5  ;;  %1036 = vmatpush3.bf16.msra.mxu1 %v1047_v5 }
  0x18   : > { %1002 = vmatmul.mubr.msk.bf16.vlgmr.msra.gmra.mxu0 %vm309_vm2, %v1050_v8  ;;  %1018 = vmatmul.mubr.msk.bf16.vlgmr.msra.gmra.mxu1 %vm309_vm2, %v1051_v9 }
  0x19   : > { %1005 = vmatprep.mubr.msk.bf16.mxu0 %vm309_vm2, %v1052_v10  ;;  %1021 = vmatprep.mubr.msk.bf16.mxu1 %vm309_vm2, %v1053_v11 }
  0x20   : > { %1006 = vmatmul.mubr.msk.bf16.gmra.mxu0 %vm309_vm2, %v1054_v12  ;;  %1022 = vmatmul.mubr.msk.bf16.gmra.mxu1 %vm309_vm2, %v1055_v13 }
  0x21   : > { %1009 = vmatprep.mubr.msk.bf16.mxu0 %vm309_vm2, %v1056_v14  ;;  %1025 = vmatprep.mubr.msk.bf16.mxu1 %vm309_vm2, %v1057_v15 }
  0x28   : > { %1010 = vmatmul.mubr.msk.bf16.gmra.mxu0 %vm309_vm2, %v1058_v16  ;;  %1026 = vmatmul.mubr.msk.bf16.gmra.mxu1 %vm309_vm2, %v1059_v17 }
  0x29   : > { %1013 = vmatprep.mubr.msk.bf16.mxu0 %vm309_vm2, %v1060_v18  ;;  %1029 = vmatprep.mubr.msk.bf16.mxu1 %vm309_vm2, %v1061_v19 }
  0x30   : > { %1014 = vmatmul.mubr.msk.bf16.gmra.mxu0 %vm309_vm2, %v1062_v20  ;;  %1030 = vmatmul.mubr.msk.bf16.gmra.mxu1 %vm309_vm2, %v1063_v21 }
  0xd8   : > { %v1003_v23 = vpop.f32.mrf.mxu0  ;;  %v1019_v24 = vpop.f32.mrf.mxu1 }
  0xd9   : > { %v408_v25 = vadd.f32 %v1003_v23, %v1152_v22  ;;  %v472_v26 = vadd.f32 %v1019_v24, %v1152_v22 }
  0xda   : > { %v399_v27 = vpop.f32.mrf.mxu0  ;;  %v463_v28 = vpop.f32.mrf.mxu1 }
  0xdb   : > { %v400_v29 = vadd.f32 %v1152_v22, %v399_v27  ;;  %v464_v30 = vadd.f32 %v1152_v22, %v463_v28  ;;  %v528_v35 = vmax.f32 %v408_v25, 0.0  ;;  %v544_v36 = vmax.f32 %v472_v26, 0.0 }
  0xdc   : > { %v1004_v31 = vpop.f32.mrf.mxu0  ;;  %v1020_v32 = vpop.f32.mrf.mxu1 }
  0xdd   : > { %v411_v33 = vadd.f32 %v1004_v31, %v1152_v22  ;;  %v475_v34 = vadd.f32 %v1020_v32, %v1152_v22  ;;  %v526_v43 = vmax.f32 %v400_v29, 0.0  ;;  %v542_v44 = vmax.f32 %v464_v30, 0.0 }
  0xde   : > { %v402_v37 = vpop.f32.mrf.mxu0  ;;  %v466_v38 = vpop.f32.mrf.mxu1 }
  0xdf   : > { %v529_v39 = vmax.f32 %v411_v33, 0.0  ;;  %v545_v40 = vmax.f32 %v475_v34, 0.0  ;;  %v403_v41 = vadd.f32 %v1152_v22, %v402_v37  ;;  %v467_v42 = vadd.f32 %v1152_v22, %v466_v38 }
  0xe0   : > { %v1007_v45 = vpop.f32.mrf.mxu0  ;;  %v1023_v46 = vpop.f32.mrf.mxu1 }
  0xe1   : > { %v892_v47 = vpack.c.bf16 %v529_v39, %v528_v35  ;;  %v932_v48 = vpack.c.bf16 %v545_v40, %v544_v36  ;;  %v527_v49 = vmax.f32 %v403_v41, 0.0  ;;  %v543_v50 = vmax.f32 %v467_v42, 0.0 }
  0xe2   : > { %v424_v51 = vadd.f32 %v1007_v45, %v1152_v22  ;;  %v488_v52 = vadd.f32 %v1023_v46, %v1152_v22  ;;  %v415_v53 = vpop.f32.mrf.mxu0  ;;  %v479_v54 = vpop.f32.mrf.mxu1 }
  0xe3   : > { %964 = vst [vmem:[%s1167_s27 + $0x8] sm:$0xff] %v892_v47   ;;  %972 = vst [vmem:[%s1167_s27 + $0x48] sm:$0xff] %v932_v48   ;;  %v887_v55 = vpack.c.bf16 %v527_v49, %v526_v43  ;;  %v927_v56 = vpack.c.bf16 %v543_v50, %v542_v44  ;;  %v416_v57 = vadd.f32 %v1152_v22, %v415_v53 }
  0xe4   : > { %v480_v58 = vadd.f32 %v1152_v22, %v479_v54  ;;  %v1008_v59 = vpop.f32.mrf.mxu0  ;;  %v1024_v60 = vpop.f32.mrf.mxu1  ;;  %v532_v63 = vmax.f32 %v424_v51, 0.0  ;;  %v548_v0 = vmax.f32 %v488_v52, 0.0 }
  0xe5   : > { %888 = vst [vmem:[%s1167_s27] sm:$0xff] %v887_v55   ;;  %971 = vst [vmem:[%s1167_s27 + $0x40] sm:$0xff] %v927_v56   ;;  %v427_v61 = vadd.f32 %v1008_v59, %v1152_v22  ;;  %v491_v62 = vadd.f32 %v1024_v60, %v1152_v22  ;;  %v530_v7 = vmax.f32 %v416_v57, 0.0 }
  0xe6   : > { %v418_v1 = vpop.f32.mrf.mxu0  ;;  %v482_v2 = vpop.f32.mrf.mxu1  ;;  %v546_v8 = vmax.f32 %v480_v58, 0.0 }
  0xe7   : > { %v533_v3 = vmax.f32 %v427_v61, 0.0  ;;  %v549_v4 = vmax.f32 %v491_v62, 0.0  ;;  %v419_v5 = vadd.f32 %v1152_v22, %v418_v1  ;;  %v483_v6 = vadd.f32 %v1152_v22, %v482_v2 }
  0xe8   : > { %v1011_v9 = vpop.f32.mrf.mxu0  ;;  %v1027_v10 = vpop.f32.mrf.mxu1 }
  0xe9   : > { %v902_v11 = vpack.c.bf16 %v533_v3, %v532_v63  ;;  %v942_v12 = vpack.c.bf16 %v549_v4, %v548_v0  ;;  %v531_v13 = vmax.f32 %v419_v5, 0.0  ;;  %v547_v14 = vmax.f32 %v483_v6, 0.0 }
  0xea   : > { %v440_v15 = vadd.f32 %v1011_v9, %v1152_v22  ;;  %v504_v16 = vadd.f32 %v1027_v10, %v1152_v22  ;;  %v431_v17 = vpop.f32.mrf.mxu0  ;;  %v495_v18 = vpop.f32.mrf.mxu1 }
  0xeb   : > { %966 = vst [vmem:[%s1167_s27 + $0x18] sm:$0xff] %v902_v11   ;;  %974 = vst [vmem:[%s1167_s27 + $0x58] sm:$0xff] %v942_v12   ;;  %v897_v19 = vpack.c.bf16 %v531_v13, %v530_v7  ;;  %v937_v20 = vpack.c.bf16 %v547_v14, %v546_v8  ;;  %v432_v21 = vadd.f32 %v1152_v22, %v431_v17 }
  0xec   : > { %v496_v23 = vadd.f32 %v1152_v22, %v495_v18  ;;  %v1012_v24 = vpop.f32.mrf.mxu0  ;;  %v1028_v25 = vpop.f32.mrf.mxu1  ;;  %v536_v28 = vmax.f32 %v440_v15, 0.0  ;;  %v552_v29 = vmax.f32 %v504_v16, 0.0 }
  0xed   : > { %965 = vst [vmem:[%s1167_s27 + $0x10] sm:$0xff] %v897_v19   ;;  %973 = vst [vmem:[%s1167_s27 + $0x50] sm:$0xff] %v937_v20   ;;  %v443_v26 = vadd.f32 %v1012_v24, %v1152_v22  ;;  %v507_v27 = vadd.f32 %v1028_v25, %v1152_v22  ;;  %v534_v36 = vmax.f32 %v432_v21, 0.0 }
  0xee   : > { %v434_v30 = vpop.f32.mrf.mxu0  ;;  %v498_v31 = vpop.f32.mrf.mxu1  ;;  %v550_v37 = vmax.f32 %v496_v23, 0.0 }
  0xef   : > { %v537_v32 = vmax.f32 %v443_v26, 0.0  ;;  %v553_v33 = vmax.f32 %v507_v27, 0.0  ;;  %v435_v34 = vadd.f32 %v1152_v22, %v434_v30  ;;  %v499_v35 = vadd.f32 %v1152_v22, %v498_v31 }
  0xf0   : > { %v1015_v38 = vpop.f32.mrf.mxu0  ;;  %v1031_v39 = vpop.f32.mrf.mxu1 }
  0xf1   : > { %v912_v40 = vpack.c.bf16 %v537_v32, %v536_v28  ;;  %v952_v41 = vpack.c.bf16 %v553_v33, %v552_v29  ;;  %v535_v42 = vmax.f32 %v435_v34, 0.0  ;;  %v551_v43 = vmax.f32 %v499_v35, 0.0 }
  0xf2   : > { %v456_v44 = vadd.f32 %v1015_v38, %v1152_v22  ;;  %v520_v45 = vadd.f32 %v1031_v39, %v1152_v22  ;;  %v447_v46 = vpop.f32.mrf.mxu0  ;;  %v511_v47 = vpop.f32.mrf.mxu1 }
  0xf3   : > { %968 = vst [vmem:[%s1167_s27 + $0x28] sm:$0xff] %v912_v40   ;;  %976 = vst [vmem:[%s1167_s27 + $0x68] sm:$0xff] %v952_v41   ;;  %v907_v48 = vpack.c.bf16 %v535_v42, %v534_v36  ;;  %v947_v49 = vpack.c.bf16 %v551_v43, %v550_v37  ;;  %v448_v50 = vadd.f32 %v1152_v22, %v447_v46 }
  0xf4   : > { %v512_v51 = vadd.f32 %v1152_v22, %v511_v47  ;;  %v1016_v52 = vpop.f32.mrf.mxu0  ;;  %v1032_v53 = vpop.f32.mrf.mxu1  ;;  %v540_v56 = vmax.f32 %v456_v44, 0.0  ;;  %v556_v57 = vmax.f32 %v520_v45, 0.0 }
  0xf5   : > { %967 = vst [vmem:[%s1167_s27 + $0x20] sm:$0xff] %v907_v48   ;;  %975 = vst [vmem:[%s1167_s27 + $0x60] sm:$0xff] %v947_v49   ;;  %v459_v54 = vadd.f32 %v1016_v52, %v1152_v22  ;;  %v523_v55 = vadd.f32 %v1032_v53, %v1152_v22  ;;  %v538_v0 = vmax.f32 %v448_v50, 0.0 }
  0xf6   : > { %v450_v58 = vpop.f32.mrf.mxu0  ;;  %v514_v59 = vpop.f32.mrf.mxu1  ;;  %v554_v1 = vmax.f32 %v512_v51, 0.0 }
  0xf7   : > { %v541_v60 = vmax.f32 %v459_v54, 0.0  ;;  %v557_v61 = vmax.f32 %v523_v55, 0.0  ;;  %v451_v62 = vadd.f32 %v1152_v22, %v450_v58  ;;  %v515_v63 = vadd.f32 %v1152_v22, %v514_v59 }
  0xf9   : > { %v922_v2 = vpack.c.bf16 %v541_v60, %v540_v56  ;;  %v962_v3 = vpack.c.bf16 %v557_v61, %v556_v57  ;;  %v539_v4 = vmax.f32 %v451_v62, 0.0  ;;  %v555_v5 = vmax.f32 %v515_v63, 0.0 }
  0xfb   : > { %970 = vst [vmem:[%s1167_s27 + $0x38] sm:$0xff] %v922_v2   ;;  %978 = vst [vmem:[%s1167_s27 + $0x78] sm:$0xff] %v962_v3   ;;  %v917_v6 = vpack.c.bf16 %v539_v4, %v538_v0  ;;  %v957_v7 = vpack.c.bf16 %v555_v5, %v554_v1 }
  0xfd   : > { %969 = vst [vmem:[%s1167_s27 + $0x30] sm:$0xff] %v917_v6   ;;  %977 = vst [vmem:[%s1167_s27 + $0x70] sm:$0xff] %v957_v7  }
  0xfe PF: > { %s13_s12 = sadd.s32 1, %s1070_s12  }
  0xff   : > { %p10_p4 = scmp.ge.s32.totalorder %s13_s12, 4  }
 0x101   :  { %12 = sbr.rel (!%p10_p4) target bundleno = 1 (0x1), region = 62 }

// kernel: byobnet_forward.13
= control target key start
LH: loop header
LB: loop body
LE: loop exit
PB: predicated region body
PF: predicated region fallthrough
CT: control target
= control target key end

     0   :  { %s618_s1 = inlined_call_operand.vmem [shape: bf16[128,128], index: 1, kind: input, shape index: {}]   ;;  %s619_s0 = inlined_call_operand.vmem [shape: bf16[128,128], index: 0, kind: input, shape index: {}]   ;;  %s620_s2 = inlined_call_operand.vmem [shape: f32[1,128], index: 2, kind: input, shape index: {}]   ;;  %s621_s3 = inlined_call_operand.vmem [shape: bf16[128,128], index: 3, kind: output, shape index: {}]  }
   0x1   :  { %v507_v0 = vld [vmem:[%s618_s1 + $0x38] sm:$0xff]   ;;  %v508_v1 = vld [vmem:[%s618_s1 + $0x30] sm:$0xff]   ;;  %v509_v2 = vld [vmem:[%s618_s1 + $0x28] sm:$0xff]  }
   0x2   :  { %459 = vmatprep.subr.bf16.mxu0 %v507_v0  ;;  %491 = vmatprep.subr.bf16.mxu1 %v507_v0  ;;  %v510_v3 = vld [vmem:[%s618_s1 + $0x20] sm:$0xff]   ;;  %v511_v6 = vld [vmem:[%s618_s1 + $0x18] sm:$0xff]   ;;  %v512_v7 = vld [vmem:[%s618_s1 + $0x10] sm:$0xff]  }
   0x3   :  { %460 = vmatpush3.bf16.msra.mxu0 %v507_v0  ;;  %499 = vmatpush3.bf16.msra.mxu1 %v507_v0  ;;  %v515_v4 = vld [vmem:[%s619_s0] sm:$0xff]   ;;  %v513_v8 = vld [vmem:[%s618_s1 + $0x8] sm:$0xff]   ;;  %v519_v12 = vld [vmem:[%s619_s0 + $0x10] sm:$0xff]  }
   0x4   :  { %461 = vmatprep.subr.bf16.mxu0 %v508_v1  ;;  %492 = vmatprep.subr.bf16.mxu1 %v508_v1  ;;  %v516_v5 = vld [vmem:[%s619_s0 + $0x20] sm:$0xff]   ;;  %v517_v10 = vld [vmem:[%s619_s0 + $0x8] sm:$0xff]   ;;  %v520_v13 = vld [vmem:[%s619_s0 + $0x30] sm:$0xff]  }
   0x5   :  { %475 = vmatprep.mubr.bf16.mxu0 %v515_v4  ;;  %483 = vmatprep.mubr.bf16.mxu1 %v516_v5  ;;  %v514_v9 = vld [vmem:[%s618_s1] sm:$0xff]   ;;  %v518_v11 = vld [vmem:[%s619_s0 + $0x28] sm:$0xff]   ;;  %v521_v14 = vld [vmem:[%s619_s0 + $0x18] sm:$0xff]  }
   0x6   :  { %v522_v15 = vld [vmem:[%s619_s0 + $0x38] sm:$0xff]   ;;  %v347_v16 = vld [vmem:[%s620_s2] ss:$0 sm:$0xff] }
   0x7   :  { %462 = vmatpush3.bf16.msra.mxu0 %v508_v1  ;;  %500 = vmatpush3.bf16.msra.mxu1 %v508_v1 }
   0x8   :  { %463 = vmatprep.subr.bf16.mxu0 %v509_v2  ;;  %493 = vmatprep.subr.bf16.mxu1 %v509_v2 }
   0xb   :  { %464 = vmatpush3.bf16.msra.mxu0 %v509_v2  ;;  %501 = vmatpush3.bf16.msra.mxu1 %v509_v2 }
   0xc   :  { %465 = vmatprep.subr.bf16.mxu0 %v510_v3  ;;  %494 = vmatprep.subr.bf16.mxu1 %v510_v3 }
   0xf   :  { %466 = vmatpush3.bf16.msra.mxu0 %v510_v3  ;;  %502 = vmatpush3.bf16.msra.mxu1 %v510_v3 }
  0x10   :  { %467 = vmatprep.subr.bf16.mxu0 %v511_v6  ;;  %495 = vmatprep.subr.bf16.mxu1 %v511_v6 }
  0x13   :  { %468 = vmatpush3.bf16.msra.mxu0 %v511_v6  ;;  %503 = vmatpush3.bf16.msra.mxu1 %v511_v6 }
  0x14   :  { %469 = vmatprep.subr.bf16.mxu0 %v512_v7  ;;  %496 = vmatprep.subr.bf16.mxu1 %v512_v7 }
  0x17   :  { %470 = vmatpush3.bf16.msra.mxu0 %v512_v7  ;;  %504 = vmatpush3.bf16.msra.mxu1 %v512_v7 }
  0x18   :  { %471 = vmatprep.subr.bf16.mxu0 %v513_v8  ;;  %497 = vmatprep.subr.bf16.mxu1 %v513_v8 }
  0x1b   :  { %472 = vmatpush3.bf16.msra.mxu0 %v513_v8  ;;  %505 = vmatpush3.bf16.msra.mxu1 %v513_v8 }
  0x1c   :  { %473 = vmatprep.subr.bf16.mxu0 %v514_v9  ;;  %498 = vmatprep.subr.bf16.mxu1 %v514_v9 }
  0x1f   :  { %474 = vmatpush3.bf16.msra.mxu0 %v514_v9  ;;  %506 = vmatpush3.bf16.msra.mxu1 %v514_v9 }
  0x22   :  { %476 = vmatmul.mubr.bf16.vlgmr.msra.gmra.mxu0 %v517_v10  ;;  %484 = vmatmul.mubr.bf16.vlgmr.msra.gmra.mxu1 %v518_v11 }
  0x23   :  { %479 = vmatprep.mubr.bf16.mxu0 %v519_v12  ;;  %487 = vmatprep.mubr.bf16.mxu1 %v520_v13 }
  0x2a   :  { %480 = vmatmul.mubr.bf16.gmra.mxu0 %v521_v14  ;;  %488 = vmatmul.mubr.bf16.gmra.mxu1 %v522_v15 }
  0xe2   :  { %v477_v17 = vpop.f32.mrf.mxu0  ;;  %v485_v18 = vpop.f32.mrf.mxu1 }
  0xe3   :  { %v193_v19 = vadd.f32 %v477_v17, %v347_v16  ;;  %v225_v20 = vadd.f32 %v485_v18, %v347_v16 }
  0xe4   :  { %v184_v21 = vpop.f32.mrf.mxu0  ;;  %v216_v22 = vpop.f32.mrf.mxu1 }
  0xe5   :  { %v185_v23 = vadd.f32 %v347_v16, %v184_v21  ;;  %v217_v24 = vadd.f32 %v347_v16, %v216_v22  ;;  %v249_v29 = vmax.f32 %v193_v19, 0.0  ;;  %v257_v30 = vmax.f32 %v225_v20, 0.0 }
  0xe6   :  { %v478_v25 = vpop.f32.mrf.mxu0  ;;  %v486_v26 = vpop.f32.mrf.mxu1 }
  0xe7   :  { %v196_v27 = vadd.f32 %v478_v25, %v347_v16  ;;  %v228_v28 = vadd.f32 %v486_v26, %v347_v16  ;;  %v247_v37 = vmax.f32 %v185_v23, 0.0  ;;  %v255_v38 = vmax.f32 %v217_v24, 0.0 }
  0xe8   :  { %v187_v31 = vpop.f32.mrf.mxu0  ;;  %v219_v32 = vpop.f32.mrf.mxu1 }
  0xe9   :  { %v250_v33 = vmax.f32 %v196_v27, 0.0  ;;  %v258_v34 = vmax.f32 %v228_v28, 0.0  ;;  %v188_v35 = vadd.f32 %v347_v16, %v187_v31  ;;  %v220_v36 = vadd.f32 %v347_v16, %v219_v32 }
  0xea   :  { %v481_v39 = vpop.f32.mrf.mxu0  ;;  %v489_v40 = vpop.f32.mrf.mxu1 }
  0xeb   :  { %v404_v41 = vpack.c.bf16 %v250_v33, %v249_v29  ;;  %v424_v42 = vpack.c.bf16 %v258_v34, %v257_v30  ;;  %v248_v43 = vmax.f32 %v188_v35, 0.0  ;;  %v256_v44 = vmax.f32 %v220_v36, 0.0 }
  0xec   :  { %v209_v45 = vadd.f32 %v481_v39, %v347_v16  ;;  %v241_v46 = vadd.f32 %v489_v40, %v347_v16  ;;  %v200_v47 = vpop.f32.mrf.mxu0  ;;  %v232_v48 = vpop.f32.mrf.mxu1 }
  0xed   :  { %436 = vst [vmem:[%s621_s3 + $0x8] sm:$0xff] %v404_v41   ;;  %440 = vst [vmem:[%s621_s3 + $0x28] sm:$0xff] %v424_v42   ;;  %v399_v49 = vpack.c.bf16 %v248_v43, %v247_v37  ;;  %v419_v50 = vpack.c.bf16 %v256_v44, %v255_v38  ;;  %v201_v51 = vadd.f32 %v347_v16, %v200_v47 }
  0xee   :  { %v233_v52 = vadd.f32 %v347_v16, %v232_v48  ;;  %v482_v53 = vpop.f32.mrf.mxu0  ;;  %v490_v54 = vpop.f32.mrf.mxu1  ;;  %v253_v57 = vmax.f32 %v209_v45, 0.0  ;;  %v261_v58 = vmax.f32 %v241_v46, 0.0 }
  0xef   :  { %400 = vst [vmem:[%s621_s3] sm:$0xff] %v399_v49   ;;  %439 = vst [vmem:[%s621_s3 + $0x20] sm:$0xff] %v419_v50   ;;  %v212_v55 = vadd.f32 %v482_v53, %v347_v16  ;;  %v244_v56 = vadd.f32 %v490_v54, %v347_v16  ;;  %v251_v1 = vmax.f32 %v201_v51, 0.0 }
  0xf0   :  { %v203_v59 = vpop.f32.mrf.mxu0  ;;  %v235_v60 = vpop.f32.mrf.mxu1  ;;  %v259_v2 = vmax.f32 %v233_v52, 0.0 }
  0xf1   :  { %v254_v61 = vmax.f32 %v212_v55, 0.0  ;;  %v262_v62 = vmax.f32 %v244_v56, 0.0  ;;  %v204_v63 = vadd.f32 %v347_v16, %v203_v59  ;;  %v236_v0 = vadd.f32 %v347_v16, %v235_v60 }
  0xf3   :  { %v414_v3 = vpack.c.bf16 %v254_v61, %v253_v57  ;;  %v434_v4 = vpack.c.bf16 %v262_v62, %v261_v58  ;;  %v252_v5 = vmax.f32 %v204_v63, 0.0  ;;  %v260_v6 = vmax.f32 %v236_v0, 0.0 }
  0xf5   :  { %438 = vst [vmem:[%s621_s3 + $0x18] sm:$0xff] %v414_v3   ;;  %442 = vst [vmem:[%s621_s3 + $0x38] sm:$0xff] %v434_v4   ;;  %v409_v7 = vpack.c.bf16 %v252_v5, %v251_v1  ;;  %v429_v8 = vpack.c.bf16 %v260_v6, %v259_v2 }
  0xf7   :  { %437 = vst [vmem:[%s621_s3 + $0x10] sm:$0xff] %v409_v7   ;;  %441 = vst [vmem:[%s621_s3 + $0x30] sm:$0xff] %v429_v8  }

// kernel: byobnet_forward.10
= control target key start
LH: loop header
LB: loop body
LE: loop exit
PB: predicated region body
PF: predicated region fallthrough
CT: control target
= control target key end

     0   :  { %s3658_s1 = inlined_call_operand.vmem [shape: bf16[1152,256], index: 1, kind: input, shape index: {}]   ;;  %s3659_s0 = inlined_call_operand.vmem [shape: bf16[128,1152], index: 0, kind: input, shape index: {}]   ;;  %s3660_s2 = inlined_call_operand.vmem [shape: f32[1,256], index: 2, kind: input, shape index: {}]   ;;  %s3661_s3 = inlined_call_operand.vmem [shape: bf16[128,256], index: 3, kind: output, shape index: {}]  }
   0x1   :  { %v2354_v0 = vld [vmem:[%s3658_s1 + $0x74] ss:$8 sps:$4 sm:$0xff]   ;;  %v2358_v2 = vld [vmem:[%s3658_s1 + $0x70] ss:$8 sps:$4 sm:$0xff]   ;;  %v2360_v4 = vld [vmem:[%s3658_s1 + $0x64] ss:$8 sps:$4 sm:$0xff]  }
   0x2   :  { %v2356_v1 = vld [vmem:[%s3658_s1 + $0x174] ss:$8 sps:$4 sm:$0xff]   ;;  %1339 = vmatprep.subr.bf16.mxu0 %v2354_v0  ;;  %v2359_v3 = vld [vmem:[%s3658_s1 + $0x170] ss:$8 sps:$4 sm:$0xff]   ;;  %v2362_v5 = vld [vmem:[%s3658_s1 + $0x164] ss:$8 sps:$4 sm:$0xff]  }
   0x3   :  { %1452 = vmatprep.subr.bf16.mxu1 %v2356_v1  ;;  %1340 = vmatpush1.bf16.msra.mxu0 %v2358_v2  ;;  %v2364_v6 = vld [vmem:[%s3658_s1 + $0x60] ss:$8 sps:$4 sm:$0xff]   ;;  %v2366_v8 = vld [vmem:[%s3658_s1 + $0x54] ss:$8 sps:$4 sm:$0xff]   ;;  %v2370_v10 = vld [vmem:[%s3658_s1 + $0x50] ss:$8 sps:$4 sm:$0xff]  }
   0x4   :  { %1453 = vmatpush1.bf16.msra.mxu1 %v2359_v3  ;;  %1341 = vmatprep.subr.bf16.mxu0 %v2360_v4  ;;  %v2365_v7 = vld [vmem:[%s3658_s1 + $0x160] ss:$8 sps:$4 sm:$0xff]   ;;  %v2368_v9 = vld [vmem:[%s3658_s1 + $0x154] ss:$8 sps:$4 sm:$0xff]   ;;  %v2371_v11 = vld [vmem:[%s3658_s1 + $0x150] ss:$8 sps:$4 sm:$0xff]  }
   0x5   :  { %1454 = vmatprep.subr.bf16.mxu1 %v2362_v5  ;;  %v2372_v12 = vld [vmem:[%s3658_s1 + $0x44] ss:$8 sps:$4 sm:$0xff]   ;;  %v2376_v14 = vld [vmem:[%s3658_s1 + $0x40] ss:$8 sps:$4 sm:$0xff]   ;;  %v2378_v16 = vld [vmem:[%s3658_s1 + $0x34] ss:$8 sps:$4 sm:$0xff]  }
   0x6   :  { %v2374_v13 = vld [vmem:[%s3658_s1 + $0x144] ss:$8 sps:$4 sm:$0xff]   ;;  %v2377_v15 = vld [vmem:[%s3658_s1 + $0x140] ss:$8 sps:$4 sm:$0xff]   ;;  %v2380_v17 = vld [vmem:[%s3658_s1 + $0x134] ss:$8 sps:$4 sm:$0xff]  }
   0x7   :  { %1342 = vmatpush1.bf16.msra.mxu0 %v2364_v6  ;;  %v2382_v18 = vld [vmem:[%s3658_s1 + $0x30] ss:$8 sps:$4 sm:$0xff]   ;;  %v2384_v20 = vld [vmem:[%s3658_s1 + $0x24] ss:$8 sps:$4 sm:$0xff]   ;;  %v2388_v22 = vld [vmem:[%s3658_s1 + $0x20] ss:$8 sps:$4 sm:$0xff]  }
   0x8   :  { %1455 = vmatpush1.bf16.msra.mxu1 %v2365_v7  ;;  %1343 = vmatprep.subr.bf16.mxu0 %v2366_v8  ;;  %v2383_v19 = vld [vmem:[%s3658_s1 + $0x130] ss:$8 sps:$4 sm:$0xff]   ;;  %v2386_v21 = vld [vmem:[%s3658_s1 + $0x124] ss:$8 sps:$4 sm:$0xff]   ;;  %v2389_v23 = vld [vmem:[%s3658_s1 + $0x120] ss:$8 sps:$4 sm:$0xff]  }
   0x9   :  { %1456 = vmatprep.subr.bf16.mxu1 %v2368_v9  ;;  %v2390_v24 = vld [vmem:[%s3658_s1 + $0x14] ss:$8 sps:$4 sm:$0xff]   ;;  %v2394_v26 = vld [vmem:[%s3658_s1 + $0x10] ss:$8 sps:$4 sm:$0xff]   ;;  %v2396_v28 = vld [vmem:[%s3658_s1 + $0x4] ss:$8 sps:$4 sm:$0xff]  }
   0xa   :  { %v2392_v25 = vld [vmem:[%s3658_s1 + $0x114] ss:$8 sps:$4 sm:$0xff]   ;;  %v2395_v27 = vld [vmem:[%s3658_s1 + $0x110] ss:$8 sps:$4 sm:$0xff]   ;;  %v2398_v29 = vld [vmem:[%s3658_s1 + $0x104] ss:$8 sps:$4 sm:$0xff]  }
   0xb   :  { %1344 = vmatpush1.bf16.msra.mxu0 %v2370_v10  ;;  %v2400_v30 = vld [vmem:[%s3658_s1] ss:$8 sps:$4 sm:$0xff]   ;;  %v2402_v32 = vld [vmem:[%s3658_s1 + $0xf4] ss:$8 sps:$4 sm:$0xff]   ;;  %v2406_v34 = vld [vmem:[%s3658_s1 + $0xf0] ss:$8 sps:$4 sm:$0xff]  }
   0xc   :  { %1457 = vmatpush1.bf16.msra.mxu1 %v2371_v11  ;;  %1345 = vmatprep.subr.bf16.mxu0 %v2372_v12  ;;  %v2401_v31 = vld [vmem:[%s3658_s1 + $0x100] ss:$8 sps:$4 sm:$0xff]   ;;  %v2404_v33 = vld [vmem:[%s3658_s1 + $0x1f4] ss:$8 sps:$4 sm:$0xff]   ;;  %v2407_v35 = vld [vmem:[%s3658_s1 + $0x1f0] ss:$8 sps:$4 sm:$0xff]  }
   0xd   :  { %1458 = vmatprep.subr.bf16.mxu1 %v2374_v13  ;;  %v2408_v36 = vld [vmem:[%s3658_s1 + $0xe4] ss:$8 sps:$4 sm:$0xff]   ;;  %v2412_v38 = vld [vmem:[%s3658_s1 + $0xe0] ss:$8 sps:$4 sm:$0xff]   ;;  %v2414_v40 = vld [vmem:[%s3658_s1 + $0xd4] ss:$8 sps:$4 sm:$0xff]  }
   0xe   :  { %v2410_v37 = vld [vmem:[%s3658_s1 + $0x1e4] ss:$8 sps:$4 sm:$0xff]   ;;  %v2413_v39 = vld [vmem:[%s3658_s1 + $0x1e0] ss:$8 sps:$4 sm:$0xff]   ;;  %v2416_v41 = vld [vmem:[%s3658_s1 + $0x1d4] ss:$8 sps:$4 sm:$0xff]  }
   0xf   :  { %1346 = vmatpush1.bf16.msra.mxu0 %v2376_v14  ;;  %v2418_v42 = vld [vmem:[%s3658_s1 + $0xd0] ss:$8 sps:$4 sm:$0xff]   ;;  %v2420_v44 = vld [vmem:[%s3658_s1 + $0xc4] ss:$8 sps:$4 sm:$0xff]   ;;  %v2424_v46 = vld [vmem:[%s3658_s1 + $0xc0] ss:$8 sps:$4 sm:$0xff]  }
  0x10   :  { %1459 = vmatpush1.bf16.msra.mxu1 %v2377_v15  ;;  %1347 = vmatprep.subr.bf16.mxu0 %v2378_v16  ;;  %v2419_v43 = vld [vmem:[%s3658_s1 + $0x1d0] ss:$8 sps:$4 sm:$0xff]   ;;  %v2422_v45 = vld [vmem:[%s3658_s1 + $0x1c4] ss:$8 sps:$4 sm:$0xff]   ;;  %v2425_v47 = vld [vmem:[%s3658_s1 + $0x1c0] ss:$8 sps:$4 sm:$0xff]  }
  0x11   :  { %1460 = vmatprep.subr.bf16.mxu1 %v2380_v17  ;;  %v2426_v48 = vld [vmem:[%s3658_s1 + $0xb4] ss:$8 sps:$4 sm:$0xff]   ;;  %v2452_v49 = vld [vmem:[%s3659_s0 + $0x4] ss:$36 sps:$4 sm:$0xff]   ;;  %v2455_v51 = vld [vmem:[%s3659_s0 + $0xc] ss:$36 sps:$4 sm:$0xff]  }
  0x12   :  { %v2428_v50 = vld [vmem:[%s3658_s1 + $0x1b4] ss:$8 sps:$4 sm:$0xff]   ;;  %1371 = vmatprep.mubr.bf16.mxu0 %v2452_v49  ;;  %v2430_v52 = vld [vmem:[%s3658_s1 + $0xb0] ss:$8 sps:$4 sm:$0xff]   ;;  %1484 = vmatprep.mubr.bf16.mxu1 %v2455_v51  ;;  %v2432_v54 = vld [vmem:[%s3658_s1 + $0xa4] ss:$8 sps:$4 sm:$0xff]  }
  0x13   :  { %1348 = vmatpush1.bf16.msra.mxu0 %v2382_v18  ;;  %v2431_v53 = vld [vmem:[%s3658_s1 + $0x1b0] ss:$8 sps:$4 sm:$0xff]   ;;  %v2434_v55 = vld [vmem:[%s3658_s1 + $0x1a4] ss:$8 sps:$4 sm:$0xff]   ;;  %v2436_v56 = vld [vmem:[%s3658_s1 + $0xa0] ss:$8 sps:$4 sm:$0xff]  }
  0x14   :  { %1461 = vmatpush1.bf16.msra.mxu1 %v2383_v19  ;;  %1349 = vmatprep.subr.bf16.mxu0 %v2384_v20  ;;  %v2437_v57 = vld [vmem:[%s3658_s1 + $0x1a0] ss:$8 sps:$4 sm:$0xff]   ;;  %v2438_v58 = vld [vmem:[%s3658_s1 + $0x94] ss:$8 sps:$4 sm:$0xff]   ;;  %v2442_v60 = vld [vmem:[%s3658_s1 + $0x90] ss:$8 sps:$4 sm:$0xff]  }
  0x15   :  { %1462 = vmatprep.subr.bf16.mxu1 %v2386_v21  ;;  %v2440_v59 = vld [vmem:[%s3658_s1 + $0x194] ss:$8 sps:$4 sm:$0xff]   ;;  %v2443_v61 = vld [vmem:[%s3658_s1 + $0x190] ss:$8 sps:$4 sm:$0xff]   ;;  %v2444_v62 = vld [vmem:[%s3658_s1 + $0x84] ss:$8 sps:$4 sm:$0xff]  }
  0x16   :  { %v2446_v63 = vld [vmem:[%s3658_s1 + $0x184] ss:$8 sps:$4 sm:$0xff]   ;;  %v2448_v0 = vld [vmem:[%s3658_s1 + $0x80] ss:$8 sps:$4 sm:$0xff]   ;;  %v2458_v2 = vld [vmem:[%s3658_s1 + $0x274] ss:$8 sps:$4 sm:$0xff]  }
  0x17   :  { %1350 = vmatpush1.bf16.msra.mxu0 %v2388_v22  ;;  %v2449_v1 = vld [vmem:[%s3658_s1 + $0x180] ss:$8 sps:$4 sm:$0xff]   ;;  %v2461_v3 = vld [vmem:[%s3658_s1 + $0x374] ss:$8 sps:$4 sm:$0xff]   ;;  %v2456_v6 = vld [vmem:[%s3658_s1 + $0x270] ss:$8 sps:$4 sm:$0xff]  }
  0x18   :  { %1463 = vmatpush1.bf16.msra.mxu1 %v2389_v23  ;;  %1351 = vmatprep.subr.bf16.mxu0 %v2390_v24  ;;  %v2450_v4 = vld [vmem:[%s3659_s0] ss:$36 sps:$4 sm:$0xff]   ;;  %v2453_v5 = vld [vmem:[%s3659_s0 + $0x8] ss:$36 sps:$4 sm:$0xff]   ;;  %v2459_v7 = vld [vmem:[%s3658_s1 + $0x370] ss:$8 sps:$4 sm:$0xff]  }
  0x19   :  { %1464 = vmatprep.subr.bf16.mxu1 %v2392_v25  ;;  %v2464_v8 = vld [vmem:[%s3658_s1 + $0x264] ss:$8 sps:$4 sm:$0xff]   ;;  %v2470_v11 = vld [vmem:[%s3659_s0 + $0x54] ss:$36 sps:$4 sm:$0xff]   ;;  %v2462_v12 = vld [vmem:[%s3658_s1 + $0x260] ss:$8 sps:$4 sm:$0xff]  }
  0x1a   :  { %v2467_v9 = vld [vmem:[%s3658_s1 + $0x364] ss:$8 sps:$4 sm:$0xff]   ;;  %v2465_v13 = vld [vmem:[%s3658_s1 + $0x360] ss:$8 sps:$4 sm:$0xff]   ;;  %v2476_v14 = vld [vmem:[%s3658_s1 + $0x254] ss:$8 sps:$4 sm:$0xff]  }
  0x1b   :  { %1352 = vmatpush1.bf16.msra.mxu0 %v2394_v26  ;;  %v2468_v10 = vld [vmem:[%s3659_s0 + $0x4c] ss:$36 sps:$4 sm:$0xff]   ;;  %v2479_v15 = vld [vmem:[%s3658_s1 + $0x354] ss:$8 sps:$4 sm:$0xff]   ;;  %v2480_v24 = vld [vmem:[%s3658_s1 + $0x240] ss:$8 sps:$4 sm:$0xff]  }
  0x1c   :  { %1465 = vmatpush1.bf16.msra.mxu1 %v2395_v27  ;;  %1353 = vmatprep.subr.bf16.mxu0 %v2396_v28  ;;  %v2472_v16 = vld [vmem:[%s3659_s0 + $0x48] ss:$36 sps:$4 sm:$0xff]   ;;  %v2473_v17 = vld [vmem:[%s3659_s0 + $0x50] ss:$36 sps:$4 sm:$0xff]   ;;  %v2488_v23 = vld [vmem:[%s3659_s0 + $0x9c] ss:$36 sps:$4 sm:$0xff]  }
  0x1d   :  { %1466 = vmatprep.subr.bf16.mxu1 %v2398_v29  ;;  %v2474_v18 = vld [vmem:[%s3658_s1 + $0x250] ss:$8 sps:$4 sm:$0xff]   ;;  %v2482_v20 = vld [vmem:[%s3658_s1 + $0x244] ss:$8 sps:$4 sm:$0xff]   ;;  %v2483_v25 = vld [vmem:[%s3658_s1 + $0x340] ss:$8 sps:$4 sm:$0xff]  }
  0x1e   :  { %v2477_v19 = vld [vmem:[%s3658_s1 + $0x350] ss:$8 sps:$4 sm:$0xff]   ;;  %v2485_v21 = vld [vmem:[%s3658_s1 + $0x344] ss:$8 sps:$4 sm:$0xff]   ;;  %v2494_v26 = vld [vmem:[%s3658_s1 + $0x234] ss:$8 sps:$4 sm:$0xff]  }
  0x1f   :  { %1354 = vmatpush1.bf16.msra.mxu0 %v2400_v30  ;;  %v2486_v22 = vld [vmem:[%s3659_s0 + $0x94] ss:$36 sps:$4 sm:$0xff]   ;;  %v2519_v49 = vld [vmem:[%s3658_s1 + $0x300] ss:$8 sps:$4 sm:$0xff]  }
  0x20   :  { %1467 = vmatpush1.bf16.msra.mxu1 %v2401_v31  ;;  %1355 = vmatprep.subr.bf16.mxu0 %v2402_v32  ;;  %v2497_v27 = vld [vmem:[%s3658_s1 + $0x334] ss:$8 sps:$4 sm:$0xff]   ;;  %v2492_v30 = vld [vmem:[%s3658_s1 + $0x230] ss:$8 sps:$4 sm:$0xff]   ;;  %v2500_v32 = vld [vmem:[%s3658_s1 + $0x224] ss:$8 sps:$4 sm:$0xff]  }
  0x21   :  { %1468 = vmatprep.subr.bf16.mxu1 %v2404_v33  ;;  %v2490_v28 = vld [vmem:[%s3659_s0 + $0x90] ss:$36 sps:$4 sm:$0xff]   ;;  %v2491_v29 = vld [vmem:[%s3659_s0 + $0x98] ss:$36 sps:$4 sm:$0xff]   ;;  %v2503_v33 = vld [vmem:[%s3658_s1 + $0x324] ss:$8 sps:$4 sm:$0xff]  }
  0x22   :  { %v2495_v31 = vld [vmem:[%s3658_s1 + $0x330] ss:$8 sps:$4 sm:$0xff]   ;;  %v2533_v51 = vld [vmem:[%s3658_s1 + $0x3f4] ss:$8 sps:$4 sm:$0xff]  }
  0x23   :  { %1356 = vmatpush2.bf16.msra.mxu0 %v2406_v34  ;;  %v2504_v34 = vld [vmem:[%s3659_s0 + $0xdc] ss:$36 sps:$4 sm:$0xff]  }
  0x24   :  { %1469 = vmatpush2.bf16.msra.mxu1 %v2407_v35  ;;  %1357 = vmatprep.subr.bf16.mxu0 %v2408_v36  ;;  %v2506_v35 = vld [vmem:[%s3659_s0 + $0xe4] ss:$36 sps:$4 sm:$0xff]  }
  0x25   :  { %1470 = vmatprep.subr.bf16.mxu1 %v2410_v37  ;;  %v2498_v36 = vld [vmem:[%s3658_s1 + $0x220] ss:$8 sps:$4 sm:$0xff]  }
  0x26   :  { %v2501_v37 = vld [vmem:[%s3658_s1 + $0x320] ss:$8 sps:$4 sm:$0xff]  }
  0x27   :  { %1358 = vmatpush2.bf16.msra.mxu0 %v2412_v38  ;;  %v2512_v38 = vld [vmem:[%s3658_s1 + $0x214] ss:$8 sps:$4 sm:$0xff]  }
  0x28   :  { %1471 = vmatpush2.bf16.msra.mxu1 %v2413_v39  ;;  %1359 = vmatprep.subr.bf16.mxu0 %v2414_v40  ;;  %v2515_v39 = vld [vmem:[%s3658_s1 + $0x314] ss:$8 sps:$4 sm:$0xff]  }
  0x29   :  { %1472 = vmatprep.subr.bf16.mxu1 %v2416_v41  ;;  %v2508_v40 = vld [vmem:[%s3659_s0 + $0xd8] ss:$36 sps:$4 sm:$0xff]   ;;  %v2509_v41 = vld [vmem:[%s3659_s0 + $0xe0] ss:$36 sps:$4 sm:$0xff]  }
  0x2b   :  { %1360 = vmatpush2.bf16.msra.mxu0 %v2418_v42  ;;  %v2510_v42 = vld [vmem:[%s3658_s1 + $0x210] ss:$8 sps:$4 sm:$0xff]  }
  0x2c   :  { %1473 = vmatpush2.bf16.msra.mxu1 %v2419_v43  ;;  %1361 = vmatprep.subr.bf16.mxu0 %v2420_v44  ;;  %v2513_v43 = vld [vmem:[%s3658_s1 + $0x310] ss:$8 sps:$4 sm:$0xff]   ;;  %v2518_v44 = vld [vmem:[%s3658_s1 + $0x204] ss:$8 sps:$4 sm:$0xff]  }
  0x2d   :  { %1474 = vmatprep.subr.bf16.mxu1 %v2422_v45  ;;  %v2521_v45 = vld [vmem:[%s3658_s1 + $0x304] ss:$8 sps:$4 sm:$0xff]  }
  0x2f   :  { %1362 = vmatpush2.bf16.msra.mxu0 %v2424_v46  ;;  %v2522_v46 = vld [vmem:[%s3659_s0 + $0x124] ss:$36 sps:$4 sm:$0xff]  }
  0x30   :  { %1475 = vmatpush2.bf16.msra.mxu1 %v2425_v47  ;;  %1363 = vmatprep.subr.bf16.mxu0 %v2426_v48  ;;  %v2524_v47 = vld [vmem:[%s3659_s0 + $0x12c] ss:$36 sps:$4 sm:$0xff]   ;;  %v2516_v48 = vld [vmem:[%s3658_s1 + $0x200] ss:$8 sps:$4 sm:$0xff]  }
  0x31   :  { %1476 = vmatprep.subr.bf16.mxu1 %v2428_v50  ;;  %v2530_v50 = vld [vmem:[%s3658_s1 + $0x2f4] ss:$8 sps:$4 sm:$0xff]  }
  0x33   :  { %1364 = vmatpush2.bf16.msra.mxu0 %v2430_v52  ;;  %v2526_v52 = vld [vmem:[%s3659_s0 + $0x120] ss:$36 sps:$4 sm:$0xff]  }
  0x34   :  { %1477 = vmatpush2.bf16.msra.mxu1 %v2431_v53  ;;  %1365 = vmatprep.subr.bf16.mxu0 %v2432_v54  ;;  %v2527_v53 = vld [vmem:[%s3659_s0 + $0x128] ss:$36 sps:$4 sm:$0xff]   ;;  %v2528_v54 = vld [vmem:[%s3658_s1 + $0x2f0] ss:$8 sps:$4 sm:$0xff]  }
  0x35   :  { %1478 = vmatprep.subr.bf16.mxu1 %v2434_v55  ;;  %v2531_v55 = vld [vmem:[%s3658_s1 + $0x3f0] ss:$8 sps:$4 sm:$0xff]  }
  0x37   :  { %1366 = vmatpush2.bf16.msra.mxu0 %v2436_v56  ;;  %v2536_v56 = vld [vmem:[%s3658_s1 + $0x2e4] ss:$8 sps:$4 sm:$0xff]  }
  0x38   :  { %1479 = vmatpush2.bf16.msra.mxu1 %v2437_v57  ;;  %1367 = vmatprep.subr.bf16.mxu0 %v2438_v58  ;;  %v2539_v57 = vld [vmem:[%s3658_s1 + $0x3e4] ss:$8 sps:$4 sm:$0xff]  }
  0x39   :  { %1480 = vmatprep.subr.bf16.mxu1 %v2440_v59  ;;  %v2540_v58 = vld [vmem:[%s3659_s0 + $0x16c] ss:$36 sps:$4 sm:$0xff]   ;;  %v2542_v59 = vld [vmem:[%s3659_s0 + $0x174] ss:$36 sps:$4 sm:$0xff]  }
  0x3b   :  { %1368 = vmatpush2.bf16.msra.mxu0 %v2442_v60  ;;  %v2534_v60 = vld [vmem:[%s3658_s1 + $0x2e0] ss:$8 sps:$4 sm:$0xff]  }
  0x3c   :  { %1481 = vmatpush2.bf16.msra.mxu1 %v2443_v61  ;;  %1369 = vmatprep.subr.bf16.mxu0 %v2444_v62  ;;  %v2537_v61 = vld [vmem:[%s3658_s1 + $0x3e0] ss:$8 sps:$4 sm:$0xff]   ;;  %v2548_v62 = vld [vmem:[%s3658_s1 + $0x2d4] ss:$8 sps:$4 sm:$0xff]  }
  0x3d   :  { %1482 = vmatprep.subr.bf16.mxu1 %v2446_v63  ;;  %v2551_v63 = vld [vmem:[%s3658_s1 + $0x3d4] ss:$8 sps:$4 sm:$0xff]  }
  0x3f   :  { %1370 = vmatpush2.bf16.msra.mxu0 %v2448_v0  ;;  %v2544_v0 = vld [vmem:[%s3659_s0 + $0x168] ss:$36 sps:$4 sm:$0xff]  }
  0x40   :  { %1483 = vmatpush2.bf16.msra.mxu1 %v2449_v1  ;;  %1565 = vmatprep.subr.bf16.mxu0 %v2458_v2  ;;  %v2545_v1 = vld [vmem:[%s3659_s0 + $0x170] ss:$36 sps:$4 sm:$0xff]  }
  0x41   :  { %1678 = vmatprep.subr.bf16.mxu1 %v2461_v3  ;;  %v2546_v2 = vld [vmem:[%s3658_s1 + $0x2d0] ss:$8 sps:$4 sm:$0xff]  }
  0x42   :  { %1372 = vmatmul.mubr.bf16.vlgmr.msra.gmra.mxu0 %v2450_v4  ;;  %v2549_v3 = vld [vmem:[%s3658_s1 + $0x3d0] ss:$8 sps:$4 sm:$0xff]   ;;  %v2554_v4 = vld [vmem:[%s3658_s1 + $0x2c4] ss:$8 sps:$4 sm:$0xff]  }
  0x43   :  { %1485 = vmatmul.mubr.bf16.vlgmr.msra.gmra.mxu1 %v2453_v5  ;;  %1566 = vmatpush1.bf16.msra.mxu0 %v2456_v6  ;;  %v2557_v5 = vld [vmem:[%s3658_s1 + $0x3c4] ss:$8 sps:$4 sm:$0xff]   ;;  %v2558_v6 = vld [vmem:[%s3659_s0 + $0x1b4] ss:$36 sps:$4 sm:$0xff]  }
  0x44   :  { %1679 = vmatpush1.bf16.msra.mxu1 %v2459_v7  ;;  %1567 = vmatprep.subr.bf16.mxu0 %v2464_v8  ;;  %v2560_v7 = vld [vmem:[%s3659_s0 + $0x1bc] ss:$36 sps:$4 sm:$0xff]  }
  0x45   :  { %1680 = vmatprep.subr.bf16.mxu1 %v2467_v9  ;;  %1381 = vmatprep.mubr.bf16.mxu0 %v2468_v10  ;;  %v2552_v8 = vld [vmem:[%s3658_s1 + $0x2c0] ss:$8 sps:$4 sm:$0xff]   ;;  %v2566_v10 = vld [vmem:[%s3658_s1 + $0x2b4] ss:$8 sps:$4 sm:$0xff]  }
  0x46   :  { %1494 = vmatprep.mubr.bf16.mxu1 %v2470_v11  ;;  %v2555_v9 = vld [vmem:[%s3658_s1 + $0x3c0] ss:$8 sps:$4 sm:$0xff]   ;;  %v2569_v11 = vld [vmem:[%s3658_s1 + $0x3b4] ss:$8 sps:$4 sm:$0xff]  }
  0x47   :  { %1568 = vmatpush1.bf16.msra.mxu0 %v2462_v12  ;;  %v2562_v12 = vld [vmem:[%s3659_s0 + $0x1b0] ss:$36 sps:$4 sm:$0xff]  }
  0x48   :  { %1681 = vmatpush1.bf16.msra.mxu1 %v2465_v13  ;;  %1569 = vmatprep.subr.bf16.mxu0 %v2476_v14  ;;  %v2563_v13 = vld [vmem:[%s3659_s0 + $0x1b8] ss:$36 sps:$4 sm:$0xff]  }
  0x49   :  { %1682 = vmatprep.subr.bf16.mxu1 %v2479_v15  ;;  %v2564_v14 = vld [vmem:[%s3658_s1 + $0x2b0] ss:$8 sps:$4 sm:$0xff]  }
  0x4a   :  { %1382 = vmatmul.mubr.bf16.gmra.mxu0 %v2472_v16  ;;  %v2567_v15 = vld [vmem:[%s3658_s1 + $0x3b0] ss:$8 sps:$4 sm:$0xff]   ;;  %v2572_v16 = vld [vmem:[%s3658_s1 + $0x2a4] ss:$8 sps:$4 sm:$0xff]  }
  0x4b   :  { %1495 = vmatmul.mubr.bf16.gmra.mxu1 %v2473_v17  ;;  %1570 = vmatpush1.bf16.msra.mxu0 %v2474_v18  ;;  %v2575_v17 = vld [vmem:[%s3658_s1 + $0x3a4] ss:$8 sps:$4 sm:$0xff]   ;;  %v2576_v18 = vld [vmem:[%s3659_s0 + $0x1fc] ss:$36 sps:$4 sm:$0xff]  }
  0x4c   :  { %1683 = vmatpush1.bf16.msra.mxu1 %v2477_v19  ;;  %1571 = vmatprep.subr.bf16.mxu0 %v2482_v20  ;;  %v2578_v19 = vld [vmem:[%s3659_s0 + $0x204] ss:$36 sps:$4 sm:$0xff]  }
  0x4d   :  { %1684 = vmatprep.subr.bf16.mxu1 %v2485_v21  ;;  %1391 = vmatprep.mubr.bf16.mxu0 %v2486_v22  ;;  %v2570_v20 = vld [vmem:[%s3658_s1 + $0x2a0] ss:$8 sps:$4 sm:$0xff]   ;;  %v2584_v22 = vld [vmem:[%s3658_s1 + $0x294] ss:$8 sps:$4 sm:$0xff]  }
  0x4e   :  { %1504 = vmatprep.mubr.bf16.mxu1 %v2488_v23  ;;  %v2573_v21 = vld [vmem:[%s3658_s1 + $0x3a0] ss:$8 sps:$4 sm:$0xff]   ;;  %v2587_v23 = vld [vmem:[%s3658_s1 + $0x394] ss:$8 sps:$4 sm:$0xff]  }
  0x4f   :  { %1572 = vmatpush1.bf16.msra.mxu0 %v2480_v24  ;;  %v2580_v24 = vld [vmem:[%s3659_s0 + $0x1f8] ss:$36 sps:$4 sm:$0xff]  }
  0x50   :  { %1685 = vmatpush1.bf16.msra.mxu1 %v2483_v25  ;;  %1573 = vmatprep.subr.bf16.mxu0 %v2494_v26  ;;  %v2581_v25 = vld [vmem:[%s3659_s0 + $0x200] ss:$36 sps:$4 sm:$0xff]   ;;  %v2582_v26 = vld [vmem:[%s3658_s1 + $0x290] ss:$8 sps:$4 sm:$0xff]  }
  0x51   :  { %1686 = vmatprep.subr.bf16.mxu1 %v2497_v27  ;;  %v2585_v27 = vld [vmem:[%s3658_s1 + $0x390] ss:$8 sps:$4 sm:$0xff]  }
  0x52   :  { %1392 = vmatmul.mubr.bf16.gmra.mxu0 %v2490_v28  ;;  %v2590_v28 = vld [vmem:[%s3658_s1 + $0x284] ss:$8 sps:$4 sm:$0xff]  }
  0x53   :  { %1505 = vmatmul.mubr.bf16.gmra.mxu1 %v2491_v29  ;;  %1574 = vmatpush1.bf16.msra.mxu0 %v2492_v30  ;;  %v2593_v29 = vld [vmem:[%s3658_s1 + $0x384] ss:$8 sps:$4 sm:$0xff]   ;;  %v2596_v30 = vld [vmem:[%s3659_s0 + $0x14] ss:$36 sps:$4 sm:$0xff]  }
  0x54   :  { %1687 = vmatpush1.bf16.msra.mxu1 %v2495_v31  ;;  %1575 = vmatprep.subr.bf16.mxu0 %v2500_v32  ;;  %v2599_v31 = vld [vmem:[%s3659_s0 + $0x1c] ss:$36 sps:$4 sm:$0xff]  }
  0x55   :  { %1688 = vmatprep.subr.bf16.mxu1 %v2503_v33  ;;  %1401 = vmatprep.mubr.bf16.mxu0 %v2504_v34  ;;  %v2588_v32 = vld [vmem:[%s3658_s1 + $0x280] ss:$8 sps:$4 sm:$0xff]   ;;  %v2602_v34 = vld [vmem:[%s3658_s1 + $0x474] ss:$8 sps:$4 sm:$0xff]  }
  0x56   :  { %1514 = vmatprep.mubr.bf16.mxu1 %v2506_v35  ;;  %v2591_v33 = vld [vmem:[%s3658_s1 + $0x380] ss:$8 sps:$4 sm:$0xff]   ;;  %v2594_v35 = vld [vmem:[%s3659_s0 + $0x10] ss:$36 sps:$4 sm:$0xff]  }
  0x57   :  { %1576 = vmatpush1.bf16.msra.mxu0 %v2498_v36  ;;  %v2597_v36 = vld [vmem:[%s3659_s0 + $0x18] ss:$36 sps:$4 sm:$0xff]  }
  0x58   :  { %1689 = vmatpush1.bf16.msra.mxu1 %v2501_v37  ;;  %1577 = vmatprep.subr.bf16.mxu0 %v2512_v38  ;;  %v2600_v37 = vld [vmem:[%s3658_s1 + $0x470] ss:$8 sps:$4 sm:$0xff]   ;;  %v2603_v38 = vld [vmem:[%s3659_s0 + $0x5c] ss:$36 sps:$4 sm:$0xff]  }
  0x59   :  { %1690 = vmatprep.subr.bf16.mxu1 %v2515_v39  ;;  %v2605_v39 = vld [vmem:[%s3659_s0 + $0x64] ss:$36 sps:$4 sm:$0xff]  }
  0x5a   :  { %1402 = vmatmul.mubr.bf16.gmra.mxu0 %v2508_v40  ;;  %v2611_v40 = vld [vmem:[%s3658_s1 + $0x464] ss:$8 sps:$4 sm:$0xff]  }
  0x5b   :  { %1515 = vmatmul.mubr.bf16.gmra.mxu1 %v2509_v41  ;;  %1578 = vmatpush1.bf16.msra.mxu0 %v2510_v42  ;;  %v2609_v41 = vld [vmem:[%s3658_s1 + $0x460] ss:$8 sps:$4 sm:$0xff]   ;;  %v2620_v42 = vld [vmem:[%s3658_s1 + $0x454] ss:$8 sps:$4 sm:$0xff]  }
  0x5c   :  { %1691 = vmatpush1.bf16.msra.mxu1 %v2513_v43  ;;  %1579 = vmatprep.subr.bf16.mxu0 %v2518_v44  ;;  %v2607_v43 = vld [vmem:[%s3659_s0 + $0x58] ss:$36 sps:$4 sm:$0xff]   ;;  %v2608_v44 = vld [vmem:[%s3659_s0 + $0x60] ss:$36 sps:$4 sm:$0xff]  }
  0x5d   :  { %1692 = vmatprep.subr.bf16.mxu1 %v2521_v45  ;;  %1411 = vmatprep.mubr.bf16.mxu0 %v2522_v46  ;;  %v2612_v45 = vld [vmem:[%s3659_s0 + $0xa4] ss:$36 sps:$4 sm:$0xff]   ;;  %v2614_v46 = vld [vmem:[%s3659_s0 + $0xac] ss:$36 sps:$4 sm:$0xff]  }
  0x5e   :  { %1524 = vmatprep.mubr.bf16.mxu1 %v2524_v47  ;;  %v2618_v47 = vld [vmem:[%s3658_s1 + $0x450] ss:$8 sps:$4 sm:$0xff]  }
  0x5f   :  { %1580 = vmatpush1.bf16.msra.mxu0 %v2516_v48  ;;  %v2629_v48 = vld [vmem:[%s3658_s1 + $0x444] ss:$8 sps:$4 sm:$0xff]  }
  0x60   :  { %1693 = vmatpush1.bf16.msra.mxu1 %v2519_v49  ;;  %1581 = vmatprep.subr.bf16.mxu0 %v2530_v50  ;;  %v2616_v49 = vld [vmem:[%s3659_s0 + $0xa0] ss:$36 sps:$4 sm:$0xff]   ;;  %v2617_v50 = vld [vmem:[%s3659_s0 + $0xa8] ss:$36 sps:$4 sm:$0xff]  }
  0x61   :  { %1694 = vmatprep.subr.bf16.mxu1 %v2533_v51  ;;  %v2627_v51 = vld [vmem:[%s3658_s1 + $0x440] ss:$8 sps:$4 sm:$0xff]  }
  0x62   :  { %1412 = vmatmul.mubr.bf16.gmra.mxu0 %v2526_v52  ;;  %v2638_v52 = vld [vmem:[%s3658_s1 + $0x434] ss:$8 sps:$4 sm:$0xff]  }
  0x63   :  { %1525 = vmatmul.mubr.bf16.gmra.mxu1 %v2527_v53  ;;  %1582 = vmatpush2.bf16.msra.mxu0 %v2528_v54  ;;  %v2621_v53 = vld [vmem:[%s3659_s0 + $0xec] ss:$36 sps:$4 sm:$0xff]   ;;  %v2623_v54 = vld [vmem:[%s3659_s0 + $0xf4] ss:$36 sps:$4 sm:$0xff]  }
  0x64   :  { %1695 = vmatpush2.bf16.msra.mxu1 %v2531_v55  ;;  %1583 = vmatprep.subr.bf16.mxu0 %v2536_v56  ;;  %v2636_v55 = vld [vmem:[%s3658_s1 + $0x430] ss:$8 sps:$4 sm:$0xff]   ;;  %v2647_v56 = vld [vmem:[%s3658_s1 + $0x424] ss:$8 sps:$4 sm:$0xff]  }
  0x65   :  { %1696 = vmatprep.subr.bf16.mxu1 %v2539_v57  ;;  %1421 = vmatprep.mubr.bf16.mxu0 %v2540_v58  ;;  %v2645_v57 = vld [vmem:[%s3658_s1 + $0x420] ss:$8 sps:$4 sm:$0xff]   ;;  %v2656_v58 = vld [vmem:[%s3658_s1 + $0x414] ss:$8 sps:$4 sm:$0xff]  }
  0x66   :  { %1534 = vmatprep.mubr.bf16.mxu1 %v2542_v59  ;;  %v2625_v59 = vld [vmem:[%s3659_s0 + $0xe8] ss:$36 sps:$4 sm:$0xff]  }
  0x67   :  { %1584 = vmatpush2.bf16.msra.mxu0 %v2534_v60  ;;  %v2626_v60 = vld [vmem:[%s3659_s0 + $0xf0] ss:$36 sps:$4 sm:$0xff]  }
  0x68   :  { %1697 = vmatpush2.bf16.msra.mxu1 %v2537_v61  ;;  %1585 = vmatprep.subr.bf16.mxu0 %v2548_v62  ;;  %v2630_v61 = vld [vmem:[%s3659_s0 + $0x134] ss:$36 sps:$4 sm:$0xff]   ;;  %v2632_v62 = vld [vmem:[%s3659_s0 + $0x13c] ss:$36 sps:$4 sm:$0xff]  }
  0x69   :  { %1698 = vmatprep.subr.bf16.mxu1 %v2551_v63  ;;  %v2654_v63 = vld [vmem:[%s3658_s1 + $0x410] ss:$8 sps:$4 sm:$0xff]  }
  0x6a   :  { %1422 = vmatmul.mubr.bf16.gmra.mxu0 %v2544_v0  ;;  %v2665_v0 = vld [vmem:[%s3658_s1 + $0x404] ss:$8 sps:$4 sm:$0xff]  }
  0x6b   :  { %1535 = vmatmul.mubr.bf16.gmra.mxu1 %v2545_v1  ;;  %1586 = vmatpush2.bf16.msra.mxu0 %v2546_v2  ;;  %v2663_v1 = vld [vmem:[%s3658_s1 + $0x400] ss:$8 sps:$4 sm:$0xff]   ;;  %v2634_v2 = vld [vmem:[%s3659_s0 + $0x130] ss:$36 sps:$4 sm:$0xff]  }
  0x6c   :  { %1699 = vmatpush2.bf16.msra.mxu1 %v2549_v3  ;;  %1587 = vmatprep.subr.bf16.mxu0 %v2554_v4  ;;  %v2635_v3 = vld [vmem:[%s3659_s0 + $0x138] ss:$36 sps:$4 sm:$0xff]  }
  0x6d   :  { %1700 = vmatprep.subr.bf16.mxu1 %v2557_v5  ;;  %1431 = vmatprep.mubr.bf16.mxu0 %v2558_v6  ;;  %v2639_v4 = vld [vmem:[%s3659_s0 + $0x17c] ss:$36 sps:$4 sm:$0xff]   ;;  %v2641_v5 = vld [vmem:[%s3659_s0 + $0x184] ss:$36 sps:$4 sm:$0xff]  }
  0x6e   :  { %1544 = vmatprep.mubr.bf16.mxu1 %v2560_v7  ;;  %v2643_v6 = vld [vmem:[%s3659_s0 + $0x178] ss:$36 sps:$4 sm:$0xff]   ;;  %v2644_v7 = vld [vmem:[%s3659_s0 + $0x180] ss:$36 sps:$4 sm:$0xff]  }
  0x6f   :  { %1588 = vmatpush2.bf16.msra.mxu0 %v2552_v8  ;;  %v2648_v8 = vld [vmem:[%s3659_s0 + $0x1c4] ss:$36 sps:$4 sm:$0xff]  }
  0x70   :  { %1701 = vmatpush2.bf16.msra.mxu1 %v2555_v9  ;;  %1589 = vmatprep.subr.bf16.mxu0 %v2566_v10  ;;  %v2650_v9 = vld [vmem:[%s3659_s0 + $0x1cc] ss:$36 sps:$4 sm:$0xff]   ;;  %v2652_v10 = vld [vmem:[%s3659_s0 + $0x1c0] ss:$36 sps:$4 sm:$0xff]  }
  0x71   :  { %1702 = vmatprep.subr.bf16.mxu1 %v2569_v11  ;;  %v2653_v11 = vld [vmem:[%s3659_s0 + $0x1c8] ss:$36 sps:$4 sm:$0xff]  }
  0x72   :  { %1432 = vmatmul.mubr.bf16.gmra.mxu0 %v2562_v12  ;;  %v2657_v12 = vld [vmem:[%s3659_s0 + $0x20c] ss:$36 sps:$4 sm:$0xff]  }
  0x73   :  { %1545 = vmatmul.mubr.bf16.gmra.mxu1 %v2563_v13  ;;  %1590 = vmatpush2.bf16.msra.mxu0 %v2564_v14  ;;  %v2659_v13 = vld [vmem:[%s3659_s0 + $0x214] ss:$36 sps:$4 sm:$0xff]   ;;  %v2661_v14 = vld [vmem:[%s3659_s0 + $0x208] ss:$36 sps:$4 sm:$0xff]  }
  0x74   :  { %1703 = vmatpush2.bf16.msra.mxu1 %v2567_v15  ;;  %1591 = vmatprep.subr.bf16.mxu0 %v2572_v16  ;;  %v2662_v15 = vld [vmem:[%s3659_s0 + $0x210] ss:$36 sps:$4 sm:$0xff]   ;;  %v2674_v16 = vmov 0  }
  0x75   :  { %1704 = vmatprep.subr.bf16.mxu1 %v2575_v17  ;;  %1441 = vmatprep.mubr.bf16.mxu0 %v2576_v18  ;;  %v2666_v17 = vld [vmem:[%s3659_s0 + $0x20] ss:$36 sps:$4 sm:$0xff]  }
  0x76   :  { %1554 = vmatprep.mubr.bf16.mxu1 %v2578_v19  ;;  %v2667_v18 = vld [vmem:[%s3659_s0 + $0x140] ss:$36 sps:$4 sm:$0xff]   ;;  %v2668_v19 = vld [vmem:[%s3659_s0 + $0x68] ss:$36 sps:$4 sm:$0xff]  }
  0x77   :  { %1592 = vmatpush2.bf16.msra.mxu0 %v2570_v20  ;;  %v2669_v20 = vld [vmem:[%s3659_s0 + $0x188] ss:$36 sps:$4 sm:$0xff]  }
  0x78   :  { %1705 = vmatpush2.bf16.msra.mxu1 %v2573_v21  ;;  %1593 = vmatprep.subr.bf16.mxu0 %v2584_v22  ;;  %v2670_v21 = vld [vmem:[%s3659_s0 + $0xb0] ss:$36 sps:$4 sm:$0xff]  }
  0x79   :  { %1706 = vmatprep.subr.bf16.mxu1 %v2587_v23  ;;  %v2671_v22 = vld [vmem:[%s3659_s0 + $0x1d0] ss:$36 sps:$4 sm:$0xff]   ;;  %v2672_v23 = vld [vmem:[%s3659_s0 + $0xf8] ss:$36 sps:$4 sm:$0xff]  }
  0x7a   :  { %1442 = vmatmul.mubr.bf16.gmra.mxu0 %v2580_v24  ;;  %v2673_v24 = vld [vmem:[%s3659_s0 + $0x218] ss:$36 sps:$4 sm:$0xff]  }
  0x7b   :  { %1555 = vmatmul.mubr.bf16.gmra.mxu1 %v2581_v25  ;;  %1594 = vmatpush2.bf16.msra.mxu0 %v2582_v26  ;;  %v241_v25 = vlaneseq }
  0x7c   :  { %1707 = vmatpush2.bf16.msra.mxu1 %v2585_v27  ;;  %1595 = vmatprep.subr.bf16.mxu0 %v2590_v28  ;;  %v239_v28 = vld [vmem:[%s3660_s2] sm:$0x3] }
  0x7d   :  { %1708 = vmatprep.subr.bf16.mxu1 %v2593_v29  ;;  %1597 = vmatprep.mubr.bf16.mxu0 %v2596_v30  ;;  %v242_v26 = vshrl.u32 %v241_v25, 7 }
  0x7e   :  { %1710 = vmatprep.mubr.bf16.mxu1 %v2599_v31 }
  0x7f   :  { %1596 = vmatpush2.bf16.msra.mxu0 %v2588_v32  ;;  %v243_v27 = vsub.s32 0, %v242_v26  ;;  %v247_v29 = vsub.s32 1, %v242_v26 }
  0x80   :  { %1709 = vmatpush2.bf16.msra.mxu1 %v2591_v33  ;;  %1791 = vmatprep.subr.bf16.mxu0 %v2602_v34 }
  0x81   :  { %2337 = vmatprep.subr.bf16.mxu1 %v2602_v34  ;;  %v3346_v30 = vrot.slane %v239_v28, %v243_v27  ;;  %v3348_v31 = vrot.slane %v239_v28, %v247_v29 }
  0x82   :  { %1598 = vmatmul.mubr.bf16.vlgmr.msra.gmra.mxu0 %v2594_v35 }
  0x83   :  { %1711 = vmatmul.mubr.bf16.vlgmr.msra.gmra.mxu1 %v2597_v36  ;;  %1792 = vmatpush1.bf16.msra.mxu0 %v2600_v37 }
  0x84   :  { %2345 = vmatpush1.bf16.msra.mxu1 %v2600_v37  ;;  %1607 = vmatprep.mubr.bf16.mxu0 %v2603_v38 }
  0x85   :  { %1720 = vmatprep.mubr.bf16.mxu1 %v2605_v39  ;;  %1793 = vmatprep.subr.bf16.mxu0 %v2611_v40 }
  0x86   :  { %2338 = vmatprep.subr.bf16.mxu1 %v2611_v40 }
  0x87   :  { %1794 = vmatpush1.bf16.msra.mxu0 %v2609_v41 }
  0x88   :  { %2346 = vmatpush1.bf16.msra.mxu1 %v2609_v41  ;;  %1795 = vmatprep.subr.bf16.mxu0 %v2620_v42 }
  0x89   :  { %2339 = vmatprep.subr.bf16.mxu1 %v2620_v42 }
  0x8a   :  { %1608 = vmatmul.mubr.bf16.gmra.mxu0 %v2607_v43 }
  0x8b   :  { %1721 = vmatmul.mubr.bf16.gmra.mxu1 %v2608_v44  ;;  %1617 = vmatprep.mubr.bf16.mxu0 %v2612_v45 }
  0x8c   :  { %1730 = vmatprep.mubr.bf16.mxu1 %v2614_v46  ;;  %1796 = vmatpush1.bf16.msra.mxu0 %v2618_v47 }
  0x8d   :  { %2347 = vmatpush1.bf16.msra.mxu1 %v2618_v47  ;;  %1797 = vmatprep.subr.bf16.mxu0 %v2629_v48 }
  0x8e   :  { %2340 = vmatprep.subr.bf16.mxu1 %v2629_v48 }
  0x90   :  { %1798 = vmatpush1.bf16.msra.mxu0 %v2627_v51 }
  0x91   :  { %2348 = vmatpush1.bf16.msra.mxu1 %v2627_v51  ;;  %1799 = vmatprep.subr.bf16.mxu0 %v2638_v52 }
  0x92   :  { %2341 = vmatprep.subr.bf16.mxu1 %v2638_v52  ;;  %1618 = vmatmul.mubr.bf16.gmra.mxu0 %v2616_v49 }
  0x93   :  { %1731 = vmatmul.mubr.bf16.gmra.mxu1 %v2617_v50  ;;  %1627 = vmatprep.mubr.bf16.mxu0 %v2621_v53 }
  0x94   :  { %1740 = vmatprep.mubr.bf16.mxu1 %v2623_v54  ;;  %1800 = vmatpush1.bf16.msra.mxu0 %v2636_v55 }
  0x95   :  { %2349 = vmatpush1.bf16.msra.mxu1 %v2636_v55  ;;  %1801 = vmatprep.subr.bf16.mxu0 %v2647_v56 }
  0x96   :  { %2342 = vmatprep.subr.bf16.mxu1 %v2647_v56 }
  0x98   :  { %1802 = vmatpush1.bf16.msra.mxu0 %v2645_v57 }
  0x99   :  { %2350 = vmatpush1.bf16.msra.mxu1 %v2645_v57  ;;  %1803 = vmatprep.subr.bf16.mxu0 %v2656_v58 }
  0x9a   :  { %2343 = vmatprep.subr.bf16.mxu1 %v2656_v58  ;;  %1628 = vmatmul.mubr.bf16.gmra.mxu0 %v2625_v59 }
  0x9b   :  { %1741 = vmatmul.mubr.bf16.gmra.mxu1 %v2626_v60  ;;  %1637 = vmatprep.mubr.bf16.mxu0 %v2630_v61 }
  0x9c   :  { %1750 = vmatprep.mubr.bf16.mxu1 %v2632_v62  ;;  %1804 = vmatpush1.bf16.msra.mxu0 %v2654_v63 }
  0x9d   :  { %2351 = vmatpush1.bf16.msra.mxu1 %v2654_v63  ;;  %1805 = vmatprep.subr.bf16.mxu0 %v2665_v0 }
  0x9e   :  { %2344 = vmatprep.subr.bf16.mxu1 %v2665_v0 }
  0xa0   :  { %1806 = vmatpush1.bf16.msra.mxu0 %v2663_v1 }
  0xa1   :  { %2352 = vmatpush1.bf16.msra.mxu1 %v2663_v1 }
  0xa2   :  { %1638 = vmatmul.mubr.bf16.gmra.mxu0 %v2634_v2 }
  0xa3   :  { %1751 = vmatmul.mubr.bf16.gmra.mxu1 %v2635_v3  ;;  %1647 = vmatprep.mubr.bf16.mxu0 %v2639_v4 }
  0xa4   :  { %1760 = vmatprep.mubr.bf16.mxu1 %v2641_v5 }
  0xaa   :  { %1648 = vmatmul.mubr.bf16.gmra.mxu0 %v2643_v6 }
  0xab   :  { %1761 = vmatmul.mubr.bf16.gmra.mxu1 %v2644_v7  ;;  %1657 = vmatprep.mubr.bf16.mxu0 %v2648_v8 }
  0xac   :  { %1770 = vmatprep.mubr.bf16.mxu1 %v2650_v9 }
  0xb2   :  { %1658 = vmatmul.mubr.bf16.gmra.mxu0 %v2652_v10 }
  0xb3   :  { %1771 = vmatmul.mubr.bf16.gmra.mxu1 %v2653_v11  ;;  %1667 = vmatprep.mubr.bf16.mxu0 %v2657_v12 }
  0xb4   :  { %1780 = vmatprep.mubr.bf16.mxu1 %v2659_v13 }
  0xba   :  { %1668 = vmatmul.mubr.bf16.gmra.mxu0 %v2661_v14 }
  0xbb   :  { %1781 = vmatmul.mubr.bf16.gmra.mxu1 %v2662_v15  ;;  %1823 = vmatprep.mubr.bf16.mxu0 %v2674_v16 }
  0xbc   :  { %1863 = vmatprep.mubr.bf16.mxu1 %v2674_v16 }
  0xc2   :  { %1824 = vmatmul.mubr.bf16.vlgmr.msra.gmra.mxu0 %v2666_v17 }
  0xc3   :  { %1864 = vmatmul.mubr.bf16.vlgmr.msra.gmra.mxu1 %v2667_v18  ;;  %1833 = vmatprep.mubr.bf16.mxu0 %v2674_v16 }
  0xc4   :  { %1873 = vmatprep.mubr.bf16.mxu1 %v2674_v16 }
  0xca   :  { %1834 = vmatmul.mubr.bf16.gmra.mxu0 %v2668_v19 }
  0xcb   :  { %1874 = vmatmul.mubr.bf16.gmra.mxu1 %v2669_v20  ;;  %1843 = vmatprep.mubr.bf16.mxu0 %v2674_v16 }
  0xcc   :  { %1883 = vmatprep.mubr.bf16.mxu1 %v2674_v16 }
  0xd2   :  { %1844 = vmatmul.mubr.bf16.gmra.mxu0 %v2670_v21 }
  0xd3   :  { %1884 = vmatmul.mubr.bf16.gmra.mxu1 %v2671_v22  ;;  %1853 = vmatprep.mubr.bf16.mxu0 %v2674_v16 }
  0xd4   :  { %1893 = vmatprep.mubr.bf16.mxu1 %v2674_v16 }
  0xda   :  { %1854 = vmatmul.mubr.bf16.gmra.mxu0 %v2672_v23 }
  0xdb   :  { %1894 = vmatmul.mubr.bf16.gmra.mxu1 %v2673_v24 }
 0x102   :  { %v1373_v32 = vpop.f32.mrf.mxu0 }
 0x103   :  { %v1486_v33 = vpop.f32.mrf.mxu1  ;;  %v1374_v34 = vadd.f32 %v1373_v32, %v3346_v30 }
 0x104   :  { %v1375_v35 = vpop.f32.mrf.mxu0 }
 0x105   :  { %v1488_v36 = vpop.f32.mrf.mxu1  ;;  %v3351_v37 = vadd.f32 %v1486_v33, %v1374_v34  ;;  %v1376_v38 = vadd.f32 %v1375_v35, %v3348_v31 }
 0x106   :  { %v1377_v39 = vpop.f32.mrf.mxu0 }
 0x107   :  { %v1490_v40 = vpop.f32.mrf.mxu1  ;;  %v3354_v41 = vadd.f32 %v1488_v36, %v1376_v38  ;;  %v1378_v42 = vadd.f32 %v1377_v39, %v3346_v30 }
 0x108   :  { %v1379_v43 = vpop.f32.mrf.mxu0 }
 0x109   :  { %v1492_v44 = vpop.f32.mrf.mxu1  ;;  %v3357_v45 = vadd.f32 %v1490_v40, %v1378_v42  ;;  %v1380_v46 = vadd.f32 %v1379_v43, %v3348_v31 }
 0x10a   :  { %v1383_v47 = vpop.f32.mrf.mxu0 }
 0x10b   :  { %v1496_v48 = vpop.f32.mrf.mxu1  ;;  %v3360_v49 = vadd.f32 %v1492_v44, %v1380_v46  ;;  %v1384_v50 = vadd.f32 %v1383_v47, %v3346_v30 }
 0x10c   :  { %v1385_v51 = vpop.f32.mrf.mxu0 }
 0x10d   :  { %v1498_v52 = vpop.f32.mrf.mxu1  ;;  %v3363_v53 = vadd.f32 %v1496_v48, %v1384_v50  ;;  %v1386_v54 = vadd.f32 %v1385_v51, %v3348_v31 }
 0x10e   :  { %v1387_v55 = vpop.f32.mrf.mxu0 }
 0x10f   :  { %v1500_v56 = vpop.f32.mrf.mxu1  ;;  %v3366_v57 = vadd.f32 %v1498_v52, %v1386_v54  ;;  %v1388_v58 = vadd.f32 %v1387_v55, %v3346_v30 }
 0x110   :  { %v1389_v59 = vpop.f32.mrf.mxu0 }
 0x111   :  { %v1502_v60 = vpop.f32.mrf.mxu1  ;;  %v3369_v61 = vadd.f32 %v1500_v56, %v1388_v58  ;;  %v1390_v62 = vadd.f32 %v1389_v59, %v3348_v31 }
 0x112   :  { %v1393_v63 = vpop.f32.mrf.mxu0 }
 0x113   :  { %v1506_v0 = vpop.f32.mrf.mxu1  ;;  %v3372_v1 = vadd.f32 %v1502_v60, %v1390_v62  ;;  %v1394_v2 = vadd.f32 %v1393_v63, %v3346_v30 }
 0x114   :  { %v1395_v3 = vpop.f32.mrf.mxu0 }
 0x115   :  { %v1508_v4 = vpop.f32.mrf.mxu1  ;;  %v3375_v5 = vadd.f32 %v1506_v0, %v1394_v2  ;;  %v1396_v6 = vadd.f32 %v1395_v3, %v3348_v31 }
 0x116   :  { %v1397_v7 = vpop.f32.mrf.mxu0 }
 0x117   :  { %v1510_v8 = vpop.f32.mrf.mxu1  ;;  %v3378_v9 = vadd.f32 %v1508_v4, %v1396_v6  ;;  %v1398_v10 = vadd.f32 %v1397_v7, %v3346_v30 }
 0x118   :  { %v1399_v11 = vpop.f32.mrf.mxu0 }
 0x119   :  { %v1512_v12 = vpop.f32.mrf.mxu1  ;;  %v3381_v13 = vadd.f32 %v1510_v8, %v1398_v10  ;;  %v1400_v14 = vadd.f32 %v1399_v11, %v3348_v31 }
 0x11a   :  { %v1403_v15 = vpop.f32.mrf.mxu0 }
 0x11b   :  { %v1516_v16 = vpop.f32.mrf.mxu1  ;;  %v3384_v17 = vadd.f32 %v1512_v12, %v1400_v14  ;;  %v1404_v18 = vadd.f32 %v1403_v15, %v3346_v30 }
 0x11c   :  { %v1405_v19 = vpop.f32.mrf.mxu0 }
 0x11d   :  { %v1518_v20 = vpop.f32.mrf.mxu1  ;;  %v3387_v21 = vadd.f32 %v1516_v16, %v1404_v18  ;;  %v1406_v22 = vadd.f32 %v1405_v19, %v3348_v31 }
 0x11e   :  { %v1407_v23 = vpop.f32.mrf.mxu0 }
 0x11f   :  { %v1520_v24 = vpop.f32.mrf.mxu1  ;;  %v3390_v25 = vadd.f32 %v1518_v20, %v1406_v22  ;;  %v1408_v26 = vadd.f32 %v1407_v23, %v3346_v30 }
 0x120   :  { %v1409_v27 = vpop.f32.mrf.mxu0 }
 0x121   :  { %3662 = vst [vmem:[#allocation2_spill] sm:$0xff] %v3390_v25  ;;  %v1522_v28 = vpop.f32.mrf.mxu1  ;;  %v3393_v29 = vadd.f32 %v1520_v24, %v1408_v26  ;;  %v1410_v32 = vadd.f32 %v1409_v27, %v3348_v31 }
 0x122   :  { %v1413_v33 = vpop.f32.mrf.mxu0 }
 0x123   :  { %v1526_v34 = vpop.f32.mrf.mxu1  ;;  %v3396_v35 = vadd.f32 %v1522_v28, %v1410_v32  ;;  %v1414_v36 = vadd.f32 %v1413_v33, %v3346_v30 }
 0x124   :  { %v1415_v38 = vpop.f32.mrf.mxu0 }
 0x125   :  { %3663 = vst [vmem:[#allocation3_spill] sm:$0xff] %v3396_v35  ;;  %v1528_v39 = vpop.f32.mrf.mxu1  ;;  %v3399_v40 = vadd.f32 %v1526_v34, %v1414_v36  ;;  %v1416_v42 = vadd.f32 %v1415_v38, %v3348_v31 }
 0x126   :  { %v1417_v43 = vpop.f32.mrf.mxu0 }
 0x127   :  { %v1530_v44 = vpop.f32.mrf.mxu1  ;;  %v3402_v46 = vadd.f32 %v1528_v39, %v1416_v42  ;;  %v1418_v47 = vadd.f32 %v1417_v43, %v3346_v30 }
 0x128   :  { %v1419_v48 = vpop.f32.mrf.mxu0 }
 0x129   :  { %v1532_v50 = vpop.f32.mrf.mxu1  ;;  %v3405_v51 = vadd.f32 %v1530_v44, %v1418_v47  ;;  %v1420_v52 = vadd.f32 %v1419_v48, %v3348_v31 }
 0x12a   :  { %v1423_v54 = vpop.f32.mrf.mxu0 }
 0x12b   :  { %v1536_v55 = vpop.f32.mrf.mxu1  ;;  %v3408_v56 = vadd.f32 %v1532_v50, %v1420_v52  ;;  %v1424_v58 = vadd.f32 %v1423_v54, %v3346_v30 }
 0x12c   :  { %v1425_v59 = vpop.f32.mrf.mxu0 }
 0x12d   :  { %v1538_v60 = vpop.f32.mrf.mxu1  ;;  %v3411_v62 = vadd.f32 %v1536_v55, %v1424_v58  ;;  %v1426_v63 = vadd.f32 %v1425_v59, %v3348_v31 }
 0x12e   :  { %v1427_v0 = vpop.f32.mrf.mxu0 }
 0x12f   :  { %v1540_v2 = vpop.f32.mrf.mxu1  ;;  %v3414_v3 = vadd.f32 %v1538_v60, %v1426_v63  ;;  %v1428_v4 = vadd.f32 %v1427_v0, %v3346_v30 }
 0x130   :  { %v1429_v6 = vpop.f32.mrf.mxu0 }
 0x131   :  { %v1542_v7 = vpop.f32.mrf.mxu1  ;;  %v3417_v8 = vadd.f32 %v1540_v2, %v1428_v4  ;;  %v1430_v10 = vadd.f32 %v1429_v6, %v3348_v31 }
 0x132   :  { %v1433_v11 = vpop.f32.mrf.mxu0 }
 0x133   :  { %v1546_v12 = vpop.f32.mrf.mxu1  ;;  %v3420_v14 = vadd.f32 %v1542_v7, %v1430_v10  ;;  %v1434_v15 = vadd.f32 %v1433_v11, %v3346_v30 }
 0x134   :  { %v1435_v16 = vpop.f32.mrf.mxu0 }
 0x135   :  { %v1548_v18 = vpop.f32.mrf.mxu1  ;;  %v3423_v19 = vadd.f32 %v1546_v12, %v1434_v15  ;;  %v1436_v20 = vadd.f32 %v1435_v16, %v3348_v31 }
 0x136   :  { %v1437_v22 = vpop.f32.mrf.mxu0 }
 0x137   :  { %v1550_v23 = vpop.f32.mrf.mxu1  ;;  %v3426_v24 = vadd.f32 %v1548_v18, %v1436_v20  ;;  %v1438_v26 = vadd.f32 %v1437_v22, %v3346_v30 }
 0x138   :  { %v1439_v27 = vpop.f32.mrf.mxu0 }
 0x139   :  { %v1552_v28 = vpop.f32.mrf.mxu1  ;;  %v3429_v32 = vadd.f32 %v1550_v23, %v1438_v26  ;;  %v1440_v33 = vadd.f32 %v1439_v27, %v3348_v31 }
 0x13a   :  { %v1443_v34 = vpop.f32.mrf.mxu0 }
 0x13b   :  { %3664 = vst [vmem:[#allocation4_spill] sm:$0xff] %v3429_v32  ;;  %v1556_v36 = vpop.f32.mrf.mxu1  ;;  %v3432_v38 = vadd.f32 %v1552_v28, %v1440_v33  ;;  %v1444_v39 = vadd.f32 %v1443_v34, %v3346_v30 }
 0x13c   :  { %v1445_v42 = vpop.f32.mrf.mxu0 }
 0x13d   :  { %v1558_v43 = vpop.f32.mrf.mxu1  ;;  %v3435_v44 = vadd.f32 %v1556_v36, %v1444_v39  ;;  %v1446_v47 = vadd.f32 %v1445_v42, %v3348_v31 }
 0x13e   :  { %v1447_v48 = vpop.f32.mrf.mxu0 }
 0x13f   :  { %3665 = vst [vmem:[#allocation5_spill] sm:$0xff] %v3435_v44  ;;  %v1560_v50 = vpop.f32.mrf.mxu1  ;;  %v3438_v52 = vadd.f32 %v1558_v43, %v1446_v47  ;;  %v1448_v54 = vadd.f32 %v1447_v48, %v3346_v30 }
 0x140   :  { %v1449_v55 = vpop.f32.mrf.mxu0 }
 0x141   :  { %3666 = vst [vmem:[#allocation6_spill] sm:$0xff] %v3438_v52  ;;  %v1562_v58 = vpop.f32.mrf.mxu1  ;;  %v3441_v59 = vadd.f32 %v1560_v50, %v1448_v54  ;;  %v1450_v60 = vadd.f32 %v1449_v55, %v3348_v31 }
 0x142   :  { %v1599_v63 = vpop.f32.mrf.mxu0 }
 0x143   :  { %3667 = vst [vmem:[#allocation7_spill] sm:$0xff] %v3441_v59  ;;  %v1712_v0 = vpop.f32.mrf.mxu1  ;;  %v3444_v2 = vadd.f32 %v1562_v58, %v1450_v60  ;;  %v1600_v4 = vadd.f32 %v1599_v63, %v3351_v37 }
 0x144   :  { %v3447_v6 = vpop.f32.mrf.mxu0 }
 0x145   :  { %3668 = vst [vmem:[#allocation8_spill] sm:$0xff] %v3444_v2  ;;  %v3449_v7 = vpop.f32.mrf.mxu1  ;;  %v3451_v10 = vadd.f32 %v1712_v0, %v1600_v4 }
 0x146   :  { %v1603_v11 = vpop.f32.mrf.mxu0 }
 0x147   :  { %v1716_v30 = vpop.f32.mrf.mxu1  ;;  %v1604_v12 = vadd.f32 %v1603_v11, %v3357_v45 }
 0x148   :  { %v3454_v15 = vpop.f32.mrf.mxu0 }
 0x149   :  { %v3456_v16 = vpop.f32.mrf.mxu1  ;;  %v3458_v31 = vadd.f32 %v1716_v30, %v1604_v12 }
 0x14a   :  { %v1609_v18 = vpop.f32.mrf.mxu0 }
 0x14b   :  { %v1722_v20 = vpop.f32.mrf.mxu1  ;;  %v1610_v37 = vadd.f32 %v1609_v18, %v3363_v53 }
 0x14c   :  { %v3461_v22 = vpop.f32.mrf.mxu0 }
 0x14d   :  { %v3463_v23 = vpop.f32.mrf.mxu1  ;;  %v3465_v26 = vadd.f32 %v1722_v20, %v1610_v37 }
 0x14e   :  { %v1613_v27 = vpop.f32.mrf.mxu0 }
 0x14f   :  { %v1726_v28 = vpop.f32.mrf.mxu1  ;;  %v1614_v45 = vadd.f32 %v1613_v27, %v3369_v61 }
 0x150   :  { %v3468_v33 = vpop.f32.mrf.mxu0 }
 0x151   :  { %v3470_v34 = vpop.f32.mrf.mxu1  ;;  %v3472_v36 = vadd.f32 %v1726_v28, %v1614_v45 }
 0x152   :  { %v1619_v39 = vpop.f32.mrf.mxu0 }
 0x153   :  { %v1732_v42 = vpop.f32.mrf.mxu1  ;;  %v1620_v53 = vadd.f32 %v1619_v39, %v3375_v5 }
 0x154   :  { %v3475_v43 = vpop.f32.mrf.mxu0 }
 0x155   :  { %v3477_v47 = vpop.f32.mrf.mxu1  ;;  %v3479_v48 = vadd.f32 %v1732_v42, %v1620_v53 }
 0x156   :  { %v1623_v50 = vpop.f32.mrf.mxu0 }
 0x157   :  { %3669 = vst [vmem:[#allocation9_spill] sm:$0xff] %v3479_v48  ;;  %v1736_v54 = vpop.f32.mrf.mxu1  ;;  %v1624_v61 = vadd.f32 %v1623_v50, %v3381_v13 }
 0x158   :  { %v3482_v55 = vpop.f32.mrf.mxu0 }
 0x159   :  { %v3484_v58 = vpop.f32.mrf.mxu1  ;;  %v3486_v60 = vadd.f32 %v1736_v54, %v1624_v61 }
 0x15a   :  { %3670 = vst [vmem:[#allocation10_spill] sm:$0xff] %v3484_v58  ;;  %v1629_v63 = vpop.f32.mrf.mxu0  ;;  %v1602_v58 = vadd.f32 %v3447_v6, %v3354_v41 }
 0x15b   :  { %3671 = vst [vmem:[#allocation11_spill] sm:$0xff] %v3486_v60  ;;  %v1742_v0 = vpop.f32.mrf.mxu1  ;;  %v1630_v5 = vadd.f32 %v1629_v63, %v3387_v21 }
 0x15c   :  { %v3489_v4 = vpop.f32.mrf.mxu0 }
 0x15d   :  { %3672 = vst [vmem:[#allocation12_spill] sm:$0xff] %v3489_v4  ;;  %v3491_v11 = vpop.f32.mrf.mxu1  ;;  %v3493_v30 = vadd.f32 %v1742_v0, %v1630_v5 }
 0x15e   :  { %3673 = vst [vmem:[#allocation13_spill] sm:$0xff] %v3491_v11  ;;  %v1633_v12 = vpop.f32.mrf.mxu0 }
 0x15f   :  { %3674 = vst [vmem:[#allocation14_spill] sm:$0xff] %v3493_v30  ;;  %v1746_v18 = vpop.f32.mrf.mxu1  ;;  %v1634_v13 = vadd.f32 %v1633_v12, %v3393_v29 }
 0x160   :  { %v3496_v20 = vpop.f32.mrf.mxu0 }
 0x161   :  { %3675 = vst [vmem:[#allocation15_spill] sm:$0xff] %v3496_v20  ;;  %v3498_v37 = vpop.f32.mrf.mxu1  ;;  %v3500_v27 = vadd.f32 %v1746_v18, %v1634_v13 }
 0x162   :  { %3676 = vst [vmem:[#allocation16_spill] sm:$0xff] %v3498_v37  ;;  %v1639_v28 = vpop.f32.mrf.mxu0 }
 0x163   :  { %3677 = vst [vmem:[#allocation17_spill] sm:$0xff] %v3500_v27  ;;  %v1752_v45 = vpop.f32.mrf.mxu1 }
 0x164   :  { %v1641_v39 = vpop.f32.mrf.mxu0 }
 0x165   :  { %v1754_v21 = vpop.f32.mrf.mxu1 }
 0x166   :  { %v1643_v42 = vpop.f32.mrf.mxu0 }
 0x167   :  { %v1756_v53 = vpop.f32.mrf.mxu1  ;;  %v1644_v41 = vadd.f32 %v1643_v42, %v3405_v51 }
 0x168   :  { %v1645_v50 = vpop.f32.mrf.mxu0 }
 0x169   :  { %v1758_v54 = vpop.f32.mrf.mxu1 }
 0x16a   :  { %v1649_v61 = vpop.f32.mrf.mxu0 }
 0x16b   :  { %v3502_v63 = vpop.f32.mrf.mxu1 }
 0x16c   :  { %v1651_v0 = vpop.f32.mrf.mxu0 }
 0x16d   :  { %v1764_v5 = vpop.f32.mrf.mxu1 }
 0x16e   :  { %v3504_v29 = vpop.f32.mrf.mxu0 }
 0x16f   :  { %v3506_v12 = vpop.f32.mrf.mxu1 }
 0x170   :  { %v1655_v30 = vpop.f32.mrf.mxu0 }
 0x171   :  { %v3508_v18 = vpop.f32.mrf.mxu1 }
 0x172   :  { %v3510_v13 = vpop.f32.mrf.mxu0 }
 0x173   :  { %v3512_v27 = vpop.f32.mrf.mxu1 }
 0x174   :  { %3678 = vst [vmem:[#allocation18_spill] sm:$0xff] %v3512_v27  ;;  %v3514_v37 = vpop.f32.mrf.mxu0 }
 0x175   :  { %v3516_v59 = vpop.f32.mrf.mxu1 }
 0x176   :  { %v3518_v60 = vpop.f32.mrf.mxu0 }
 0x177   :  { %3679 = vst [vmem:[#allocation19_spill] sm:$0xff] %v3518_v60  ;;  %v3520_v2 = vpop.f32.mrf.mxu1 }
 0x178   :  { %3680 = vst [vmem:[#allocation20_spill] sm:$0xff] %v3520_v2  ;;  %v3522_v20 = vpop.f32.mrf.mxu0  ;;  %v1642_v2 = vadd.f32 %v1641_v39, %v3402_v46 }
 0x179   :  { %v3524_v35 = vpop.f32.mrf.mxu1 }
 0x17a   :  { %3681 = vst [vmem:[#allocation21_spill] sm:$0xff] %v3524_v35  ;;  %v3526_v11 = vpop.f32.mrf.mxu0  ;;  %v1755_v32 = vadd.f32 %v1754_v21, %v1642_v2  ;;  %v1757_v21 = vadd.f32 %v1756_v53, %v1644_v41 }
 0x17b   :  { %3682 = vst [vmem:[#allocation22_spill] sm:$0xff] %v3526_v11  ;;  %v3528_v44 = vpop.f32.mrf.mxu1  ;;  %v1640_v11 = vadd.f32 %v1639_v28, %v3399_v40  ;;  %v1612_v40 = vadd.f32 %v3461_v22, %v3366_v57 }
 0x17c   :  { %3683 = vst [vmem:[#allocation23_spill] sm:$0xff] %v3528_v44  ;;  %v3530_v48 = vpop.f32.mrf.mxu0  ;;  %v1606_v44 = vadd.f32 %v3454_v15, %v3360_v49 }
 0x17d   :  { %3684 = vst [vmem:[#allocation24_spill] sm:$0xff] %v3530_v48  ;;  %v3532_v52 = vpop.f32.mrf.mxu1  ;;  %v1753_v39 = vadd.f32 %v1752_v45, %v1640_v11  ;;  %v1650_v11 = vadd.f32 %v1649_v61, %v3411_v62  ;;  %v1725_v57 = vadd.f32 %v3463_v23, %v1612_v40  ;;  %v1622_v61 = vadd.f32 %v3475_v43, %v3378_v9 }
 0x17e   :  { %3685 = vst [vmem:[#allocation25_spill] sm:$0xff] %v3532_v52  ;;  %v3534_v4 = vpop.f32.mrf.mxu0  ;;  %v1646_v52 = vadd.f32 %v1645_v50, %v3408_v56  ;;  %v1652_v56 = vadd.f32 %v1651_v0, %v3414_v3  ;;  %v1616_v3 = vadd.f32 %v3468_v33, %v3372_v1  ;;  %v1662_v0 = vadd.f32 %v3514_v37, %v3426_v24 }
 0x17f   :  { %3686 = vst [vmem:[#allocation26_spill] sm:$0xff] %v3534_v4  ;;  %v3536_v25 = vpop.f32.mrf.mxu1  ;;  %v1763_v1 = vadd.f32 %v3502_v63, %v1650_v11  ;;  %v1660_v24 = vadd.f32 %v3510_v13, %v3423_v19  ;;  %v1735_v40 = vadd.f32 %v3477_v47, %v1622_v61 }
 0x180   :  { %3687 = vst [vmem:[#allocation27_spill] sm:$0xff] %v3536_v25  ;;  %v3541_v60 = vpop.f32.mrf.mxu0  ;;  %v1715_v25 = vadd.f32 %v3449_v7, %v1602_v58  ;;  %v1759_v49 = vadd.f32 %v1758_v54, %v1646_v52  ;;  %v1765_v52 = vadd.f32 %v1764_v5, %v1652_v56  ;;  %v1729_v54 = vadd.f32 %v3470_v34, %v1616_v3 }
 0x181   :  { %3688 = vst [vmem:[#allocation28_spill] sm:$0xff] %v3541_v60  ;;  %v3543_v35 = vpop.f32.mrf.mxu1  ;;  %v1666_v56 = vadd.f32 %v3522_v20, %v3432_v38 }
 0x182   :  { %3689 = vst [vmem:[#allocation29_spill] sm:$0xff] %v3543_v35  ;;  %v1825_v48 = vpop.f32.mrf.mxu0  ;;  %v1719_v35 = vadd.f32 %v3456_v16, %v1606_v44 }
 0x183   :  { %v1865_v4 = vpop.f32.mrf.mxu1  ;;  %v1826_v7 = vadd.f32 %v1825_v48, %v3451_v10  ;;  %v1656_v10 = vadd.f32 %v1655_v30, %v3420_v14  ;;  %v1654_v14 = vadd.f32 %v3504_v29, %v3417_v8 }
 0x184   :  { %v1827_v6 = vpop.f32.mrf.mxu0  ;;  %v1866_v2 = vadd.f32 %v1865_v4, %v1753_v39  ;;  %v3698_v3 = vld [vmem:[#allocation24_spill] sm:$0xff] }
 0x185   :  { %v1867_v46 = vpop.f32.mrf.mxu1  ;;  %v1828_v60 = vadd.f32 %v1827_v6, %v1715_v25  ;;  %v1767_v43 = vadd.f32 %v3506_v12, %v1654_v14 }
 0x186   :  { %v1868_v27 = vadd.f32 %v1867_v46, %v1755_v32  ;;  %v1829_v15 = vpop.f32.mrf.mxu0 }
 0x187   :  { %v1869_v28 = vpop.f32.mrf.mxu1  ;;  %v1910_v58 = vmax.f32 %v1828_v60, 0.0 }
 0x188   :  { %v1926_v51 = vmax.f32 %v1868_v27, 0.0  ;;  %v1831_v25 = vpop.f32.mrf.mxu0  ;;  %v1870_v62 = vadd.f32 %v1869_v28, %v1757_v21  ;;  %v3691_v28 = vld [vmem:[#allocation4_spill] sm:$0xff] }
 0x189   :  { %v1871_v32 = vpop.f32.mrf.mxu1  ;;  %v2321_v45 = vpack.c.bf16 %v1910_v58, %v1826_v7  ;;  %v1832_v16 = vadd.f32 %v1831_v25, %v1719_v35  ;;  %v1830_v35 = vadd.f32 %v1829_v15, %v3458_v31  ;;  %v1769_v31 = vadd.f32 %v3508_v18, %v1656_v10  ;;  %v3692_v7 = vld [vmem:[#allocation19_spill] sm:$0xff]  ;;  %v3693_v25 = vld [vmem:[#allocation10_spill] sm:$0xff] }
 0x18a   :  { %v2329_v44 = vpack.c.bf16 %v1926_v51, %v1866_v2  ;;  %v1872_v42 = vadd.f32 %v1871_v32, %v1759_v49  ;;  %v1835_v22 = vpop.f32.mrf.mxu0  ;;  %v1626_v49 = vadd.f32 %v3482_v55, %v3384_v17  ;;  %v3690_v55 = vld [vmem:[#allocation18_spill] sm:$0xff]  ;;  %v1664_v38 = vadd.f32 %v3692_v7, %v3691_v28  ;;  %v3713_v7 = vld [vmem:[#allocation16_spill] sm:$0xff] }
 0x18b   :  { %v1875_v48 = vpop.f32.mrf.mxu1  ;;  %2069 = vst [vmem:[%s3661_s3] sm:$0xff] %v2321_v45  ;;  %v1912_v23 = vmax.f32 %v1832_v16, 0.0  ;;  %v1836_v8 = vadd.f32 %v1835_v22, %v3465_v26  ;;  %v1775_v26 = vadd.f32 %v3516_v59, %v1662_v0  ;;  %v1773_v59 = vadd.f32 %v3690_v55, %v1660_v24  ;;  %v3694_v45 = vld [vmem:[#allocation2_spill] sm:$0xff]  ;;  %v3703_v0 = vld [vmem:[#allocation13_spill] sm:$0xff]  ;;  %v3708_v24 = vld [vmem:[#allocation28_spill] sm:$0xff] }
 0x18c   :  { %2077 = vst [vmem:[%s3661_s3 + $0x40] sm:$0xff] %v2329_v44  ;;  %v1928_v60 = vmax.f32 %v1872_v42, 0.0  ;;  %v1837_v33 = vpop.f32.mrf.mxu0  ;;  %v1876_v34 = vadd.f32 %v1875_v48, %v1763_v1  ;;  %v1739_v32 = vadd.f32 %v3693_v25, %v1626_v49  ;;  %v3695_v44 = vld [vmem:[#allocation12_spill] sm:$0xff]  ;;  %v3699_v48 = vld [vmem:[#allocation9_spill] sm:$0xff] }
 0x18d   :  { %v1877_v4 = vpop.f32.mrf.mxu1  ;;  %v2322_v30 = vpack.c.bf16 %v1912_v23, %v1830_v35  ;;  %v1838_v53 = vadd.f32 %v1837_v33, %v1725_v57  ;;  %v1632_v16 = vadd.f32 %v3695_v44, %v3694_v45  ;;  %v3697_v57 = vld [vmem:[#allocation6_spill] sm:$0xff]  ;;  %v3700_v1 = vld [vmem:[#allocation20_spill] sm:$0xff]  ;;  %v3701_v33 = vld [vmem:[#allocation5_spill] sm:$0xff] }
 0x18e   :  { %v2330_v27 = vpack.c.bf16 %v1928_v60, %v1870_v62  ;;  %v1878_v50 = vadd.f32 %v1877_v4, %v1765_v52  ;;  %v1839_v63 = vpop.f32.mrf.mxu0  ;;  %v1672_v52 = vadd.f32 %v3698_v3, %v3697_v57  ;;  %v1777_v14 = vadd.f32 %v3700_v1, %v1664_v38  ;;  %v3702_v4 = vld [vmem:[#allocation22_spill] sm:$0xff]  ;;  %v3716_v44 = vld [vmem:[#allocation27_spill] sm:$0xff] }
 0x18f   :  { %v1879_v5 = vpop.f32.mrf.mxu1  ;;  %2070 = vst [vmem:[%s3661_s3 + $0x8] sm:$0xff] %v2322_v30  ;;  %v1914_v29 = vmax.f32 %v1838_v53, 0.0  ;;  %v1840_v19 = vadd.f32 %v1839_v63, %v3472_v36  ;;  %v3696_v36 = vld [vmem:[#allocation21_spill] sm:$0xff]  ;;  %v1670_v30 = vadd.f32 %v3702_v4, %v3701_v33  ;;  %v1745_v63 = vadd.f32 %v3703_v0, %v1632_v16 }
 0x190   :  { %2078 = vst [vmem:[%s3661_s3 + $0x48] sm:$0xff] %v2330_v27  ;;  %v1930_v9 = vmax.f32 %v1878_v50, 0.0  ;;  %v1841_v37 = vpop.f32.mrf.mxu0  ;;  %v1880_v47 = vadd.f32 %v1879_v5, %v1767_v43  ;;  %v1779_v42 = vadd.f32 %v3696_v36, %v1666_v56  ;;  %v3704_v5 = vld [vmem:[#allocation3_spill] sm:$0xff]  ;;  %v3707_v43 = vld [vmem:[#allocation8_spill] sm:$0xff] }
 0x191   :  { %v1881_v18 = vpop.f32.mrf.mxu1  ;;  %v2323_v41 = vpack.c.bf16 %v1914_v29, %v1836_v8  ;;  %v1842_v46 = vadd.f32 %v1841_v37, %v1729_v54  ;;  %v3705_v8 = vld [vmem:[#allocation15_spill] sm:$0xff]  ;;  %v3706_v29 = vld [vmem:[#allocation25_spill] sm:$0xff]  ;;  %v1676_v37 = vadd.f32 %v3708_v24, %v3707_v43 }
 0x192   :  { %v2331_v6 = vpack.c.bf16 %v1930_v9, %v1876_v34  ;;  %v1882_v39 = vadd.f32 %v1881_v18, %v1769_v31  ;;  %v1845_v12 = vpop.f32.mrf.mxu0  ;;  %v1636_v34 = vadd.f32 %v3705_v8, %v3704_v5  ;;  %v1785_v9 = vadd.f32 %v3706_v29, %v1672_v52 }
 0x193   :  { %v1885_v15 = vpop.f32.mrf.mxu1  ;;  %2071 = vst [vmem:[%s3661_s3 + $0x10] sm:$0xff] %v2323_v41  ;;  %v1916_v13 = vmax.f32 %v1842_v46, 0.0  ;;  %v1846_v35 = vadd.f32 %v1845_v12, %v3699_v48  ;;  %v3711_v12 = vld [vmem:[#allocation7_spill] sm:$0xff] }
 0x194   :  { %2079 = vst [vmem:[%s3661_s3 + $0x50] sm:$0xff] %v2331_v6  ;;  %v1932_v17 = vmax.f32 %v1882_v39, 0.0  ;;  %v1847_v20 = vpop.f32.mrf.mxu0  ;;  %v1886_v62 = vadd.f32 %v1885_v15, %v1773_v59  ;;  %v3709_v6 = vld [vmem:[#allocation11_spill] sm:$0xff]  ;;  %v3712_v15 = vld [vmem:[#allocation26_spill] sm:$0xff]  ;;  %v1749_v38 = vadd.f32 %v3713_v7, %v1636_v34 }
 0x195   :  { %v1887_v2 = vpop.f32.mrf.mxu1  ;;  %v2324_v58 = vpack.c.bf16 %v1916_v13, %v1840_v19  ;;  %v1848_v21 = vadd.f32 %v1847_v20, %v1735_v40  ;;  %v1674_v19 = vadd.f32 %v3712_v15, %v3711_v12  ;;  %v3714_v20 = vld [vmem:[#allocation29_spill] sm:$0xff] }
 0x196   :  { %v2332_v51 = vpack.c.bf16 %v1932_v17, %v1880_v47  ;;  %v1888_v11 = vadd.f32 %v1887_v2, %v1775_v26  ;;  %v1849_v10 = vpop.f32.mrf.mxu0  ;;  %v3710_v26 = vld [vmem:[#allocation23_spill] sm:$0xff]  ;;  %v1789_v2 = vadd.f32 %v3714_v20, %v1676_v37 }
 0x197   :  { %v1889_v22 = vpop.f32.mrf.mxu1  ;;  %2072 = vst [vmem:[%s3661_s3 + $0x18] sm:$0xff] %v2324_v58  ;;  %v1918_v23 = vmax.f32 %v1848_v21, 0.0  ;;  %v1850_v46 = vadd.f32 %v1849_v10, %v3709_v6  ;;  %v1783_v56 = vadd.f32 %v3710_v26, %v1670_v30  ;;  %v3715_v21 = vld [vmem:[#allocation14_spill] sm:$0xff]  ;;  %v1787_v16 = vadd.f32 %v3716_v44, %v1674_v19 }
 0x198   :  { %2080 = vst [vmem:[%s3661_s3 + $0x58] sm:$0xff] %v2332_v51  ;;  %v1934_v60 = vmax.f32 %v1888_v11, 0.0  ;;  %v1851_v27 = vpop.f32.mrf.mxu0  ;;  %v1890_v39 = vadd.f32 %v1889_v22, %v1777_v14  ;;  %v3717_v22 = vld [vmem:[#allocation17_spill] sm:$0xff] }
 0x199   :  { %v1891_v53 = vpop.f32.mrf.mxu1  ;;  %v2325_v50 = vpack.c.bf16 %v1918_v23, %v1846_v35  ;;  %v1852_v61 = vadd.f32 %v1851_v27, %v1739_v32 }
 0x19a   :  { %v2333_v54 = vpack.c.bf16 %v1934_v60, %v1886_v62  ;;  %v1892_v31 = vadd.f32 %v1891_v53, %v1779_v42  ;;  %v1855_v18 = vpop.f32.mrf.mxu0 }
 0x19b   :  { %v1895_v41 = vpop.f32.mrf.mxu1  ;;  %2073 = vst [vmem:[%s3661_s3 + $0x20] sm:$0xff] %v2325_v50  ;;  %v1920_v40 = vmax.f32 %v1852_v61, 0.0  ;;  %v1856_v11 = vadd.f32 %v1855_v18, %v3715_v21 }
 0x19c   :  { %2081 = vst [vmem:[%s3661_s3 + $0x60] sm:$0xff] %v2333_v54  ;;  %v1936_v49 = vmax.f32 %v1892_v31, 0.0  ;;  %v1857_v47 = vpop.f32.mrf.mxu0  ;;  %v1896_v25 = vadd.f32 %v1895_v41, %v1783_v56 }
 0x19d   :  { %v1897_v13 = vpop.f32.mrf.mxu1  ;;  %v2326_v17 = vpack.c.bf16 %v1920_v40, %v1850_v46  ;;  %v1858_v59 = vadd.f32 %v1857_v47, %v1745_v63 }
 0x19e   :  { %v2334_v55 = vpack.c.bf16 %v1936_v49, %v1890_v39  ;;  %v1898_v28 = vadd.f32 %v1897_v13, %v1785_v9  ;;  %v1859_v58 = vpop.f32.mrf.mxu0 }
 0x19f   :  { %v1899_v51 = vpop.f32.mrf.mxu1  ;;  %2074 = vst [vmem:[%s3661_s3 + $0x28] sm:$0xff] %v2326_v17  ;;  %v1922_v32 = vmax.f32 %v1858_v59, 0.0  ;;  %v1860_v48 = vadd.f32 %v1859_v58, %v3717_v22 }
 0x1a0   :  { %2082 = vst [vmem:[%s3661_s3 + $0x68] sm:$0xff] %v2334_v55  ;;  %v1938_v45 = vmax.f32 %v1898_v28, 0.0  ;;  %v1861_v36 = vpop.f32.mrf.mxu0  ;;  %v1900_v35 = vadd.f32 %v1899_v51, %v1787_v16 }
 0x1a1   :  { %v1901_v42 = vpop.f32.mrf.mxu1  ;;  %v2327_v57 = vpack.c.bf16 %v1922_v32, %v1856_v11  ;;  %v1862_v52 = vadd.f32 %v1861_v36, %v1749_v38 }
 0x1a2   :  { %v2335_v3 = vpack.c.bf16 %v1938_v45, %v1896_v25  ;;  %v1902_v10 = vadd.f32 %v1901_v42, %v1789_v2 }
 0x1a3   :  { %2075 = vst [vmem:[%s3661_s3 + $0x30] sm:$0xff] %v2327_v57  ;;  %v1924_v62 = vmax.f32 %v1862_v52, 0.0 }
 0x1a4   :  { %2083 = vst [vmem:[%s3661_s3 + $0x70] sm:$0xff] %v2335_v3  ;;  %v1940_v23 = vmax.f32 %v1902_v10, 0.0 }
 0x1a5   :  { %v2328_v60 = vpack.c.bf16 %v1924_v62, %v1860_v48 }
 0x1a6   :  { %v2336_v1 = vpack.c.bf16 %v1940_v23, %v1900_v35 }
 0x1a7   :  { %2076 = vst [vmem:[%s3661_s3 + $0x38] sm:$0xff] %v2328_v60 }
 0x1a8   :  { %2084 = vst [vmem:[%s3661_s3 + $0x78] sm:$0xff] %v2336_v1 }

// kernel: byobnet_forward.11
= control target key start
LH: loop header
LB: loop body
LE: loop exit
PB: predicated region body
PF: predicated region fallthrough
CT: control target
= control target key end

     0   :  { %s3196_s1 = inlined_call_operand.vmem [shape: bf16[1152,128], index: 1, kind: input, shape index: {}]   ;;  %s3197_s0 = inlined_call_operand.vmem [shape: bf16[128,1152], index: 0, kind: input, shape index: {}]   ;;  %s3198_s2 = inlined_call_operand.vmem [shape: f32[1,128], index: 2, kind: input, shape index: {}]   ;;  %s3199_s3 = inlined_call_operand.vmem [shape: bf16[128,128], index: 3, kind: input, shape index: {}]   ;;  %s3200_s4 = inlined_call_operand.vmem [shape: bf16[128,128], index: 4, kind: output, shape index: {}]  }
   0x1   :  { %v2265_v0 = vld [vmem:[%s3196_s1 + $0x78] sm:$0xff]   ;;  %v2269_v4 = vld [vmem:[%s3196_s1 + $0x70] sm:$0xff]   ;;  %v2273_v8 = vld [vmem:[%s3196_s1 + $0x68] sm:$0xff]  }
   0x2   :  { %v2266_v1 = vld [vmem:[%s3196_s1 + $0xf8] sm:$0xff]   ;;  %1945 = vmatprep.subr.bf16.mxu0 %v2265_v0  ;;  %v2270_v5 = vld [vmem:[%s3196_s1 + $0xf0] sm:$0xff]   ;;  %v2274_v9 = vld [vmem:[%s3196_s1 + $0xe8] sm:$0xff]  }
   0x3   :  { %v2267_v2 = vld [vmem:[%s3196_s1 + $0x38] sm:$0xff]   ;;  %2009 = vmatprep.subr.bf16.mxu1 %v2266_v1  ;;  %v2271_v6 = vld [vmem:[%s3196_s1 + $0x30] sm:$0xff]   ;;  %v2275_v10 = vld [vmem:[%s3196_s1 + $0x28] sm:$0xff]  }
   0x4   :  { %v2268_v3 = vld [vmem:[%s3196_s1 + $0xb8] sm:$0xff]   ;;  %1946 = vmatpush3.bf16.msra.mxu0 %v2267_v2  ;;  %v2272_v7 = vld [vmem:[%s3196_s1 + $0xb0] sm:$0xff]   ;;  %v2276_v11 = vld [vmem:[%s3196_s1 + $0xa8] sm:$0xff]  }
   0x5   :  { %2010 = vmatpush3.bf16.msra.mxu1 %v2268_v3  ;;  %1947 = vmatprep.subr.bf16.mxu0 %v2269_v4  ;;  %v2277_v12 = vld [vmem:[%s3196_s1 + $0x60] sm:$0xff]   ;;  %v2281_v16 = vld [vmem:[%s3196_s1 + $0x58] sm:$0xff]   ;;  %v2285_v20 = vld [vmem:[%s3196_s1 + $0x50] sm:$0xff]  }
   0x6   :  { %2011 = vmatprep.subr.bf16.mxu1 %v2270_v5  ;;  %v2278_v13 = vld [vmem:[%s3196_s1 + $0xe0] sm:$0xff]   ;;  %v2282_v17 = vld [vmem:[%s3196_s1 + $0xd8] sm:$0xff]   ;;  %v2286_v21 = vld [vmem:[%s3196_s1 + $0xd0] sm:$0xff]  }
   0x7   :  { %v2279_v14 = vld [vmem:[%s3196_s1 + $0x20] sm:$0xff]   ;;  %v2283_v18 = vld [vmem:[%s3196_s1 + $0x18] sm:$0xff]   ;;  %v2287_v22 = vld [vmem:[%s3196_s1 + $0x10] sm:$0xff]  }
   0x8   :  { %1948 = vmatpush3.bf16.msra.mxu0 %v2271_v6  ;;  %v2280_v15 = vld [vmem:[%s3196_s1 + $0xa0] sm:$0xff]   ;;  %v2284_v19 = vld [vmem:[%s3196_s1 + $0x98] sm:$0xff]   ;;  %v2288_v23 = vld [vmem:[%s3196_s1 + $0x90] sm:$0xff]  }
   0x9   :  { %2012 = vmatpush3.bf16.msra.mxu1 %v2272_v7  ;;  %1949 = vmatprep.subr.bf16.mxu0 %v2273_v8  ;;  %v2289_v24 = vld [vmem:[%s3196_s1 + $0x48] sm:$0xff]   ;;  %v2293_v28 = vld [vmem:[%s3196_s1 + $0x40] sm:$0xff]   ;;  %v2303_v36 = vld [vmem:[%s3196_s1 + $0x178] sm:$0xff]  }
   0xa   :  { %2013 = vmatprep.subr.bf16.mxu1 %v2274_v9  ;;  %v2290_v25 = vld [vmem:[%s3196_s1 + $0xc8] sm:$0xff]   ;;  %v2294_v29 = vld [vmem:[%s3196_s1 + $0xc0] sm:$0xff]   ;;  %v2304_v37 = vld [vmem:[%s3196_s1 + $0x1f8] sm:$0xff]  }
   0xb   :  { %v2291_v26 = vld [vmem:[%s3196_s1 + $0x8] sm:$0xff]   ;;  %v2295_v30 = vld [vmem:[%s3196_s1] sm:$0xff]   ;;  %v2305_v38 = vld [vmem:[%s3196_s1 + $0x138] sm:$0xff]  }
   0xc   :  { %1950 = vmatpush3.bf16.msra.mxu0 %v2275_v10  ;;  %v2292_v27 = vld [vmem:[%s3196_s1 + $0x88] sm:$0xff]   ;;  %v2296_v31 = vld [vmem:[%s3196_s1 + $0x80] sm:$0xff]   ;;  %v2306_v39 = vld [vmem:[%s3196_s1 + $0x1b8] sm:$0xff]  }
   0xd   :  { %2014 = vmatpush3.bf16.msra.mxu1 %v2276_v11  ;;  %1951 = vmatprep.subr.bf16.mxu0 %v2277_v12  ;;  %v2297_v32 = vld [vmem:[%s3197_s0] ss:$36 sps:$4 sm:$0xff]   ;;  %v2300_v34 = vld [vmem:[%s3197_s0 + $0x8] ss:$36 sps:$4 sm:$0xff]   ;;  %v2309_v41 = vld [vmem:[%s3197_s0 + $0x54] ss:$36 sps:$4 sm:$0xff]  }
   0xe   :  { %2015 = vmatprep.subr.bf16.mxu1 %v2278_v13  ;;  %v2299_v33 = vld [vmem:[%s3197_s0 + $0x4] ss:$36 sps:$4 sm:$0xff]   ;;  %v2302_v35 = vld [vmem:[%s3197_s0 + $0xc] ss:$36 sps:$4 sm:$0xff]   ;;  %v2317_v48 = vld [vmem:[%s3197_s0 + $0x94] ss:$36 sps:$4 sm:$0xff]  }
   0xf   :  { %1081 = vmatprep.mubr.bf16.mxu0 %v2299_v33  ;;  %1178 = vmatprep.mubr.bf16.mxu1 %v2302_v35  ;;  %v2307_v40 = vld [vmem:[%s3197_s0 + $0x4c] ss:$36 sps:$4 sm:$0xff]   ;;  %v2319_v49 = vld [vmem:[%s3197_s0 + $0x9c] ss:$36 sps:$4 sm:$0xff]   ;;  %v2329_v57 = vld [vmem:[%s3197_s0 + $0xe4] ss:$36 sps:$4 sm:$0xff]  }
  0x10   :  { %1952 = vmatpush3.bf16.msra.mxu0 %v2279_v14  ;;  %v2311_v42 = vld [vmem:[%s3197_s0 + $0x48] ss:$36 sps:$4 sm:$0xff]   ;;  %v2312_v43 = vld [vmem:[%s3197_s0 + $0x50] ss:$36 sps:$4 sm:$0xff]   ;;  %v2322_v51 = vld [vmem:[%s3197_s0 + $0x98] ss:$36 sps:$4 sm:$0xff]  }
  0x11   :  { %2016 = vmatpush3.bf16.msra.mxu1 %v2280_v15  ;;  %1953 = vmatprep.subr.bf16.mxu0 %v2281_v16  ;;  %v2313_v44 = vld [vmem:[%s3196_s1 + $0x170] sm:$0xff]   ;;  %v2323_v52 = vld [vmem:[%s3196_s1 + $0x168] sm:$0xff]   ;;  %v2327_v56 = vld [vmem:[%s3197_s0 + $0xdc] ss:$36 sps:$4 sm:$0xff]  }
  0x12   :  { %2017 = vmatprep.subr.bf16.mxu1 %v2282_v17  ;;  %v2314_v45 = vld [vmem:[%s3196_s1 + $0x1f0] sm:$0xff]   ;;  %v2324_v53 = vld [vmem:[%s3196_s1 + $0x1e8] sm:$0xff]   ;;  %v2331_v58 = vld [vmem:[%s3197_s0 + $0xd8] ss:$36 sps:$4 sm:$0xff]  }
  0x13   :  { %v2315_v46 = vld [vmem:[%s3196_s1 + $0x130] sm:$0xff]   ;;  %v2325_v54 = vld [vmem:[%s3196_s1 + $0x128] sm:$0xff]   ;;  %v2332_v59 = vld [vmem:[%s3197_s0 + $0xe0] ss:$36 sps:$4 sm:$0xff]  }
  0x14   :  { %1954 = vmatpush3.bf16.msra.mxu0 %v2283_v18  ;;  %v2316_v47 = vld [vmem:[%s3196_s1 + $0x1b0] sm:$0xff]   ;;  %v2326_v55 = vld [vmem:[%s3196_s1 + $0x1a8] sm:$0xff]   ;;  %v2333_v60 = vld [vmem:[%s3196_s1 + $0x160] sm:$0xff]  }
  0x15   :  { %2018 = vmatpush3.bf16.msra.mxu1 %v2284_v19  ;;  %1955 = vmatprep.subr.bf16.mxu0 %v2285_v20  ;;  %v2321_v50 = vld [vmem:[%s3197_s0 + $0x90] ss:$36 sps:$4 sm:$0xff]   ;;  %v2334_v61 = vld [vmem:[%s3196_s1 + $0x1e0] sm:$0xff]   ;;  %v2343_v3 = vld [vmem:[%s3196_s1 + $0x158] sm:$0xff]  }
  0x16   :  { %2019 = vmatprep.subr.bf16.mxu1 %v2286_v21  ;;  %v2335_v62 = vld [vmem:[%s3196_s1 + $0x120] sm:$0xff]   ;;  %v2339_v1 = vld [vmem:[%s3197_s0 + $0x12c] ss:$36 sps:$4 sm:$0xff]   ;;  %v2344_v5 = vld [vmem:[%s3196_s1 + $0x1d8] sm:$0xff]  }
  0x17   :  { %v2336_v63 = vld [vmem:[%s3196_s1 + $0x1a0] sm:$0xff]   ;;  %v2342_v4 = vld [vmem:[%s3197_s0 + $0x128] ss:$36 sps:$4 sm:$0xff]   ;;  %v2345_v6 = vld [vmem:[%s3196_s1 + $0x118] sm:$0xff]  }
  0x18   :  { %1956 = vmatpush3.bf16.msra.mxu0 %v2287_v22  ;;  %v2337_v0 = vld [vmem:[%s3197_s0 + $0x124] ss:$36 sps:$4 sm:$0xff]   ;;  %v2346_v7 = vld [vmem:[%s3196_s1 + $0x198] sm:$0xff]   ;;  %v2347_v8 = vld [vmem:[%s3197_s0 + $0x16c] ss:$36 sps:$4 sm:$0xff]  }
  0x19   :  { %2020 = vmatpush3.bf16.msra.mxu1 %v2288_v23  ;;  %1957 = vmatprep.subr.bf16.mxu0 %v2289_v24  ;;  %v2341_v2 = vld [vmem:[%s3197_s0 + $0x120] ss:$36 sps:$4 sm:$0xff]   ;;  %v2349_v9 = vld [vmem:[%s3197_s0 + $0x174] ss:$36 sps:$4 sm:$0xff]   ;;  %v2351_v12 = vld [vmem:[%s3197_s0 + $0x168] ss:$36 sps:$4 sm:$0xff]  }
  0x1a   :  { %2021 = vmatprep.subr.bf16.mxu1 %v2290_v25  ;;  %v2353_v10 = vld [vmem:[%s3196_s1 + $0x150] sm:$0xff]   ;;  %v2359_v17 = vld [vmem:[%s3197_s0 + $0x1bc] ss:$36 sps:$4 sm:$0xff]   ;;  %v2363_v18 = vld [vmem:[%s3196_s1 + $0x148] sm:$0xff]  }
  0x1b   :  { %v2354_v11 = vld [vmem:[%s3196_s1 + $0x1d0] sm:$0xff]   ;;  %v2364_v19 = vld [vmem:[%s3196_s1 + $0x1c8] sm:$0xff]   ;;  %v2362_v23 = vld [vmem:[%s3197_s0 + $0x1b8] ss:$36 sps:$4 sm:$0xff]  }
  0x1c   :  { %1958 = vmatpush3.bf16.msra.mxu0 %v2291_v26  ;;  %v2355_v13 = vld [vmem:[%s3196_s1 + $0x110] sm:$0xff]   ;;  %v2365_v20 = vld [vmem:[%s3196_s1 + $0x108] sm:$0xff]   ;;  %v2367_v24 = vld [vmem:[%s3197_s0 + $0x1fc] ss:$36 sps:$4 sm:$0xff]  }
  0x1d   :  { %2022 = vmatpush3.bf16.msra.mxu1 %v2292_v27  ;;  %1959 = vmatprep.subr.bf16.mxu0 %v2293_v28  ;;  %v2356_v14 = vld [vmem:[%s3196_s1 + $0x190] sm:$0xff]   ;;  %v2366_v21 = vld [vmem:[%s3196_s1 + $0x188] sm:$0xff]   ;;  %v2373_v26 = vld [vmem:[%s3196_s1 + $0x140] sm:$0xff]  }
  0x1e   :  { %2023 = vmatprep.subr.bf16.mxu1 %v2294_v29  ;;  %v2352_v15 = vld [vmem:[%s3197_s0 + $0x170] ss:$36 sps:$4 sm:$0xff]   ;;  %v2369_v25 = vld [vmem:[%s3197_s0 + $0x204] ss:$36 sps:$4 sm:$0xff]  }
  0x1f   :  { %v2357_v16 = vld [vmem:[%s3197_s0 + $0x1b4] ss:$36 sps:$4 sm:$0xff]   ;;  %v2374_v27 = vld [vmem:[%s3196_s1 + $0x1c0] sm:$0xff]  }
  0x20   :  { %1960 = vmatpush3.bf16.msra.mxu0 %v2295_v30  ;;  %v2361_v22 = vld [vmem:[%s3197_s0 + $0x1b0] ss:$36 sps:$4 sm:$0xff]   ;;  %v2375_v28 = vld [vmem:[%s3196_s1 + $0x100] sm:$0xff]   ;;  %v2371_v30 = vld [vmem:[%s3197_s0 + $0x1f8] ss:$36 sps:$4 sm:$0xff]  }
  0x21   :  { %2024 = vmatpush3.bf16.msra.mxu1 %v2296_v31  ;;  %2073 = vmatprep.subr.bf16.mxu0 %v2303_v36  ;;  %v2376_v29 = vld [vmem:[%s3196_s1 + $0x180] sm:$0xff]   ;;  %v2379_v33 = vld [vmem:[%s3197_s0 + $0x14] ss:$36 sps:$4 sm:$0xff]  }
  0x22   :  { %2137 = vmatprep.subr.bf16.mxu1 %v2304_v37  ;;  %v2372_v31 = vld [vmem:[%s3197_s0 + $0x200] ss:$36 sps:$4 sm:$0xff]   ;;  %v2377_v35 = vld [vmem:[%s3197_s0 + $0x10] ss:$36 sps:$4 sm:$0xff]   ;;  %v2380_v36 = vld [vmem:[%s3197_s0 + $0x18] ss:$36 sps:$4 sm:$0xff]  }
  0x23   :  { %1082 = vmatmul.mubr.bf16.vlgmr.msra.gmra.mxu0 %v2297_v32  ;;  %v2383_v32 = vld [vmem:[%s3196_s1 + $0x238] sm:$0xff]  }
  0x24   :  { %1179 = vmatmul.mubr.bf16.vlgmr.msra.gmra.mxu1 %v2300_v34  ;;  %2074 = vmatpush3.bf16.msra.mxu0 %v2305_v38  ;;  %v2382_v34 = vld [vmem:[%s3197_s0 + $0x1c] ss:$36 sps:$4 sm:$0xff]   ;;  %v2386_v38 = vld [vmem:[%s3197_s0 + $0x64] ss:$36 sps:$4 sm:$0xff]  }
  0x25   :  { %2138 = vmatpush3.bf16.msra.mxu1 %v2306_v39  ;;  %1089 = vmatprep.mubr.bf16.mxu0 %v2307_v40  ;;  %v2384_v37 = vld [vmem:[%s3197_s0 + $0x5c] ss:$36 sps:$4 sm:$0xff]   ;;  %v2390_v39 = vld [vmem:[%s3196_s1 + $0x230] sm:$0xff]   ;;  %v2397_v40 = vld [vmem:[%s3196_s1 + $0x228] sm:$0xff]  }
  0x26   :  { %1186 = vmatprep.mubr.bf16.mxu1 %v2309_v41  ;;  %2075 = vmatprep.subr.bf16.mxu0 %v2313_v44  ;;  %v2388_v41 = vld [vmem:[%s3197_s0 + $0x58] ss:$36 sps:$4 sm:$0xff]   ;;  %v2393_v44 = vld [vmem:[%s3197_s0 + $0xac] ss:$36 sps:$4 sm:$0xff]  }
  0x27   :  { %2139 = vmatprep.subr.bf16.mxu1 %v2314_v45  ;;  %v2404_v45 = vld [vmem:[%s3196_s1 + $0x220] sm:$0xff]  }
  0x28   :  { %2076 = vmatpush3.bf16.msra.mxu0 %v2315_v46  ;;  %v2411_v46 = vld [vmem:[%s3196_s1 + $0x218] sm:$0xff]  }
  0x29   :  { %2140 = vmatpush3.bf16.msra.mxu1 %v2316_v47  ;;  %2077 = vmatprep.subr.bf16.mxu0 %v2323_v52  ;;  %v2395_v47 = vld [vmem:[%s3197_s0 + $0xa0] ss:$36 sps:$4 sm:$0xff]   ;;  %v2402_v52 = vld [vmem:[%s3197_s0 + $0xe8] ss:$36 sps:$4 sm:$0xff]  }
  0x2a   :  { %2141 = vmatprep.subr.bf16.mxu1 %v2324_v53  ;;  %v2425_v53 = vld [vmem:[%s3196_s1 + $0x208] sm:$0xff]  }
  0x2b   :  { %1090 = vmatmul.mubr.bf16.gmra.mxu0 %v2311_v42  ;;  %v2389_v42 = vld [vmem:[%s3197_s0 + $0x60] ss:$36 sps:$4 sm:$0xff]  }
  0x2c   :  { %1187 = vmatmul.mubr.bf16.gmra.mxu1 %v2312_v43  ;;  %1097 = vmatprep.mubr.bf16.mxu0 %v2317_v48  ;;  %v2391_v43 = vld [vmem:[%s3197_s0 + $0xa4] ss:$36 sps:$4 sm:$0xff]  }
  0x2d   :  { %1194 = vmatprep.mubr.bf16.mxu1 %v2319_v49  ;;  %2078 = vmatpush3.bf16.msra.mxu0 %v2325_v54  ;;  %v2396_v48 = vld [vmem:[%s3197_s0 + $0xa8] ss:$36 sps:$4 sm:$0xff]   ;;  %v2403_v54 = vld [vmem:[%s3197_s0 + $0xf0] ss:$36 sps:$4 sm:$0xff]  }
  0x2e   :  { %2142 = vmatpush3.bf16.msra.mxu1 %v2326_v55  ;;  %2079 = vmatprep.subr.bf16.mxu0 %v2333_v60  ;;  %v2398_v49 = vld [vmem:[%s3197_s0 + $0xec] ss:$36 sps:$4 sm:$0xff]   ;;  %v2405_v55 = vld [vmem:[%s3197_s0 + $0x134] ss:$36 sps:$4 sm:$0xff]   ;;  %v2412_v60 = vld [vmem:[%s3197_s0 + $0x17c] ss:$36 sps:$4 sm:$0xff]  }
  0x2f   :  { %2143 = vmatprep.subr.bf16.mxu1 %v2334_v61  ;;  %v2414_v61 = vld [vmem:[%s3197_s0 + $0x184] ss:$36 sps:$4 sm:$0xff]  }
  0x31   :  { %2080 = vmatpush3.bf16.msra.mxu0 %v2335_v62  ;;  %v2416_v62 = vld [vmem:[%s3197_s0 + $0x178] ss:$36 sps:$4 sm:$0xff]  }
  0x32   :  { %2144 = vmatpush3.bf16.msra.mxu1 %v2336_v63  ;;  %2081 = vmatprep.subr.bf16.mxu0 %v2343_v3  ;;  %v2417_v63 = vld [vmem:[%s3197_s0 + $0x180] ss:$36 sps:$4 sm:$0xff]   ;;  %v2424_v3 = vld [vmem:[%s3197_s0 + $0x1c8] ss:$36 sps:$4 sm:$0xff]  }
  0x33   :  { %1098 = vmatmul.mubr.bf16.gmra.mxu0 %v2321_v50  ;;  %2145 = vmatprep.subr.bf16.mxu1 %v2344_v5  ;;  %v2400_v50 = vld [vmem:[%s3197_s0 + $0xf4] ss:$36 sps:$4 sm:$0xff]  }
  0x34   :  { %1195 = vmatmul.mubr.bf16.gmra.mxu1 %v2322_v51  ;;  %1105 = vmatprep.mubr.bf16.mxu0 %v2327_v56  ;;  %v2418_v51 = vld [vmem:[%s3196_s1 + $0x210] sm:$0xff]   ;;  %v2407_v56 = vld [vmem:[%s3197_s0 + $0x13c] ss:$36 sps:$4 sm:$0xff]  }
  0x35   :  { %1202 = vmatprep.mubr.bf16.mxu1 %v2329_v57  ;;  %2082 = vmatpush3.bf16.msra.mxu0 %v2345_v6  ;;  %v2432_v57 = vld [vmem:[%s3196_s1 + $0x200] sm:$0xff]   ;;  %v2428_v5 = vld [vmem:[%s3197_s0 + $0x214] ss:$36 sps:$4 sm:$0xff]   ;;  %v2430_v6 = vld [vmem:[%s3197_s0 + $0x208] ss:$36 sps:$4 sm:$0xff]  }
  0x36   :  { %2146 = vmatpush3.bf16.msra.mxu1 %v2346_v7  ;;  %2083 = vmatprep.subr.bf16.mxu0 %v2353_v10  ;;  %v2431_v7 = vld [vmem:[%s3197_s0 + $0x210] ss:$36 sps:$4 sm:$0xff]   ;;  %v2435_v10 = vld [vmem:[%s3197_s0 + $0x68] ss:$36 sps:$4 sm:$0xff]  }
  0x37   :  { %2147 = vmatprep.subr.bf16.mxu1 %v2354_v11  ;;  %v2436_v11 = vld [vmem:[%s3197_s0 + $0x188] ss:$36 sps:$4 sm:$0xff]  }
  0x39   :  { %2084 = vmatpush3.bf16.msra.mxu0 %v2355_v13  ;;  %v2438_v13 = vld [vmem:[%s3197_s0 + $0x1d0] ss:$36 sps:$4 sm:$0xff]  }
  0x3a   :  { %2148 = vmatpush3.bf16.msra.mxu1 %v2356_v14  ;;  %2085 = vmatprep.subr.bf16.mxu0 %v2363_v18  ;;  %v2439_v14 = vld [vmem:[%s3197_s0 + $0xf8] ss:$36 sps:$4 sm:$0xff]   ;;  %v2901_v18 = vld [vmem:[%s3198_s2] ss:$0 sm:$0xff] }
  0x3b   :  { %1106 = vmatmul.mubr.bf16.gmra.mxu0 %v2331_v58  ;;  %2149 = vmatprep.subr.bf16.mxu1 %v2364_v19  ;;  %v2409_v58 = vld [vmem:[%s3197_s0 + $0x130] ss:$36 sps:$4 sm:$0xff]  }
  0x3c   :  { %1203 = vmatmul.mubr.bf16.gmra.mxu1 %v2332_v59  ;;  %1113 = vmatprep.mubr.bf16.mxu0 %v2337_v0  ;;  %v2410_v59 = vld [vmem:[%s3197_s0 + $0x138] ss:$36 sps:$4 sm:$0xff]   ;;  %v2419_v0 = vld [vmem:[%s3197_s0 + $0x1c4] ss:$36 sps:$4 sm:$0xff]  }
  0x3d   :  { %1210 = vmatprep.mubr.bf16.mxu1 %v2339_v1  ;;  %2086 = vmatpush3.bf16.msra.mxu0 %v2365_v20  ;;  %v2421_v1 = vld [vmem:[%s3197_s0 + $0x1cc] ss:$36 sps:$4 sm:$0xff]  }
  0x3e   :  { %2150 = vmatpush3.bf16.msra.mxu1 %v2366_v21  ;;  %2087 = vmatprep.subr.bf16.mxu0 %v2373_v26 }
  0x3f   :  { %2151 = vmatprep.subr.bf16.mxu1 %v2374_v27 }
  0x41   :  { %2088 = vmatpush3.bf16.msra.mxu0 %v2375_v28 }
  0x42   :  { %2152 = vmatpush3.bf16.msra.mxu1 %v2376_v29  ;;  %2217 = vmatprep.subr.bf16.mxu0 %v2383_v32 }
  0x43   :  { %1114 = vmatmul.mubr.bf16.gmra.mxu0 %v2341_v2  ;;  %2249 = vmatprep.subr.bf16.mxu1 %v2383_v32  ;;  %v2423_v2 = vld [vmem:[%s3197_s0 + $0x1c0] ss:$36 sps:$4 sm:$0xff]  }
  0x44   :  { %1211 = vmatmul.mubr.bf16.gmra.mxu1 %v2342_v4  ;;  %1121 = vmatprep.mubr.bf16.mxu0 %v2347_v8  ;;  %v2426_v4 = vld [vmem:[%s3197_s0 + $0x20c] ss:$36 sps:$4 sm:$0xff]   ;;  %v2433_v8 = vld [vmem:[%s3197_s0 + $0x20] ss:$36 sps:$4 sm:$0xff]  }
  0x45   :  { %1218 = vmatprep.mubr.bf16.mxu1 %v2349_v9  ;;  %v2434_v9 = vld [vmem:[%s3197_s0 + $0x140] ss:$36 sps:$4 sm:$0xff]  }
  0x4b   :  { %1122 = vmatmul.mubr.bf16.gmra.mxu0 %v2351_v12  ;;  %v2437_v12 = vld [vmem:[%s3197_s0 + $0xb0] ss:$36 sps:$4 sm:$0xff]  }
  0x4c   :  { %1219 = vmatmul.mubr.bf16.gmra.mxu1 %v2352_v15  ;;  %1129 = vmatprep.mubr.bf16.mxu0 %v2357_v16  ;;  %v2440_v15 = vld [vmem:[%s3197_s0 + $0x218] ss:$36 sps:$4 sm:$0xff]  }
  0x4d   :  { %1226 = vmatprep.mubr.bf16.mxu1 %v2359_v17 }
  0x53   :  { %1130 = vmatmul.mubr.bf16.gmra.mxu0 %v2361_v22 }
  0x54   :  { %1227 = vmatmul.mubr.bf16.gmra.mxu1 %v2362_v23  ;;  %1137 = vmatprep.mubr.bf16.mxu0 %v2367_v24 }
  0x55   :  { %1234 = vmatprep.mubr.bf16.mxu1 %v2369_v25 }
  0x5b   :  { %1138 = vmatmul.mubr.bf16.gmra.mxu0 %v2371_v30 }
  0x5c   :  { %1235 = vmatmul.mubr.bf16.gmra.mxu1 %v2372_v31  ;;  %1275 = vmatprep.mubr.bf16.mxu0 %v2379_v33 }
  0x5d   :  { %1372 = vmatprep.mubr.bf16.mxu1 %v2382_v34 }
  0x63   :  { %1276 = vmatmul.mubr.bf16.vlgmr.msra.gmra.mxu0 %v2377_v35 }
  0x64   :  { %1373 = vmatmul.mubr.bf16.vlgmr.msra.gmra.mxu1 %v2380_v36  ;;  %2218 = vmatpush3.bf16.msra.mxu0 %v2383_v32 }
  0x65   :  { %2257 = vmatpush3.bf16.msra.mxu1 %v2383_v32  ;;  %1283 = vmatprep.mubr.bf16.mxu0 %v2384_v37 }
  0x66   :  { %1380 = vmatprep.mubr.bf16.mxu1 %v2386_v38  ;;  %2219 = vmatprep.subr.bf16.mxu0 %v2390_v39 }
  0x67   :  { %2250 = vmatprep.subr.bf16.mxu1 %v2390_v39 }
  0x68   :  { %2220 = vmatpush3.bf16.msra.mxu0 %v2390_v39 }
  0x69   :  { %2258 = vmatpush3.bf16.msra.mxu1 %v2390_v39  ;;  %2221 = vmatprep.subr.bf16.mxu0 %v2397_v40 }
  0x6a   :  { %2251 = vmatprep.subr.bf16.mxu1 %v2397_v40 }
  0x6b   :  { %1284 = vmatmul.mubr.bf16.gmra.mxu0 %v2388_v41 }
  0x6c   :  { %1381 = vmatmul.mubr.bf16.gmra.mxu1 %v2389_v42  ;;  %1291 = vmatprep.mubr.bf16.mxu0 %v2391_v43 }
  0x6d   :  { %1388 = vmatprep.mubr.bf16.mxu1 %v2393_v44  ;;  %2222 = vmatpush3.bf16.msra.mxu0 %v2397_v40 }
  0x6e   :  { %2259 = vmatpush3.bf16.msra.mxu1 %v2397_v40  ;;  %2223 = vmatprep.subr.bf16.mxu0 %v2404_v45 }
  0x6f   :  { %2252 = vmatprep.subr.bf16.mxu1 %v2404_v45 }
  0x71   :  { %2224 = vmatpush3.bf16.msra.mxu0 %v2404_v45 }
  0x72   :  { %2260 = vmatpush3.bf16.msra.mxu1 %v2404_v45  ;;  %2225 = vmatprep.subr.bf16.mxu0 %v2411_v46 }
  0x73   :  { %1292 = vmatmul.mubr.bf16.gmra.mxu0 %v2395_v47  ;;  %2253 = vmatprep.subr.bf16.mxu1 %v2411_v46 }
  0x74   :  { %1389 = vmatmul.mubr.bf16.gmra.mxu1 %v2396_v48  ;;  %1299 = vmatprep.mubr.bf16.mxu0 %v2398_v49 }
  0x75   :  { %1396 = vmatprep.mubr.bf16.mxu1 %v2400_v50  ;;  %2226 = vmatpush3.bf16.msra.mxu0 %v2411_v46 }
  0x76   :  { %2261 = vmatpush3.bf16.msra.mxu1 %v2411_v46  ;;  %2227 = vmatprep.subr.bf16.mxu0 %v2418_v51 }
  0x77   :  { %2254 = vmatprep.subr.bf16.mxu1 %v2418_v51 }
  0x79   :  { %2228 = vmatpush3.bf16.msra.mxu0 %v2418_v51 }
  0x7a   :  { %2262 = vmatpush3.bf16.msra.mxu1 %v2418_v51  ;;  %2229 = vmatprep.subr.bf16.mxu0 %v2425_v53 }
  0x7b   :  { %1300 = vmatmul.mubr.bf16.gmra.mxu0 %v2402_v52  ;;  %2255 = vmatprep.subr.bf16.mxu1 %v2425_v53 }
  0x7c   :  { %1397 = vmatmul.mubr.bf16.gmra.mxu1 %v2403_v54  ;;  %1307 = vmatprep.mubr.bf16.mxu0 %v2405_v55 }
  0x7d   :  { %1404 = vmatprep.mubr.bf16.mxu1 %v2407_v56  ;;  %2230 = vmatpush3.bf16.msra.mxu0 %v2425_v53 }
  0x7e   :  { %2263 = vmatpush3.bf16.msra.mxu1 %v2425_v53  ;;  %2231 = vmatprep.subr.bf16.mxu0 %v2432_v57 }
  0x7f   :  { %2256 = vmatprep.subr.bf16.mxu1 %v2432_v57 }
  0x81   :  { %2232 = vmatpush3.bf16.msra.mxu0 %v2432_v57 }
  0x82   :  { %2264 = vmatpush3.bf16.msra.mxu1 %v2432_v57 }
  0x83   :  { %1308 = vmatmul.mubr.bf16.gmra.mxu0 %v2409_v58 }
  0x84   :  { %1405 = vmatmul.mubr.bf16.gmra.mxu1 %v2410_v59  ;;  %1315 = vmatprep.mubr.bf16.mxu0 %v2412_v60 }
  0x85   :  { %1412 = vmatprep.mubr.bf16.mxu1 %v2414_v61 }
  0x8b   :  { %1316 = vmatmul.mubr.bf16.gmra.mxu0 %v2416_v62 }
  0x8c   :  { %1413 = vmatmul.mubr.bf16.gmra.mxu1 %v2417_v63  ;;  %1323 = vmatprep.mubr.bf16.mxu0 %v2419_v0 }
  0x8d   :  { %1420 = vmatprep.mubr.bf16.mxu1 %v2421_v1 }
  0x93   :  { %1324 = vmatmul.mubr.bf16.gmra.mxu0 %v2423_v2 }
  0x94   :  { %1421 = vmatmul.mubr.bf16.gmra.mxu1 %v2424_v3  ;;  %1331 = vmatprep.mubr.bf16.mxu0 %v2426_v4 }
  0x95   :  { %1428 = vmatprep.mubr.bf16.mxu1 %v2428_v5 }
  0x9b   :  { %1332 = vmatmul.mubr.bf16.gmra.mxu0 %v2430_v6 }
  0x9c   :  { %1429 = vmatmul.mubr.bf16.gmra.mxu1 %v2431_v7  ;;  %2233 = vmatprep.mubr.bf16.mxu0 %v2433_v8 }
  0x9d   :  { %2241 = vmatprep.mubr.bf16.mxu1 %v2434_v9 }
  0xa3   :  { %2234 = vmatmul.mubr.bf16.vlgmr.msra.gmra.mxu0 %v2435_v10 }
  0xa4   :  { %2242 = vmatmul.mubr.bf16.vlgmr.msra.gmra.mxu1 %v2436_v11  ;;  %2237 = vmatprep.mubr.bf16.mxu0 %v2437_v12 }
  0xa5   :  { %2245 = vmatprep.mubr.bf16.mxu1 %v2438_v13 }
  0xab   :  { %2238 = vmatmul.mubr.bf16.gmra.mxu0 %v2439_v14 }
  0xac   :  { %2246 = vmatmul.mubr.bf16.gmra.mxu1 %v2440_v15 }
  0xe3   :  { %v1961_v16 = vpop.f32.mrf.mxu0 }
  0xe4   :  { %v2025_v17 = vpop.f32.mrf.mxu1 }
  0xe5   :  { %v1962_v19 = vpop.f32.mrf.mxu0 }
  0xe6   :  { %v1963_v20 = vadd.f32 %v1962_v19, %v1961_v16  ;;  %v2026_v21 = vpop.f32.mrf.mxu1 }
  0xe7   :  { %v2027_v22 = vadd.f32 %v2026_v21, %v2025_v17  ;;  %v1964_v23 = vpop.f32.mrf.mxu0 }
  0xe8   :  { %v1084_v24 = vadd.f32 %v1963_v20, %v2901_v18  ;;  %v2028_v25 = vpop.f32.mrf.mxu1 }
  0xe9   :  { %v1965_v26 = vpop.f32.mrf.mxu0 }
  0xea   :  { %v2904_v27 = vadd.f32 %v2027_v22, %v1084_v24  ;;  %v1966_v28 = vadd.f32 %v1965_v26, %v1964_v23  ;;  %v2029_v29 = vpop.f32.mrf.mxu1 }
  0xeb   :  { %v2030_v30 = vadd.f32 %v2029_v29, %v2028_v25  ;;  %v1967_v31 = vpop.f32.mrf.mxu0 }
  0xec   :  { %v1087_v32 = vadd.f32 %v1966_v28, %v2901_v18  ;;  %v2031_v33 = vpop.f32.mrf.mxu1 }
  0xed   :  { %v1968_v34 = vpop.f32.mrf.mxu0 }
  0xee   :  { %v2907_v35 = vadd.f32 %v2030_v30, %v1087_v32  ;;  %v1969_v36 = vadd.f32 %v1968_v34, %v1967_v31  ;;  %v2032_v37 = vpop.f32.mrf.mxu1 }
  0xef   :  { %v2033_v38 = vadd.f32 %v2032_v37, %v2031_v33  ;;  %v1970_v39 = vpop.f32.mrf.mxu0 }
  0xf0   :  { %v1092_v40 = vadd.f32 %v1969_v36, %v2901_v18  ;;  %v2034_v41 = vpop.f32.mrf.mxu1 }
  0xf1   :  { %v1971_v42 = vpop.f32.mrf.mxu0 }
  0xf2   :  { %v2910_v43 = vadd.f32 %v2033_v38, %v1092_v40  ;;  %v1972_v44 = vadd.f32 %v1971_v42, %v1970_v39  ;;  %v2035_v45 = vpop.f32.mrf.mxu1 }
  0xf3   :  { %v2036_v46 = vadd.f32 %v2035_v45, %v2034_v41  ;;  %v1973_v47 = vpop.f32.mrf.mxu0 }
  0xf4   :  { %v1095_v48 = vadd.f32 %v1972_v44, %v2901_v18  ;;  %v2037_v49 = vpop.f32.mrf.mxu1 }
  0xf5   :  { %v1974_v50 = vpop.f32.mrf.mxu0 }
  0xf6   :  { %v2913_v51 = vadd.f32 %v2036_v46, %v1095_v48  ;;  %v1975_v52 = vadd.f32 %v1974_v50, %v1973_v47  ;;  %v2038_v53 = vpop.f32.mrf.mxu1 }
  0xf7   :  { %v2039_v54 = vadd.f32 %v2038_v53, %v2037_v49  ;;  %v1976_v55 = vpop.f32.mrf.mxu0 }
  0xf8   :  { %v1100_v56 = vadd.f32 %v1975_v52, %v2901_v18  ;;  %v2040_v57 = vpop.f32.mrf.mxu1 }
  0xf9   :  { %v1977_v58 = vpop.f32.mrf.mxu0 }
  0xfa   :  { %v2916_v59 = vadd.f32 %v2039_v54, %v1100_v56  ;;  %v1978_v60 = vadd.f32 %v1977_v58, %v1976_v55  ;;  %v2041_v61 = vpop.f32.mrf.mxu1 }
  0xfb   :  { %v2042_v62 = vadd.f32 %v2041_v61, %v2040_v57  ;;  %v1979_v63 = vpop.f32.mrf.mxu0 }
  0xfc   :  { %v1103_v0 = vadd.f32 %v1978_v60, %v2901_v18  ;;  %v2043_v1 = vpop.f32.mrf.mxu1 }
  0xfd   :  { %v1980_v2 = vpop.f32.mrf.mxu0 }
  0xfe   :  { %v2919_v3 = vadd.f32 %v2042_v62, %v1103_v0  ;;  %v1981_v4 = vadd.f32 %v1980_v2, %v1979_v63  ;;  %v2044_v5 = vpop.f32.mrf.mxu1 }
  0xff   :  { %v2045_v6 = vadd.f32 %v2044_v5, %v2043_v1  ;;  %v1982_v7 = vpop.f32.mrf.mxu0 }
 0x100   :  { %v1108_v8 = vadd.f32 %v1981_v4, %v2901_v18  ;;  %v2046_v9 = vpop.f32.mrf.mxu1 }
 0x101   :  { %v1983_v10 = vpop.f32.mrf.mxu0 }
 0x102   :  { %v2922_v11 = vadd.f32 %v2045_v6, %v1108_v8  ;;  %v1984_v12 = vadd.f32 %v1983_v10, %v1982_v7  ;;  %v2047_v13 = vpop.f32.mrf.mxu1 }
 0x103   :  { %v2048_v14 = vadd.f32 %v2047_v13, %v2046_v9  ;;  %v1985_v15 = vpop.f32.mrf.mxu0 }
 0x104   :  { %v1111_v16 = vadd.f32 %v1984_v12, %v2901_v18  ;;  %v2049_v17 = vpop.f32.mrf.mxu1 }
 0x105   :  { %v1986_v19 = vpop.f32.mrf.mxu0 }
 0x106   :  { %v2925_v20 = vadd.f32 %v2048_v14, %v1111_v16  ;;  %v1987_v21 = vadd.f32 %v1986_v19, %v1985_v15  ;;  %v2050_v22 = vpop.f32.mrf.mxu1 }
 0x107   :  { %v2051_v23 = vadd.f32 %v2050_v22, %v2049_v17  ;;  %v1988_v24 = vpop.f32.mrf.mxu0 }
 0x108   :  { %v1116_v25 = vadd.f32 %v1987_v21, %v2901_v18  ;;  %v2052_v26 = vpop.f32.mrf.mxu1 }
 0x109   :  { %v1989_v28 = vpop.f32.mrf.mxu0 }
 0x10a   :  { %v2928_v29 = vadd.f32 %v2051_v23, %v1116_v25  ;;  %v1990_v30 = vadd.f32 %v1989_v28, %v1988_v24  ;;  %v2053_v31 = vpop.f32.mrf.mxu1 }
 0x10b   :  { %v2054_v32 = vadd.f32 %v2053_v31, %v2052_v26  ;;  %v1991_v33 = vpop.f32.mrf.mxu0 }
 0x10c   :  { %v1119_v34 = vadd.f32 %v1990_v30, %v2901_v18  ;;  %v2055_v36 = vpop.f32.mrf.mxu1 }
 0x10d   :  { %v1992_v37 = vpop.f32.mrf.mxu0 }
 0x10e   :  { %v2931_v38 = vadd.f32 %v2054_v32, %v1119_v34  ;;  %v1993_v39 = vadd.f32 %v1992_v37, %v1991_v33  ;;  %v2056_v40 = vpop.f32.mrf.mxu1 }
 0x10f   :  { %v2057_v41 = vadd.f32 %v2056_v40, %v2055_v36  ;;  %v1994_v42 = vpop.f32.mrf.mxu0 }
 0x110   :  { %3207 = vst [vmem:[#allocation2_spill] sm:$0xff] %v2931_v38  ;;  %v1124_v44 = vadd.f32 %v1993_v39, %v2901_v18  ;;  %v2058_v45 = vpop.f32.mrf.mxu1 }
 0x111   :  { %v1995_v46 = vpop.f32.mrf.mxu0 }
 0x112   :  { %v2934_v47 = vadd.f32 %v2057_v41, %v1124_v44  ;;  %v1996_v48 = vadd.f32 %v1995_v46, %v1994_v42  ;;  %v2059_v49 = vpop.f32.mrf.mxu1 }
 0x113   :  { %v2060_v50 = vadd.f32 %v2059_v49, %v2058_v45  ;;  %v1997_v52 = vpop.f32.mrf.mxu0 }
 0x114   :  { %v1127_v53 = vadd.f32 %v1996_v48, %v2901_v18  ;;  %v2061_v54 = vpop.f32.mrf.mxu1 }
 0x115   :  { %v1998_v55 = vpop.f32.mrf.mxu0 }
 0x116   :  { %v2937_v56 = vadd.f32 %v2060_v50, %v1127_v53  ;;  %v1999_v57 = vadd.f32 %v1998_v55, %v1997_v52  ;;  %v2062_v58 = vpop.f32.mrf.mxu1 }
 0x117   :  { %v2063_v60 = vadd.f32 %v2062_v58, %v2061_v54  ;;  %v2000_v61 = vpop.f32.mrf.mxu0 }
 0x118   :  { %3208 = vst [vmem:[#allocation3_spill] sm:$0xff] %v2937_v56  ;;  %v1132_v62 = vadd.f32 %v1999_v57, %v2901_v18  ;;  %v2064_v63 = vpop.f32.mrf.mxu1 }
 0x119   :  { %v2001_v0 = vpop.f32.mrf.mxu0 }
 0x11a   :  { %v2940_v1 = vadd.f32 %v2063_v60, %v1132_v62  ;;  %v2002_v2 = vadd.f32 %v2001_v0, %v2000_v61  ;;  %v2065_v4 = vpop.f32.mrf.mxu1 }
 0x11b   :  { %v2066_v5 = vadd.f32 %v2065_v4, %v2064_v63  ;;  %v2003_v6 = vpop.f32.mrf.mxu0 }
 0x11c   :  { %3209 = vst [vmem:[#allocation4_spill] sm:$0xff] %v2940_v1  ;;  %v1135_v7 = vadd.f32 %v2002_v2, %v2901_v18  ;;  %v2067_v8 = vpop.f32.mrf.mxu1 }
 0x11d   :  { %v2004_v9 = vpop.f32.mrf.mxu0 }
 0x11e   :  { %v2943_v10 = vadd.f32 %v2066_v5, %v1135_v7  ;;  %v2005_v12 = vadd.f32 %v2004_v9, %v2003_v6  ;;  %v2068_v13 = vpop.f32.mrf.mxu1 }
 0x11f   :  { %v2069_v14 = vadd.f32 %v2068_v13, %v2067_v8  ;;  %v2006_v15 = vpop.f32.mrf.mxu0 }
 0x120   :  { %3210 = vst [vmem:[#allocation5_spill] sm:$0xff] %v2943_v10  ;;  %v1140_v16 = vadd.f32 %v2005_v12, %v2901_v18  ;;  %v2070_v17 = vpop.f32.mrf.mxu1 }
 0x121   :  { %v2007_v19 = vpop.f32.mrf.mxu0 }
 0x122   :  { %v2946_v21 = vadd.f32 %v2069_v14, %v1140_v16  ;;  %v2008_v22 = vadd.f32 %v2007_v19, %v2006_v15  ;;  %v2071_v23 = vpop.f32.mrf.mxu1 }
 0x123   :  { %v2072_v24 = vadd.f32 %v2071_v23, %v2070_v17  ;;  %v2089_v25 = vpop.f32.mrf.mxu0 }
 0x124   :  { %3211 = vst [vmem:[#allocation6_spill] sm:$0xff] %v2946_v21  ;;  %v1143_v26 = vadd.f32 %v2008_v22, %v2901_v18  ;;  %v2153_v28 = vpop.f32.mrf.mxu1 }
 0x125   :  { %v2090_v30 = vpop.f32.mrf.mxu0 }
 0x126   :  { %v2949_v31 = vadd.f32 %v2072_v24, %v1143_v26  ;;  %v2091_v32 = vadd.f32 %v2090_v30, %v2089_v25  ;;  %v2154_v33 = vpop.f32.mrf.mxu1 }
 0x127   :  { %v2092_v34 = vpop.f32.mrf.mxu0  ;;  %v2155_v37 = vadd.f32 %v2154_v33, %v2153_v28  ;;  %v3015_v33 = vld [vmem:[%s3199_s3 + $0x8] sm:$0xff]  }
 0x128   :  { %3212 = vst [vmem:[#allocation7_spill] sm:$0xff] %v2949_v31  ;;  %v1278_v36 = vadd.f32 %v2091_v32, %v2904_v27  ;;  %v2952_v39 = vpop.f32.mrf.mxu1  ;;  %3221 = vst [vmem:[#allocation16_spill] sm:$0xff] %v3015_v33  ;;  %v3032_v31 = vld [vmem:[%s3199_s3 + $0x20] sm:$0xff]  }
 0x129   :  { %v2093_v40 = vpop.f32.mrf.mxu0 }
 0x12a   :  { %v2954_v41 = vpop.f32.mrf.mxu1  ;;  %v2956_v42 = vadd.f32 %v2155_v37, %v1278_v36  ;;  %v3020_v36 = vld [vmem:[%s3199_s3 + $0x28] sm:$0xff]   ;;  %v3025_v37 = vld [vmem:[%s3199_s3] sm:$0xff]  }
 0x12b   :  { %v2095_v44 = vpop.f32.mrf.mxu0  ;;  %3222 = vst [vmem:[#allocation17_spill] sm:$0xff] %v3020_v36  ;;  %3223 = vst [vmem:[#allocation18_spill] sm:$0xff] %v3025_v37 }
 0x12c   :  { %3213 = vst [vmem:[#allocation8_spill] sm:$0xff] %v2956_v42  ;;  %v2958_v45 = vpop.f32.mrf.mxu1  ;;  %v2094_v42 = vadd.f32 %v2093_v40, %v2092_v34 }
 0x12d   :  { %v2096_v18 = vpop.f32.mrf.mxu0 }
 0x12e   :  { %v2960_v46 = vpop.f32.mrf.mxu1  ;;  %v2097_v1 = vadd.f32 %v2096_v18, %v2095_v44 }
 0x12f   :  { %v2098_v48 = vpop.f32.mrf.mxu0 }
 0x130   :  { %v2962_v49 = vpop.f32.mrf.mxu1 }
 0x131   :  { %v2099_v50 = vpop.f32.mrf.mxu0 }
 0x132   :  { %v2964_v52 = vpop.f32.mrf.mxu1 }
 0x133   :  { %v2101_v27 = vpop.f32.mrf.mxu0 }
 0x134   :  { %v2966_v53 = vpop.f32.mrf.mxu1 }
 0x135   :  { %v2102_v54 = vpop.f32.mrf.mxu0 }
 0x136   :  { %v2968_v55 = vpop.f32.mrf.mxu1  ;;  %v2103_v56 = vadd.f32 %v2102_v54, %v2101_v27 }
 0x137   :  { %v2970_v57 = vpop.f32.mrf.mxu0 }
 0x138   :  { %v2972_v58 = vpop.f32.mrf.mxu1 }
 0x139   :  { %v2974_v60 = vpop.f32.mrf.mxu0 }
 0x13a   :  { %v2976_v61 = vpop.f32.mrf.mxu1 }
 0x13b   :  { %v2107_v62 = vpop.f32.mrf.mxu0 }
 0x13c   :  { %v2978_v63 = vpop.f32.mrf.mxu1 }
 0x13d   :  { %v2108_v0 = vpop.f32.mrf.mxu0 }
 0x13e   :  { %v2980_v2 = vpop.f32.mrf.mxu1 }
 0x13f   :  { %v2982_v4 = vpop.f32.mrf.mxu0 }
 0x140   :  { %v2984_v5 = vpop.f32.mrf.mxu1 }
 0x141   :  { %3214 = vst [vmem:[#allocation9_spill] sm:$0xff] %v2984_v5  ;;  %v2986_v6 = vpop.f32.mrf.mxu0  ;;  %v3063_v5 = vld [vmem:[%s3199_s3 + $0x30] sm:$0xff]  }
 0x142   :  { %v2988_v7 = vpop.f32.mrf.mxu1  ;;  %v1886_v54 = vunpack.c.h.bf16 %v3063_v5 }
 0x143   :  { %3215 = vst [vmem:[#allocation10_spill] sm:$0xff] %v2988_v7  ;;  %v2113_v8 = vpop.f32.mrf.mxu0  ;;  %v3042_v7 = vld [vmem:[%s3199_s3 + $0x18] sm:$0xff]  }
 0x144   :  { %v2990_v9 = vpop.f32.mrf.mxu1  ;;  %v1873_v36 = vunpack.c.l.bf16 %v3042_v7  ;;  %v1874_v18 = vunpack.c.h.bf16 %v3042_v7 }
 0x145   :  { %v2114_v12 = vpop.f32.mrf.mxu0 }
 0x146   :  { %v2992_v13 = vpop.f32.mrf.mxu1  ;;  %v2115_v44 = vadd.f32 %v2114_v12, %v2113_v8 }
 0x147   :  { %3216 = vst [vmem:[#allocation11_spill] sm:$0xff] %v2992_v13  ;;  %v2994_v14 = vpop.f32.mrf.mxu0  ;;  %v1294_v13 = vadd.f32 %v2103_v56, %v2916_v59  ;;  %v2112_v59 = vadd.f32 %v2986_v6, %v2982_v4  ;;  %v3111_v6 = vadd.f32 %v2976_v61, %v2972_v58 }
 0x148   :  { %v2996_v15 = vpop.f32.mrf.mxu1 }
 0x149   :  { %3217 = vst [vmem:[#allocation12_spill] sm:$0xff] %v2996_v15  ;;  %v2998_v16 = vpop.f32.mrf.mxu0  ;;  %v2109_v15 = vadd.f32 %v2108_v0, %v2107_v62  ;;  %v1286_v62 = vadd.f32 %v2097_v1, %v2910_v43  ;;  %v2164_v43 = vadd.f32 %v2964_v52, %v2962_v49  ;;  %v1310_v49 = vadd.f32 %v2115_v44, %v2928_v29 }
 0x14a   :  { %v3000_v17 = vpop.f32.mrf.mxu1  ;;  %v2118_v56 = vadd.f32 %v2998_v16, %v2994_v14  ;;  %v3228_v14 = vld [vmem:[#allocation2_spill] sm:$0xff] }
 0x14b   :  { %3218 = vst [vmem:[#allocation13_spill] sm:$0xff] %v3000_v17  ;;  %v2119_v19 = vpop.f32.mrf.mxu0  ;;  %v1281_v17 = vadd.f32 %v2094_v42, %v2907_v35 }
 0x14c   :  { %v3002_v22 = vpop.f32.mrf.mxu1 }
 0x14d   :  { %v2120_v23 = vpop.f32.mrf.mxu0 }
 0x14e   :  { %v3004_v24 = vpop.f32.mrf.mxu1  ;;  %v2121_v35 = vadd.f32 %v2120_v23, %v2119_v19  ;;  %v3227_v29 = vld [vmem:[#allocation11_spill] sm:$0xff] }
 0x14f   :  { %v3006_v25 = vpop.f32.mrf.mxu0  ;;  %v2179_v12 = vadd.f32 %v3227_v29, %v2990_v9 }
 0x150   :  { %v3008_v26 = vpop.f32.mrf.mxu1  ;;  %v3233_v44 = vld [vmem:[#allocation12_spill] sm:$0xff] }
 0x151   :  { %3219 = vst [vmem:[#allocation14_spill] sm:$0xff] %v3008_v26  ;;  %v2123_v28 = vpop.f32.mrf.mxu0  ;;  %v1878_v26 = vunpack.c.h.bf16 %v3032_v31  ;;  %v1407_v9 = vadd.f32 %v2179_v12, %v1310_v49 }
 0x152   :  { %v3010_v30 = vpop.f32.mrf.mxu1 }
 0x153   :  { %3220 = vst [vmem:[#allocation15_spill] sm:$0xff] %v3010_v30  ;;  %v2125_v32 = vpop.f32.mrf.mxu0 }
 0x154   :  { %v3027_v10 = vpop.f32.mrf.mxu1 }
 0x155   :  { %3224 = vst [vmem:[#allocation19_spill] sm:$0xff] %v3027_v10  ;;  %v2126_v21 = vpop.f32.mrf.mxu0  ;;  %v3047_v10 = vld [vmem:[%s3199_s3 + $0x38] sm:$0xff]  }
 0x156   :  { %v3034_v30 = vpop.f32.mrf.mxu1 }
 0x157   :  { %3225 = vst [vmem:[#allocation20_spill] sm:$0xff] %v3034_v30  ;;  %v3049_v34 = vpop.f32.mrf.mxu0  ;;  %v3058_v30 = vld [vmem:[%s3199_s3 + $0x10] sm:$0xff]  }
 0x158   :  { %3226 = vst [vmem:[#allocation21_spill] sm:$0xff] %v3049_v34  ;;  %v2100_v34 = vadd.f32 %v2099_v50, %v2098_v48  ;;  %v3065_v40 = vpop.f32.mrf.mxu1  ;;  %v2158_v50 = vadd.f32 %v2954_v41, %v2952_v39  ;;  %v1870_v27 = vunpack.c.h.bf16 %v3058_v30  ;;  %v2161_v48 = vadd.f32 %v2960_v46, %v2958_v45 }
 0x159   :  { %v2129_v37 = vpop.f32.mrf.mxu0  ;;  %v2106_v39 = vadd.f32 %v2974_v60, %v2970_v57  ;;  %v1302_v41 = vadd.f32 %v2109_v15, %v2922_v11  ;;  %v2173_v45 = vadd.f32 %v2980_v2, %v2978_v63  ;;  %v1318_v11 = vadd.f32 %v2121_v35, %v2934_v47 }
 0x15a   :  { %v3071_v38 = vpop.f32.mrf.mxu1  ;;  %v1289_v0 = vadd.f32 %v2100_v34, %v2913_v51  ;;  %v3089_v23 = vadd.f32 %v2158_v50, %v1281_v17  ;;  %v2167_v51 = vadd.f32 %v2968_v55, %v2966_v53  ;;  %v2124_v46 = vadd.f32 %v2123_v28, %v3006_v25  ;;  %v3230_v25 = vld [vmem:[#allocation4_spill] sm:$0xff]  ;;  %v3231_v34 = vld [vmem:[#allocation9_spill] sm:$0xff] }
 0x15b   :  { %v2131_v42 = vpop.f32.mrf.mxu0  ;;  %v2127_v57 = vadd.f32 %v2126_v21, %v2125_v32  ;;  %v1383_v53 = vadd.f32 %v2161_v48, %v1286_v62  ;;  %v3107_v4 = vadd.f32 %v2106_v39, %v2919_v3  ;;  %v2185_v47 = vadd.f32 %v3004_v24, %v3002_v22  ;;  %v3229_v3 = vld [vmem:[#allocation3_spill] sm:$0xff]  ;;  %v3232_v22 = vld [vmem:[#allocation10_spill] sm:$0xff]  ;;  %v3234_v48 = vld [vmem:[#allocation13_spill] sm:$0xff] }
 0x15c   :  { %v2195_v33 = vpop.f32.mrf.mxu1  ;;  %v1386_v55 = vadd.f32 %v2164_v43, %v1289_v0  ;;  %v3104_v8 = vadd.f32 %v2167_v51, %v1294_v13  ;;  %v1399_v21 = vadd.f32 %v2173_v45, %v1302_v41  ;;  %v1305_v2 = vadd.f32 %v2112_v59, %v2925_v20  ;;  %v3235_v62 = vld [vmem:[#allocation14_spill] sm:$0xff]  ;;  %v3236_v0 = vld [vmem:[#allocation15_spill] sm:$0xff] }
 0x15d   :  { %v2132_v19 = vpop.f32.mrf.mxu0  ;;  %v1313_v13 = vadd.f32 %v2118_v56, %v3228_v14  ;;  %v1321_v17 = vadd.f32 %v2124_v46, %v3229_v3  ;;  %v1326_v28 = vadd.f32 %v2127_v57, %v3230_v25  ;;  %v1415_v32 = vadd.f32 %v2185_v47, %v1318_v11  ;;  %v3237_v39 = vld [vmem:[#allocation19_spill] sm:$0xff]  ;;  %v3240_v45 = vld [vmem:[#allocation6_spill] sm:$0xff]  ;;  %v3241_v46 = vld [vmem:[#allocation8_spill] sm:$0xff] }
 0x15e   :  { %v2196_v1 = vpop.f32.mrf.mxu1  ;;  %v2133_v15 = vadd.f32 %v2132_v19, %v2131_v42  ;;  %v2176_v24 = vadd.f32 %v3232_v22, %v3231_v34  ;;  %v2182_v20 = vadd.f32 %v3234_v48, %v3233_v44  ;;  %v2188_v42 = vadd.f32 %v3236_v0, %v3235_v62  ;;  %v3238_v41 = vld [vmem:[#allocation20_spill] sm:$0xff]  ;;  %v3245_v44 = vld [vmem:[#allocation5_spill] sm:$0xff] }
 0x15f   :  { %v2134_v60 = vpop.f32.mrf.mxu0  ;;  %v2191_v19 = vadd.f32 %v3238_v41, %v3237_v39  ;;  %v3239_v43 = vld [vmem:[#allocation21_spill] sm:$0xff]  ;;  %v2194_v25 = vadd.f32 %v3071_v38, %v3065_v40 }
 0x160   :  { %v2198_v52 = vpop.f32.mrf.mxu1  ;;  %v2130_v51 = vadd.f32 %v2129_v37, %v3239_v43  ;;  %v1334_v11 = vadd.f32 %v2133_v15, %v3240_v45  ;;  %v1410_v47 = vadd.f32 %v2182_v20, %v1313_v13  ;;  %v1418_v14 = vadd.f32 %v2188_v42, %v1321_v17  ;;  %v3243_v37 = vld [vmem:[#allocation16_spill] sm:$0xff]  ;;  %v3246_v13 = vld [vmem:[#allocation17_spill] sm:$0xff] }
 0x161   :  { %v2135_v63 = vpop.f32.mrf.mxu0  ;;  %v1423_v3 = vadd.f32 %v2191_v19, %v1326_v28  ;;  %v3250_v62 = vunpack.c.h.bf16 %v3243_v37 }
 0x162   :  { %v2199_v16 = vpop.f32.mrf.mxu1  ;;  %v2136_v58 = vadd.f32 %v2135_v63, %v2134_v60  ;;  %v1402_v63 = vadd.f32 %v2176_v24, %v1305_v2  ;;  %v1329_v48 = vadd.f32 %v2130_v51, %v3245_v44  ;;  %v3247_v2 = vunpack.c.l.bf16 %v3246_v13 }
 0x163   :  { %v2235_v61 = vpop.f32.mrf.mxu0 }
 0x164   :  { %v1480_v50 = vadd.f32 %v2235_v61, %v1383_v53  ;;  %v2243_v35 = vpop.f32.mrf.mxu1  ;;  %v3242_v53 = vld [vmem:[#allocation7_spill] sm:$0xff]  ;;  %v2197_v61 = vadd.f32 %v2196_v1, %v2195_v33 }
 0x165   :  { %v1512_v59 = vadd.f32 %v2243_v35, %v1415_v32  ;;  %v1471_v56 = vpop.f32.mrf.mxu0  ;;  %v1337_v29 = vadd.f32 %v2136_v58, %v3242_v53  ;;  %v3244_v32 = vunpack.c.l.bf16 %v3243_v37  ;;  %v2200_v35 = vadd.f32 %v2199_v16, %v2198_v52 }
 0x166   :  { %v1472_v57 = vadd.f32 %v1471_v56, %v3241_v46  ;;  %v1503_v60 = vpop.f32.mrf.mxu1  ;;  %v1431_v1 = vadd.f32 %v2197_v61, %v1334_v11  ;;  %v3252_v52 = vunpack.c.h.bf16 %v3246_v13  ;;  %v1426_v13 = vadd.f32 %v2194_v25, %v1329_v48 }
 0x167   :  { %v1504_v49 = vadd.f32 %v1503_v60, %v1407_v9  ;;  %v2236_v12 = vpop.f32.mrf.mxu0  ;;  %v1568_v34 = vadd.f32 %v3244_v32, %v1480_v50  ;;  %v1576_v24 = vadd.f32 %v3247_v2, %v1512_v59  ;;  %v3248_v9 = vld [vmem:[#allocation18_spill] sm:$0xff]  ;;  %v1434_v39 = vadd.f32 %v2200_v35, %v1337_v29 }
 0x168   :  { %v1483_v22 = vadd.f32 %v2236_v12, %v1386_v55  ;;  %v2244_v15 = vpop.f32.mrf.mxu1  ;;  %v3249_v17 = vunpack.c.l.bf16 %v3248_v9  ;;  %v3251_v55 = vunpack.c.l.bf16 %v3032_v31  ;;  %v3253_v43 = vunpack.c.h.bf16 %v3248_v9 }
 0x169   :  { %v1515_v58 = vadd.f32 %v2244_v15, %v1418_v14  ;;  %v1474_v20 = vpop.f32.mrf.mxu0  ;;  %v1584_v41 = vmax.f32 %v1568_v34, 0.0  ;;  %v1592_v45 = vmax.f32 %v1576_v24, 0.0  ;;  %v3256_v24 = vunpack.c.l.bf16 %v3063_v5 }
 0x16a   :  { %v1566_v28 = vadd.f32 %v3249_v17, %v1472_v57  ;;  %v1569_v38 = vadd.f32 %v3250_v62, %v1483_v22  ;;  %v1475_v33 = vadd.f32 %v1474_v20, %v3089_v23  ;;  %v1506_v40 = vpop.f32.mrf.mxu1  ;;  %v1574_v50 = vadd.f32 %v3251_v55, %v1504_v49 }
 0x16b   :  { %v1577_v16 = vadd.f32 %v3252_v52, %v1515_v58  ;;  %v1507_v0 = vadd.f32 %v1506_v40, %v1410_v47  ;;  %v2239_v42 = vpop.f32.mrf.mxu0  ;;  %v1394_v22 = vadd.f32 %v3111_v6, %v3107_v4  ;;  %v3257_v25 = vunpack.c.h.bf16 %v3047_v10 }
 0x16c   :  { %v1585_v19 = vmax.f32 %v1569_v38, 0.0  ;;  %v1567_v51 = vadd.f32 %v3253_v43, %v1475_v33  ;;  %v1496_v59 = vadd.f32 %v2239_v42, %v1399_v21  ;;  %v2247_v56 = vpop.f32.mrf.mxu1  ;;  %v1582_v60 = vmax.f32 %v1566_v28, 0.0 }
 0x16d   :  { %v1593_v23 = vmax.f32 %v1577_v16, 0.0  ;;  %v1575_v11 = vadd.f32 %v1878_v26, %v1507_v0  ;;  %v1528_v46 = vadd.f32 %v2247_v56, %v1431_v1  ;;  %v1487_v57 = vpop.f32.mrf.mxu0  ;;  %v1590_v12 = vmax.f32 %v1574_v50, 0.0 }
 0x16e   :  { %v1899_v53 = vpack.c.bf16 %v1585_v19, %v1584_v41  ;;  %v1583_v49 = vmax.f32 %v1567_v51, 0.0  ;;  %v1488_v47 = vadd.f32 %v1487_v57, %v3104_v8  ;;  %v1519_v29 = vpop.f32.mrf.mxu1  ;;  %v1572_v31 = vadd.f32 %v1873_v36, %v1496_v59 }
 0x16f   :  { %v1919_v14 = vpack.c.bf16 %v1593_v23, %v1592_v45  ;;  %v1591_v61 = vmax.f32 %v1575_v11, 0.0  ;;  %v1520_v37 = vadd.f32 %v1519_v29, %v1423_v3  ;;  %v2240_v32 = vpop.f32.mrf.mxu0  ;;  %v3254_v3 = vunpack.c.l.bf16 %v3047_v10 }
 0x170   :  { %1938 = vst [vmem:[%s3200_s4 + $0x8] sm:$0xff] %v1899_v53   ;;  %v1894_v21 = vpack.c.bf16 %v1583_v49, %v1582_v60  ;;  %v1499_v26 = vadd.f32 %v2240_v32, %v1402_v63  ;;  %v2248_v34 = vpop.f32.mrf.mxu1  ;;  %v3255_v36 = vunpack.c.l.bf16 %v3058_v30  ;;  %v1588_v9 = vmax.f32 %v1572_v31, 0.0 }
 0x171   :  { %1942 = vst [vmem:[%s3200_s4 + $0x28] sm:$0xff] %v1919_v14   ;;  %v1914_v8 = vpack.c.bf16 %v1591_v61, %v1590_v12  ;;  %v1580_v15 = vadd.f32 %v3254_v3, %v1528_v46  ;;  %v1531_v44 = vadd.f32 %v2248_v34, %v1434_v39  ;;  %v1490_v35 = vpop.f32.mrf.mxu0  ;;  %v1578_v58 = vadd.f32 %v3256_v24, %v1520_v37 }
 0x172   :  { %1895 = vst [vmem:[%s3200_s4] sm:$0xff] %v1894_v21   ;;  %v1570_v63 = vadd.f32 %v3255_v36, %v1488_v47  ;;  %v1573_v4 = vadd.f32 %v1874_v18, %v1499_v26  ;;  %v1491_v6 = vadd.f32 %v1490_v35, %v1394_v22  ;;  %v1522_v2 = vpop.f32.mrf.mxu1 }
 0x173   :  { %1941 = vst [vmem:[%s3200_s4 + $0x20] sm:$0xff] %v1914_v8   ;;  %v1581_v48 = vadd.f32 %v3257_v25, %v1531_v44  ;;  %v1523_v20 = vadd.f32 %v1522_v2, %v1426_v13  ;;  %v1596_v7 = vmax.f32 %v1580_v15, 0.0  ;;  %v1594_v1 = vmax.f32 %v1578_v58, 0.0 }
 0x174   :  { %v1589_v17 = vmax.f32 %v1573_v4, 0.0  ;;  %v1571_v28 = vadd.f32 %v1870_v27, %v1491_v6  ;;  %v1586_v38 = vmax.f32 %v1570_v63, 0.0 }
 0x175   :  { %v1597_v18 = vmax.f32 %v1581_v48, 0.0  ;;  %v1579_v62 = vadd.f32 %v1886_v54, %v1523_v20 }
 0x176   :  { %v1909_v33 = vpack.c.bf16 %v1589_v17, %v1588_v9  ;;  %v1587_v40 = vmax.f32 %v1571_v28, 0.0 }
 0x177   :  { %v1929_v55 = vpack.c.bf16 %v1597_v18, %v1596_v7  ;;  %v1595_v50 = vmax.f32 %v1579_v62, 0.0 }
 0x178   :  { %1940 = vst [vmem:[%s3200_s4 + $0x18] sm:$0xff] %v1909_v33   ;;  %v1904_v10 = vpack.c.bf16 %v1587_v40, %v1586_v38 }
 0x179   :  { %1944 = vst [vmem:[%s3200_s4 + $0x38] sm:$0xff] %v1929_v55   ;;  %v1924_v30 = vpack.c.bf16 %v1595_v50, %v1594_v1 }
 0x17a   :  { %1939 = vst [vmem:[%s3200_s4 + $0x10] sm:$0xff] %v1904_v10  }
 0x17b   :  { %1943 = vst [vmem:[%s3200_s4 + $0x30] sm:$0xff] %v1924_v30  }

// kernel: byobnet_forward.12
= control target key start
LH: loop header
LB: loop body
LE: loop exit
PB: predicated region body
PF: predicated region fallthrough
CT: control target
= control target key end

     0   :  { %s304_s1 = inlined_call_operand.vmem [shape: bf16[128,128], index: 1, kind: input, shape index: {}]   ;;  %s305_s0 = inlined_call_operand.vmem [shape: bf16[32,128], index: 0, kind: input, shape index: {}]   ;;  %s306_s2 = inlined_call_operand.vmem [shape: f32[1,128], index: 2, kind: input, shape index: {}]   ;;  %s307_s3 = inlined_call_operand.vmem [shape: bf16[32,128], index: 3, kind: output, shape index: {}]  }
   0x1   :  { %v235_v0 = vld [vmem:[%s304_s1 + $0x38] sm:$0xff]   ;;  %v236_v1 = vld [vmem:[%s304_s1 + $0x30] sm:$0xff]   ;;  %v237_v2 = vld [vmem:[%s304_s1 + $0x28] sm:$0xff]  }
   0x2   :  { %215 = vmatprep.subr.bf16.mxu0 %v235_v0  ;;  %v238_v3 = vld [vmem:[%s304_s1 + $0x20] sm:$0xff]   ;;  %v239_v5 = vld [vmem:[%s304_s1 + $0x18] sm:$0xff]   ;;  %v240_v6 = vld [vmem:[%s304_s1 + $0x10] sm:$0xff]  }
   0x3   :  { %216 = vmatpush3.bf16.msra.mxu0 %v235_v0  ;;  %v243_v4 = vld [vmem:[%s305_s0] sm:$0xff]   ;;  %v241_v7 = vld [vmem:[%s304_s1 + $0x8] sm:$0xff]  }
   0x4   :  { %217 = vmatprep.subr.bf16.mxu0 %v236_v1  ;;  %231 = vmatprep.mubr.bf16.mxu0 %v243_v4  ;;  %v242_v8 = vld [vmem:[%s304_s1] sm:$0xff]   ;;  %v244_v9 = vld [vmem:[%s305_s0 + $0x8] sm:$0xff]  }
   0x5   :  { %v175_v11 = vld [vmem:[%s306_s2] ss:$0 sm:$0xff] }
   0x7   :  { %218 = vmatpush3.bf16.msra.mxu0 %v236_v1 }
   0x8   :  { %219 = vmatprep.subr.bf16.mxu0 %v237_v2 }
   0xb   :  { %220 = vmatpush3.bf16.msra.mxu0 %v237_v2 }
   0xc   :  { %221 = vmatprep.subr.bf16.mxu0 %v238_v3 }
   0xf   :  { %222 = vmatpush3.bf16.msra.mxu0 %v238_v3 }
  0x10   :  { %223 = vmatprep.subr.bf16.mxu0 %v239_v5 }
  0x13   :  { %224 = vmatpush3.bf16.msra.mxu0 %v239_v5 }
  0x14   :  { %225 = vmatprep.subr.bf16.mxu0 %v240_v6 }
  0x17   :  { %226 = vmatpush3.bf16.msra.mxu0 %v240_v6 }
  0x18   :  { %227 = vmatprep.subr.bf16.mxu0 %v241_v7 }
  0x1b   :  { %228 = vmatpush3.bf16.msra.mxu0 %v241_v7 }
  0x1c   :  { %229 = vmatprep.subr.bf16.mxu0 %v242_v8 }
  0x1f   :  { %230 = vmatpush3.bf16.msra.mxu0 %v242_v8 }
  0x22   :  { %232 = vmatmul.mubr.bf16.vlgmr.msra.gmra.mxu0 %v244_v9 }
  0xe2   :  { %v233_v10 = vpop.f32.mrf.mxu0 }
  0xe3   :  { %v145_v14 = vadd.f32 %v233_v10, %v175_v11 }
  0xe4   :  { %v136_v12 = vpop.f32.mrf.mxu0 }
  0xe5   :  { %v137_v17 = vadd.f32 %v175_v11, %v136_v12 }
  0xe6   :  { %v234_v13 = vpop.f32.mrf.mxu0 }
  0xe7   :  { %v148_v15 = vadd.f32 %v234_v13, %v175_v11 }
  0xe8   :  { %v139_v16 = vpop.f32.mrf.mxu0 }
  0xe9   :  { %v202_v18 = vpack.c.bf16 %v148_v15, %v145_v14  ;;  %v140_v19 = vadd.f32 %v175_v11, %v139_v16 }
  0xeb   :  { %204 = vst [vmem:[%s307_s3 + $0x8] sm:$0xff] %v202_v18   ;;  %v197_v20 = vpack.c.bf16 %v140_v19, %v137_v17 }
  0xed   :  { %198 = vst [vmem:[%s307_s3] sm:$0xff] %v197_v20  }

// kernel: byobnet_forward.15
= control target key start
LH: loop header
LB: loop body
LE: loop exit
PB: predicated region body
PF: predicated region fallthrough
CT: control target
= control target key end

     0   :  { %s343_s1 = inlined_call_operand.vmem [shape: bf16[128,128], index: 1, kind: input, shape index: {}]   ;;  %s344_s0 = inlined_call_operand.vmem [shape: bf16[32,128], index: 0, kind: input, shape index: {}]   ;;  %s345_s2 = inlined_call_operand.vmem [shape: f32[1,128], index: 2, kind: input, shape index: {}]   ;;  %s346_s3 = inlined_call_operand.vmem [shape: bf16[32,128], index: 3, kind: input, shape index: {}]   ;;  %s347_s4 = inlined_call_operand.vmem [shape: bf16[32,128], index: 4, kind: output, shape index: {}]  }
   0x1   :  { %v263_v0 = vld [vmem:[%s343_s1 + $0x38] sm:$0xff]   ;;  %v264_v1 = vld [vmem:[%s343_s1 + $0x30] sm:$0xff]   ;;  %v265_v2 = vld [vmem:[%s343_s1 + $0x28] sm:$0xff]  }
   0x2   :  { %243 = vmatprep.subr.bf16.mxu0 %v263_v0  ;;  %v266_v3 = vld [vmem:[%s343_s1 + $0x20] sm:$0xff]   ;;  %v267_v5 = vld [vmem:[%s343_s1 + $0x18] sm:$0xff]   ;;  %v268_v6 = vld [vmem:[%s343_s1 + $0x10] sm:$0xff]  }
   0x3   :  { %244 = vmatpush3.bf16.msra.mxu0 %v263_v0  ;;  %v271_v4 = vld [vmem:[%s344_s0] sm:$0xff]   ;;  %v269_v7 = vld [vmem:[%s343_s1 + $0x8] sm:$0xff]  }
   0x4   :  { %245 = vmatprep.subr.bf16.mxu0 %v264_v1  ;;  %259 = vmatprep.mubr.bf16.mxu0 %v271_v4  ;;  %v270_v8 = vld [vmem:[%s343_s1] sm:$0xff]   ;;  %v272_v9 = vld [vmem:[%s344_s0 + $0x8] sm:$0xff]  }
   0x5   :  { %v194_v10 = vld [vmem:[%s345_s2] ss:$0 sm:$0xff]  ;;  %v231_v11 = vld [vmem:[%s346_s3 + $0x8] sm:$0xff]  }
   0x6   :  { %v214_v13 = vld [vmem:[%s346_s3] sm:$0xff]   ;;  %v219_v15 = vunpack.c.l.bf16 %v231_v11  ;;  %v220_v19 = vunpack.c.h.bf16 %v231_v11 }
   0x7   :  { %246 = vmatpush3.bf16.msra.mxu0 %v264_v1  ;;  %v215_v18 = vunpack.c.l.bf16 %v214_v13  ;;  %v216_v23 = vunpack.c.h.bf16 %v214_v13 }
   0x8   :  { %247 = vmatprep.subr.bf16.mxu0 %v265_v2 }
   0xb   :  { %248 = vmatpush3.bf16.msra.mxu0 %v265_v2 }
   0xc   :  { %249 = vmatprep.subr.bf16.mxu0 %v266_v3 }
   0xf   :  { %250 = vmatpush3.bf16.msra.mxu0 %v266_v3 }
  0x10   :  { %251 = vmatprep.subr.bf16.mxu0 %v267_v5 }
  0x13   :  { %252 = vmatpush3.bf16.msra.mxu0 %v267_v5 }
  0x14   :  { %253 = vmatprep.subr.bf16.mxu0 %v268_v6 }
  0x17   :  { %254 = vmatpush3.bf16.msra.mxu0 %v268_v6 }
  0x18   :  { %255 = vmatprep.subr.bf16.mxu0 %v269_v7 }
  0x1b   :  { %256 = vmatpush3.bf16.msra.mxu0 %v269_v7 }
  0x1c   :  { %257 = vmatprep.subr.bf16.mxu0 %v270_v8 }
  0x1f   :  { %258 = vmatpush3.bf16.msra.mxu0 %v270_v8 }
  0x22   :  { %260 = vmatmul.mubr.bf16.vlgmr.msra.gmra.mxu0 %v272_v9 }
  0xe2   :  { %v261_v12 = vpop.f32.mrf.mxu0 }
  0xe3   :  { %v148_v14 = vadd.f32 %v261_v12, %v194_v10 }
  0xe4   :  { %v139_v16 = vpop.f32.mrf.mxu0 }
  0xe5   :  { %v140_v17 = vadd.f32 %v194_v10, %v139_v16  ;;  %v164_v21 = vadd.f32 %v219_v15, %v148_v14 }
  0xe6   :  { %v262_v20 = vpop.f32.mrf.mxu0 }
  0xe7   :  { %v151_v22 = vadd.f32 %v262_v20, %v194_v10  ;;  %v162_v25 = vadd.f32 %v215_v18, %v140_v17  ;;  %v168_v28 = vmax.f32 %v164_v21, 0.0 }
  0xe8   :  { %v142_v24 = vpop.f32.mrf.mxu0 }
  0xe9   :  { %v165_v26 = vadd.f32 %v220_v19, %v151_v22  ;;  %v143_v27 = vadd.f32 %v194_v10, %v142_v24  ;;  %v166_v31 = vmax.f32 %v162_v25, 0.0 }
  0xeb   :  { %v169_v29 = vmax.f32 %v165_v26, 0.0  ;;  %v163_v30 = vadd.f32 %v216_v23, %v143_v27 }
  0xed   :  { %v229_v32 = vpack.c.bf16 %v169_v29, %v168_v28  ;;  %v167_v33 = vmax.f32 %v163_v30, 0.0 }
  0xef   :  { %232 = vst [vmem:[%s347_s4 + $0x8] sm:$0xff] %v229_v32   ;;  %v224_v34 = vpack.c.bf16 %v167_v33, %v166_v31 }
  0xf1   :  { %225 = vst [vmem:[%s347_s4] sm:$0xff] %v224_v34  }

// kernel: byobnet_forward.14
= control target key start
LH: loop header
LB: loop body
LE: loop exit
PB: predicated region body
PF: predicated region fallthrough
CT: control target
= control target key end

     0   :  { %s1632_s1 = inlined_call_operand.vmem [shape: bf16[1152,128], index: 1, kind: input, shape index: {}]   ;;  %s1633_s0 = inlined_call_operand.vmem [shape: bf16[32,1152], index: 0, kind: input, shape index: {}]   ;;  %s1634_s2 = inlined_call_operand.vmem [shape: f32[1,128], index: 2, kind: input, shape index: {}]   ;;  %s1635_s3 = inlined_call_operand.vmem [shape: bf16[32,128], index: 3, kind: output, shape index: {}]  }
   0x1   :  { %v1235_v0 = vld [vmem:[%s1632_s1 + $0x78] sm:$0xff]   ;;  %v1239_v4 = vld [vmem:[%s1632_s1 + $0x70] sm:$0xff]   ;;  %v1243_v8 = vld [vmem:[%s1632_s1 + $0x68] sm:$0xff]  }
   0x2   :  { %v1236_v1 = vld [vmem:[%s1632_s1 + $0x38] sm:$0xff]   ;;  %1093 = vmatprep.subr.bf16.mxu0 %v1235_v0  ;;  %v1240_v5 = vld [vmem:[%s1632_s1 + $0x30] sm:$0xff]   ;;  %v1244_v9 = vld [vmem:[%s1632_s1 + $0x28] sm:$0xff]  }
   0x3   :  { %v1237_v2 = vld [vmem:[%s1632_s1 + $0xf8] sm:$0xff]   ;;  %1094 = vmatpush3.bf16.msra.mxu0 %v1236_v1  ;;  %v1241_v6 = vld [vmem:[%s1632_s1 + $0xf0] sm:$0xff]   ;;  %v1245_v10 = vld [vmem:[%s1632_s1 + $0xe8] sm:$0xff]  }
   0x4   :  { %v1238_v3 = vld [vmem:[%s1632_s1 + $0xb8] sm:$0xff]   ;;  %1121 = vmatprep.subr.bf16.mxu1 %v1237_v2  ;;  %1095 = vmatprep.subr.bf16.mxu0 %v1239_v4  ;;  %v1242_v7 = vld [vmem:[%s1632_s1 + $0xb0] sm:$0xff]   ;;  %v1246_v11 = vld [vmem:[%s1632_s1 + $0xa8] sm:$0xff]  }
   0x5   :  { %1122 = vmatpush3.bf16.msra.mxu1 %v1238_v3  ;;  %v1247_v12 = vld [vmem:[%s1632_s1 + $0x60] sm:$0xff]   ;;  %v1251_v16 = vld [vmem:[%s1632_s1 + $0x58] sm:$0xff]   ;;  %v1255_v20 = vld [vmem:[%s1632_s1 + $0x50] sm:$0xff]  }
   0x6   :  { %1123 = vmatprep.subr.bf16.mxu1 %v1241_v6  ;;  %v1248_v13 = vld [vmem:[%s1632_s1 + $0x20] sm:$0xff]   ;;  %v1252_v17 = vld [vmem:[%s1632_s1 + $0x18] sm:$0xff]   ;;  %v1256_v21 = vld [vmem:[%s1632_s1 + $0x10] sm:$0xff]  }
   0x7   :  { %1096 = vmatpush3.bf16.msra.mxu0 %v1240_v5  ;;  %v1249_v14 = vld [vmem:[%s1632_s1 + $0xe0] sm:$0xff]   ;;  %v1253_v18 = vld [vmem:[%s1632_s1 + $0xd8] sm:$0xff]   ;;  %v1257_v22 = vld [vmem:[%s1632_s1 + $0xd0] sm:$0xff]  }
   0x8   :  { %1097 = vmatprep.subr.bf16.mxu0 %v1243_v8  ;;  %v1250_v15 = vld [vmem:[%s1632_s1 + $0xa0] sm:$0xff]   ;;  %v1254_v19 = vld [vmem:[%s1632_s1 + $0x98] sm:$0xff]   ;;  %v1258_v23 = vld [vmem:[%s1632_s1 + $0x90] sm:$0xff]  }
   0x9   :  { %1124 = vmatpush3.bf16.msra.mxu1 %v1242_v7  ;;  %v1259_v24 = vld [vmem:[%s1632_s1 + $0x48] sm:$0xff]   ;;  %v1263_v28 = vld [vmem:[%s1632_s1 + $0x40] sm:$0xff]   ;;  %v1270_v34 = vld [vmem:[%s1632_s1 + $0x178] sm:$0xff]  }
   0xa   :  { %1125 = vmatprep.subr.bf16.mxu1 %v1245_v10  ;;  %v1260_v25 = vld [vmem:[%s1632_s1 + $0x8] sm:$0xff]   ;;  %v1264_v29 = vld [vmem:[%s1632_s1] sm:$0xff]   ;;  %v1274_v37 = vld [vmem:[%s1632_s1 + $0x138] sm:$0xff]  }
   0xb   :  { %1098 = vmatpush3.bf16.msra.mxu0 %v1244_v9  ;;  %v1261_v26 = vld [vmem:[%s1632_s1 + $0xc8] sm:$0xff]   ;;  %v1265_v30 = vld [vmem:[%s1632_s1 + $0xc0] sm:$0xff]   ;;  %v1275_v38 = vld [vmem:[%s1632_s1 + $0x1f8] sm:$0xff]  }
   0xc   :  { %1099 = vmatprep.subr.bf16.mxu0 %v1247_v12  ;;  %v1262_v27 = vld [vmem:[%s1632_s1 + $0x88] sm:$0xff]   ;;  %v1266_v31 = vld [vmem:[%s1633_s0] ss:$36 sps:$4 sm:$0xff]   ;;  %v1276_v39 = vld [vmem:[%s1632_s1 + $0x1b8] sm:$0xff]  }
   0xd   :  { %1126 = vmatpush3.bf16.msra.mxu1 %v1246_v11  ;;  %v1268_v32 = vld [vmem:[%s1633_s0 + $0x4] ss:$36 sps:$4 sm:$0xff]   ;;  %v1273_v36 = vld [vmem:[%s1633_s0 + $0xc] ss:$36 sps:$4 sm:$0xff]   ;;  %v1289_v52 = vld [vmem:[%s1632_s1 + $0x158] sm:$0xff]  }
   0xe   :  { %1127 = vmatprep.subr.bf16.mxu1 %v1249_v14  ;;  %v1269_v33 = vld [vmem:[%s1632_s1 + $0x80] sm:$0xff]   ;;  %742 = vmatprep.mubr.bf16.mxu0 %v1268_v32  ;;  %v1271_v35 = vld [vmem:[%s1633_s0 + $0x8] ss:$36 sps:$4 sm:$0xff]   ;;  %v1277_v40 = vld [vmem:[%s1632_s1 + $0x170] sm:$0xff]  }
   0xf   :  { %1100 = vmatpush3.bf16.msra.mxu0 %v1248_v13  ;;  %791 = vmatprep.mubr.bf16.mxu1 %v1273_v36  ;;  %v1278_v41 = vld [vmem:[%s1632_s1 + $0x130] sm:$0xff]   ;;  %v1281_v44 = vld [vmem:[%s1632_s1 + $0x168] sm:$0xff]   ;;  %v1285_v48 = vld [vmem:[%s1632_s1 + $0x160] sm:$0xff]  }
  0x10   :  { %1101 = vmatprep.subr.bf16.mxu0 %v1251_v16  ;;  %v1279_v42 = vld [vmem:[%s1632_s1 + $0x1f0] sm:$0xff]   ;;  %v1282_v45 = vld [vmem:[%s1632_s1 + $0x128] sm:$0xff]   ;;  %v1286_v49 = vld [vmem:[%s1632_s1 + $0x120] sm:$0xff]  }
  0x11   :  { %1128 = vmatpush3.bf16.msra.mxu1 %v1250_v15  ;;  %v1280_v43 = vld [vmem:[%s1632_s1 + $0x1b0] sm:$0xff]   ;;  %v1283_v46 = vld [vmem:[%s1632_s1 + $0x1e8] sm:$0xff]   ;;  %v1287_v50 = vld [vmem:[%s1632_s1 + $0x1e0] sm:$0xff]  }
  0x12   :  { %1129 = vmatprep.subr.bf16.mxu1 %v1253_v18  ;;  %v1284_v47 = vld [vmem:[%s1632_s1 + $0x1a8] sm:$0xff]   ;;  %v1288_v51 = vld [vmem:[%s1632_s1 + $0x1a0] sm:$0xff]   ;;  %v1290_v53 = vld [vmem:[%s1632_s1 + $0x118] sm:$0xff]  }
  0x13   :  { %1102 = vmatpush3.bf16.msra.mxu0 %v1252_v17  ;;  %v1291_v54 = vld [vmem:[%s1633_s0 + $0x4c] ss:$36 sps:$4 sm:$0xff]   ;;  %v1293_v55 = vld [vmem:[%s1632_s1 + $0x1d8] sm:$0xff]   ;;  %v1307_v4 = vld [vmem:[%s1632_s1 + $0x140] sm:$0xff]  }
  0x14   :  { %1103 = vmatprep.subr.bf16.mxu0 %v1255_v20  ;;  %v1294_v56 = vld [vmem:[%s1633_s0 + $0x48] ss:$36 sps:$4 sm:$0xff]   ;;  %v1295_v57 = vld [vmem:[%s1632_s1 + $0x198] sm:$0xff]   ;;  %v1298_v59 = vld [vmem:[%s1632_s1 + $0x150] sm:$0xff]  }
  0x15   :  { %1130 = vmatpush3.bf16.msra.mxu1 %v1254_v19  ;;  %v1296_v58 = vld [vmem:[%s1633_s0 + $0x54] ss:$36 sps:$4 sm:$0xff]   ;;  %v1303_v0 = vld [vmem:[%s1632_s1 + $0x148] sm:$0xff]   ;;  %v1308_v5 = vld [vmem:[%s1632_s1 + $0x100] sm:$0xff]  }
  0x16   :  { %1131 = vmatprep.subr.bf16.mxu1 %v1257_v22  ;;  %v1299_v60 = vld [vmem:[%s1633_s0 + $0x50] ss:$36 sps:$4 sm:$0xff]   ;;  %v1304_v1 = vld [vmem:[%s1632_s1 + $0x108] sm:$0xff]   ;;  %v1309_v6 = vld [vmem:[%s1632_s1 + $0x1c0] sm:$0xff]  }
  0x17   :  { %1104 = vmatpush3.bf16.msra.mxu0 %v1256_v21  ;;  %v1300_v61 = vld [vmem:[%s1632_s1 + $0x110] sm:$0xff]   ;;  %v1305_v2 = vld [vmem:[%s1632_s1 + $0x1c8] sm:$0xff]   ;;  %v1313_v9 = vld [vmem:[%s1632_s1 + $0x180] sm:$0xff]  }
  0x18   :  { %1105 = vmatprep.subr.bf16.mxu0 %v1259_v24  ;;  %v1301_v62 = vld [vmem:[%s1632_s1 + $0x1d0] sm:$0xff]   ;;  %v1306_v3 = vld [vmem:[%s1632_s1 + $0x188] sm:$0xff]   ;;  %v1314_v10 = vld [vmem:[%s1632_s1 + $0x238] sm:$0xff]  }
  0x19   :  { %1132 = vmatpush3.bf16.msra.mxu1 %v1258_v23  ;;  %v1302_v63 = vld [vmem:[%s1632_s1 + $0x190] sm:$0xff]   ;;  %v1315_v11 = vld [vmem:[%s1633_s0 + $0x18] ss:$36 sps:$4 sm:$0xff]   ;;  %v1322_v16 = vld [vmem:[%s1632_s1 + $0x228] sm:$0xff]  }
  0x1a   :  { %1133 = vmatprep.subr.bf16.mxu1 %v1261_v26  ;;  %v1310_v7 = vld [vmem:[%s1633_s0 + $0x10] ss:$36 sps:$4 sm:$0xff]   ;;  %v1317_v12 = vld [vmem:[%s1633_s0 + $0x1c] ss:$36 sps:$4 sm:$0xff]   ;;  %v1323_v17 = vld [vmem:[%s1633_s0 + $0x64] ss:$36 sps:$4 sm:$0xff]  }
  0x1b   :  { %1106 = vmatpush3.bf16.msra.mxu0 %v1260_v25  ;;  %v1312_v8 = vld [vmem:[%s1633_s0 + $0x14] ss:$36 sps:$4 sm:$0xff]   ;;  %v1319_v14 = vld [vmem:[%s1633_s0 + $0x5c] ss:$36 sps:$4 sm:$0xff]   ;;  %v1329_v23 = vld [vmem:[%s1632_s1 + $0x208] sm:$0xff]  }
  0x1c   :  { %1107 = vmatprep.subr.bf16.mxu0 %v1263_v28  ;;  %v1318_v13 = vld [vmem:[%s1632_s1 + $0x230] sm:$0xff]   ;;  %v1321_v15 = vld [vmem:[%s1633_s0 + $0x58] ss:$36 sps:$4 sm:$0xff]   ;;  %v1325_v18 = vld [vmem:[%s1633_s0 + $0x60] ss:$36 sps:$4 sm:$0xff]  }
  0x1d   :  { %1134 = vmatpush3.bf16.msra.mxu1 %v1262_v27  ;;  %v1326_v19 = vld [vmem:[%s1632_s1 + $0x220] sm:$0xff]   ;;  %v1327_v20 = vld [vmem:[%s1632_s1 + $0x218] sm:$0xff]   ;;  %v1328_v22 = vld [vmem:[%s1632_s1 + $0x210] sm:$0xff]  }
  0x1e   :  { %1135 = vmatprep.subr.bf16.mxu1 %v1265_v30  ;;  %v1331_v21 = vld [vmem:[%s1633_s0 + $0x20] ss:$36 sps:$4 sm:$0xff]   ;;  %v1332_v25 = vld [vmem:[%s1633_s0 + $0x68] ss:$36 sps:$4 sm:$0xff]  }
  0x1f   :  { %1108 = vmatpush3.bf16.msra.mxu0 %v1264_v29  ;;  %v1330_v24 = vld [vmem:[%s1632_s1 + $0x200] sm:$0xff]  }
  0x20   :  { %1149 = vmatprep.subr.bf16.mxu0 %v1270_v34 }
  0x21   :  { %1136 = vmatpush3.bf16.msra.mxu1 %v1269_v33 }
  0x22   :  { %743 = vmatmul.mubr.bf16.vlgmr.msra.gmra.mxu0 %v1266_v31  ;;  %1177 = vmatprep.subr.bf16.mxu1 %v1275_v38 }
  0x23   :  { %1150 = vmatpush3.bf16.msra.mxu0 %v1274_v37  ;;  %750 = vmatprep.mubr.bf16.mxu0 %v1291_v54 }
  0x24   :  { %792 = vmatmul.mubr.bf16.vlgmr.msra.gmra.mxu1 %v1271_v35  ;;  %1151 = vmatprep.subr.bf16.mxu0 %v1277_v40 }
  0x25   :  { %1178 = vmatpush3.bf16.msra.mxu1 %v1276_v39  ;;  %799 = vmatprep.mubr.bf16.mxu1 %v1296_v58 }
  0x26   :  { %1179 = vmatprep.subr.bf16.mxu1 %v1279_v42 }
  0x27   :  { %1152 = vmatpush3.bf16.msra.mxu0 %v1278_v41 }
  0x28   :  { %1153 = vmatprep.subr.bf16.mxu0 %v1281_v44 }
  0x29   :  { %1180 = vmatpush3.bf16.msra.mxu1 %v1280_v43 }
  0x2a   :  { %1181 = vmatprep.subr.bf16.mxu1 %v1283_v46  ;;  %751 = vmatmul.mubr.bf16.gmra.mxu0 %v1294_v56 }
  0x2b   :  { %1154 = vmatpush3.bf16.msra.mxu0 %v1282_v45  ;;  %840 = vmatprep.mubr.bf16.mxu0 %v1312_v8 }
  0x2c   :  { %1155 = vmatprep.subr.bf16.mxu0 %v1285_v48  ;;  %800 = vmatmul.mubr.bf16.gmra.mxu1 %v1299_v60 }
  0x2d   :  { %1182 = vmatpush3.bf16.msra.mxu1 %v1284_v47  ;;  %889 = vmatprep.mubr.bf16.mxu1 %v1317_v12 }
  0x2e   :  { %1183 = vmatprep.subr.bf16.mxu1 %v1287_v50 }
  0x2f   :  { %1156 = vmatpush3.bf16.msra.mxu0 %v1286_v49 }
  0x30   :  { %1157 = vmatprep.subr.bf16.mxu0 %v1289_v52 }
  0x31   :  { %1184 = vmatpush3.bf16.msra.mxu1 %v1288_v51 }
  0x32   :  { %1185 = vmatprep.subr.bf16.mxu1 %v1293_v55 }
  0x33   :  { %1158 = vmatpush3.bf16.msra.mxu0 %v1290_v53 }
  0x34   :  { %1159 = vmatprep.subr.bf16.mxu0 %v1298_v59 }
  0x35   :  { %1186 = vmatpush3.bf16.msra.mxu1 %v1295_v57  ;;  %v983_v57 = vld [vmem:[%s1634_s2] ss:$0 sm:$0xff] }
  0x36   :  { %1187 = vmatprep.subr.bf16.mxu1 %v1301_v62 }
  0x37   :  { %1160 = vmatpush3.bf16.msra.mxu0 %v1300_v61 }
  0x38   :  { %1161 = vmatprep.subr.bf16.mxu0 %v1303_v0 }
  0x39   :  { %1188 = vmatpush3.bf16.msra.mxu1 %v1302_v63 }
  0x3a   :  { %1189 = vmatprep.subr.bf16.mxu1 %v1305_v2 }
  0x3b   :  { %1162 = vmatpush3.bf16.msra.mxu0 %v1304_v1 }
  0x3c   :  { %1163 = vmatprep.subr.bf16.mxu0 %v1307_v4 }
  0x3d   :  { %1190 = vmatpush3.bf16.msra.mxu1 %v1306_v3 }
  0x3e   :  { %1191 = vmatprep.subr.bf16.mxu1 %v1309_v6 }
  0x3f   :  { %1164 = vmatpush3.bf16.msra.mxu0 %v1308_v5 }
  0x40   :  { %1215 = vmatprep.subr.bf16.mxu0 %v1314_v10 }
  0x41   :  { %1192 = vmatpush3.bf16.msra.mxu1 %v1313_v9 }
  0x42   :  { %841 = vmatmul.mubr.bf16.vlgmr.msra.gmra.mxu0 %v1310_v7 }
  0x43   :  { %1216 = vmatpush3.bf16.msra.mxu0 %v1314_v10  ;;  %848 = vmatprep.mubr.bf16.mxu0 %v1319_v14 }
  0x44   :  { %890 = vmatmul.mubr.bf16.vlgmr.msra.gmra.mxu1 %v1315_v11  ;;  %1217 = vmatprep.subr.bf16.mxu0 %v1318_v13 }
  0x45   :  { %897 = vmatprep.mubr.bf16.mxu1 %v1323_v17 }
  0x47   :  { %1218 = vmatpush3.bf16.msra.mxu0 %v1318_v13 }
  0x48   :  { %1219 = vmatprep.subr.bf16.mxu0 %v1322_v16 }
  0x4a   :  { %849 = vmatmul.mubr.bf16.gmra.mxu0 %v1321_v15 }
  0x4b   :  { %1220 = vmatpush3.bf16.msra.mxu0 %v1322_v16  ;;  %1231 = vmatprep.mubr.bf16.mxu0 %v1331_v21 }
  0x4c   :  { %898 = vmatmul.mubr.bf16.gmra.mxu1 %v1325_v18  ;;  %1221 = vmatprep.subr.bf16.mxu0 %v1326_v19 }
  0x4f   :  { %1222 = vmatpush3.bf16.msra.mxu0 %v1326_v19 }
  0x50   :  { %1223 = vmatprep.subr.bf16.mxu0 %v1327_v20 }
  0x53   :  { %1224 = vmatpush3.bf16.msra.mxu0 %v1327_v20 }
  0x54   :  { %1225 = vmatprep.subr.bf16.mxu0 %v1328_v22 }
  0x57   :  { %1226 = vmatpush3.bf16.msra.mxu0 %v1328_v22 }
  0x58   :  { %1227 = vmatprep.subr.bf16.mxu0 %v1329_v23 }
  0x5b   :  { %1228 = vmatpush3.bf16.msra.mxu0 %v1329_v23 }
  0x5c   :  { %1229 = vmatprep.subr.bf16.mxu0 %v1330_v24 }
  0x5f   :  { %1230 = vmatpush3.bf16.msra.mxu0 %v1330_v24 }
  0x62   :  { %1232 = vmatmul.mubr.bf16.vlgmr.msra.gmra.mxu0 %v1332_v25 }
  0xe2   :  { %v1109_v26 = vpop.f32.mrf.mxu0 }
  0xe4   :  { %v1137_v27 = vpop.f32.mrf.mxu1  ;;  %v1110_v28 = vpop.f32.mrf.mxu0 }
  0xe5   :  { %v1111_v54 = vadd.f32 %v1110_v28, %v1109_v26 }
  0xe6   :  { %v1138_v29 = vpop.f32.mrf.mxu1  ;;  %v1112_v30 = vpop.f32.mrf.mxu0 }
  0xe7   :  { %v745_v62 = vadd.f32 %v1111_v54, %v983_v57  ;;  %v1139_v63 = vadd.f32 %v1138_v29, %v1137_v27 }
  0xe8   :  { %v1140_v31 = vpop.f32.mrf.mxu1  ;;  %v1113_v32 = vpop.f32.mrf.mxu0 }
  0xe9   :  { %v1114_v59 = vadd.f32 %v1113_v32, %v1112_v30  ;;  %v794_v10 = vadd.f32 %v1139_v63, %v745_v62 }
  0xea   :  { %v1115_v33 = vpop.f32.mrf.mxu0  ;;  %v1141_v34 = vpop.f32.mrf.mxu1 }
  0xeb   :  { %v748_v5 = vadd.f32 %v1114_v59, %v983_v57  ;;  %v1142_v6 = vadd.f32 %v1141_v34, %v1140_v31 }
  0xec   :  { %v1143_v35 = vpop.f32.mrf.mxu1  ;;  %v1116_v36 = vpop.f32.mrf.mxu0 }
  0xed   :  { %v1117_v53 = vadd.f32 %v1116_v36, %v1115_v33  ;;  %v797_v16 = vadd.f32 %v1142_v6, %v748_v5 }
  0xee   :  { %v1144_v37 = vpop.f32.mrf.mxu1  ;;  %v1118_v38 = vpop.f32.mrf.mxu0 }
  0xef   :  { %v753_v60 = vadd.f32 %v1117_v53, %v983_v57  ;;  %v1145_v61 = vadd.f32 %v1144_v37, %v1143_v35 }
  0xf0   :  { %v1146_v39 = vpop.f32.mrf.mxu1  ;;  %v1119_v40 = vpop.f32.mrf.mxu0 }
  0xf1   :  { %v1120_v58 = vadd.f32 %v1119_v40, %v1118_v38  ;;  %v802_v7 = vadd.f32 %v1145_v61, %v753_v60 }
  0xf2   :  { %v1147_v42 = vpop.f32.mrf.mxu1 }
  0xf3   :  { %v756_v2 = vadd.f32 %v1120_v58, %v983_v57  ;;  %v1148_v3 = vadd.f32 %v1147_v42, %v1146_v39 }
  0xf5   :  { %v805_v12 = vadd.f32 %v1148_v3, %v756_v2 }
 0x102   :  { %v1165_v41 = vpop.f32.mrf.mxu0 }
 0x104   :  { %v1166_v43 = vpop.f32.mrf.mxu0  ;;  %v1193_v44 = vpop.f32.mrf.mxu1 }
 0x105   :  { %v1167_v8 = vadd.f32 %v1166_v43, %v1165_v41 }
 0x106   :  { %v1168_v45 = vpop.f32.mrf.mxu0  ;;  %v1194_v46 = vpop.f32.mrf.mxu1 }
 0x107   :  { %v843_v17 = vadd.f32 %v1167_v8, %v794_v10  ;;  %v1195_v18 = vadd.f32 %v1194_v46, %v1193_v44 }
 0x108   :  { %v1169_v47 = vpop.f32.mrf.mxu0  ;;  %v1196_v48 = vpop.f32.mrf.mxu1 }
 0x109   :  { %v1170_v13 = vadd.f32 %v1169_v47, %v1168_v45  ;;  %v892_v27 = vadd.f32 %v1195_v18, %v843_v17 }
 0x10a   :  { %v1171_v49 = vpop.f32.mrf.mxu0  ;;  %v1197_v50 = vpop.f32.mrf.mxu1 }
 0x10b   :  { %v846_v22 = vadd.f32 %v1170_v13, %v797_v16  ;;  %v1198_v23 = vadd.f32 %v1197_v50, %v1196_v48 }
 0x10c   :  { %v1172_v51 = vpop.f32.mrf.mxu0  ;;  %v1199_v52 = vpop.f32.mrf.mxu1 }
 0x10d   :  { %v1173_v4 = vadd.f32 %v1172_v51, %v1171_v49  ;;  %v895_v32 = vadd.f32 %v1198_v23, %v846_v22 }
 0x10e   :  { %v1174_v55 = vpop.f32.mrf.mxu0  ;;  %v1200_v56 = vpop.f32.mrf.mxu1 }
 0x10f   :  { %v851_v14 = vadd.f32 %v1173_v4, %v802_v7  ;;  %v1201_v15 = vadd.f32 %v1200_v56, %v1199_v52 }
 0x110   :  { %v1175_v0 = vpop.f32.mrf.mxu0  ;;  %v1202_v1 = vpop.f32.mrf.mxu1 }
 0x111   :  { %v1176_v9 = vadd.f32 %v1175_v0, %v1174_v55  ;;  %v900_v24 = vadd.f32 %v1201_v15, %v851_v14 }
 0x112   :  { %v1203_v11 = vpop.f32.mrf.mxu1 }
 0x113   :  { %v854_v19 = vadd.f32 %v1176_v9, %v805_v12  ;;  %v1204_v20 = vadd.f32 %v1203_v11, %v1202_v1 }
 0x115   :  { %v903_v28 = vadd.f32 %v1204_v20, %v854_v19 }
 0x122   :  { %v1233_v21 = vpop.f32.mrf.mxu0 }
 0x123   :  { %v949_v26 = vadd.f32 %v1233_v21, %v900_v24 }
 0x124   :  { %v940_v25 = vpop.f32.mrf.mxu0 }
 0x125   :  { %v941_v30 = vadd.f32 %v940_v25, %v892_v27  ;;  %v957_v34 = vmax.f32 %v949_v26, 0.0 }
 0x126   :  { %v1234_v29 = vpop.f32.mrf.mxu0 }
 0x127   :  { %v952_v31 = vadd.f32 %v1234_v29, %v903_v28  ;;  %v955_v37 = vmax.f32 %v941_v30, 0.0 }
 0x128   :  { %v943_v33 = vpop.f32.mrf.mxu0 }
 0x129   :  { %v958_v35 = vmax.f32 %v952_v31, 0.0  ;;  %v944_v36 = vadd.f32 %v943_v33, %v895_v32 }
 0x12b   :  { %v1090_v38 = vpack.c.bf16 %v958_v35, %v957_v34  ;;  %v956_v39 = vmax.f32 %v944_v36, 0.0 }
 0x12d   :  { %1092 = vst [vmem:[%s1635_s3 + $0x8] sm:$0xff] %v1090_v38   ;;  %v1085_v40 = vpack.c.bf16 %v956_v39, %v955_v37 }
 0x12f   :  { %1086 = vst [vmem:[%s1635_s3] sm:$0xff] %v1085_v40  }

// kernel: byobnet_forward.17
= control target key start
LH: loop header
LB: loop body
LE: loop exit
PB: predicated region body
PF: predicated region fallthrough
CT: control target
= control target key end

     0   :  { %v228_v1 = vmov 0.0   ;;  %vm229_vm0 = vmmov 0   ;;  %vm19_vm1 = vcmask 1043456   ;;  %s328_s0 = inlined_call_operand.vmem [shape: bf16[2,4,128], index: 0, kind: input, shape index: {}]   ;;  %s329_s1 = inlined_call_operand.vmem [shape: f32[128,10], index: 1, kind: input, shape index: {}]   ;;  %s330_s2 = inlined_call_operand.vmem [shape: f32[1,10], index: 2, kind: input, shape index: {}]   ;;  %s331_s3 = inlined_call_operand.hbm [shape: f32[2,10], index: 3, kind: output, shape index: {}]  }
   0x1   :  { %v51_v0 = vld [vmem:[%s329_s1 + $0x78] sm:$0xff]  ;;  %168 = vmatprep.subr.mxu0 %v228_v1  ;;  %v50_v2 = vld [vmem:[%s329_s1 + $0x70] sm:$0xff]  ;;  %200 = vmatprep.mubr.msk.f32.mxu0 %vm229_vm0, %v228_v1  ;;  %v49_v3 = vld [vmem:[%s329_s1 + $0x68] sm:$0xff] }
   0x2   :  { %169 = vmatpush3.msra.mxu0 %v51_v0  ;;  %v48_v4 = vld [vmem:[%s329_s1 + $0x60] sm:$0xff] }
   0x3   :  { %170 = vmatprep.subr.mxu0 %v228_v1  ;;  %v15_v5 = vld [vmem:[%s328_s0] sm:$0x3]  ;;  %v16_v6 = vld [vmem:[%s328_s0 + $0x2] sm:$0x3] }
   0x4   :  { %171 = vmatpush3.msra.mxu0 %v50_v2  ;;  %v17_v7 = vunpack.c.l.bf16 %v15_v5  ;;  %v18_v8 = vunpack.c.l.bf16 %v16_v6 }
   0x5   :  { %172 = vmatprep.subr.mxu0 %v228_v1 }
   0x6   :  { %173 = vmatpush3.msra.mxu0 %v49_v3 }
   0x7   :  { %8 = vsyncpa [#allocation3], 0  ;;  %174 = vmatprep.subr.mxu0 %v228_v1  ;;  %v47_v9 = vld [vmem:[%s329_s1 + $0x58] sm:$0xff]  ;;  %v20_v10 = vsel %vm19_vm1, %v17_v7, 0.0  ;;  %v27_v11 = vsel %vm19_vm1, %v18_v8, 0.0  ;;  %v46_v12 = vld [vmem:[%s329_s1 + $0x50] sm:$0xff] }
   0x8   :  { %175 = vmatpush3.msra.mxu0 %v48_v4  ;;  %v21_v13 = vrot.slane %v20_v10, 4  ;;  %v28_v14 = vrot.slane %v27_v11, 4  ;;  %v45_v15 = vld [vmem:[%s329_s1 + $0x48] sm:$0xff]  ;;  %v44_v18 = vld [vmem:[%s329_s1 + $0x40] sm:$0xff]  ;;  %v43_v21 = vld [vmem:[%s329_s1 + $0x38] sm:$0xff]  ;;  %vm61_vm2 = vcmask 1041409  }
   0x9   :  { %176 = vmatprep.subr.mxu0 %v228_v1  ;;  %v42_v24 = vld [vmem:[%s329_s1 + $0x30] sm:$0xff]  ;;  %v41_v27 = vld [vmem:[%s329_s1 + $0x28] sm:$0xff]  ;;  %v40_v28 = vld [vmem:[%s329_s1 + $0x20] sm:$0xff]  ;;  %s230_s22 = smov [#allocation2]   ;;  %vm134_vm3 = vcmask 74752  }
   0xa   :  { %177 = vmatpush3.msra.mxu0 %v47_v9  ;;  %v22_v16 = vadd.f32 %v21_v13, %v20_v10  ;;  %v29_v17 = vadd.f32 %v28_v14, %v27_v11  ;;  %v39_v31 = vld [vmem:[%s329_s1 + $0x18] sm:$0xff]  ;;  %v38_v32 = vld [vmem:[%s329_s1 + $0x10] sm:$0xff]  ;;  %v37_v35 = vld [vmem:[%s329_s1 + $0x8] sm:$0xff]  ;;  %s142_s23 = sshll.u32 %s230_s22, 4  ;;  %s143_s23 = int_to_ptr.vmem [resolvable:$true] %s142_s23 }
   0xb   :  { %178 = vmatprep.subr.mxu0 %v228_v1  ;;  %v36_v36 = vld [vmem:[%s329_s1] sm:$0xff]  ;;  %s206_s24 = scalar_lea.vmem %s143_s23, 32  ;;  %p211_p1 = scmp.lt.s32.totalorder %s143_s23, %s143_s23 }
   0xc   :  { %179 = vmatpush3.msra.mxu0 %v46_v12  ;;  %v23_v19 = vrot.slane %v22_v16, 2  ;;  %v30_v20 = vrot.slane %v29_v17, 2  ;;  %v150_v38 = vld [vmem:[%s330_s2] ss:$0 sm:$0xff]  ;;  %p207_p0 = scmp.ne.s32.totalorder %s143_s23, %s206_s24  ;;  %p212_p2 = scmp.lt.s32.totalorder %s206_s24, %s206_s24 }
   0xd   :  { %180 = vmatprep.subr.mxu0 %v228_v1 }
   0xe   :  { %181 = vmatpush3.msra.mxu0 %v45_v15  ;;  %v24_v22 = vadd.f32 %v23_v19, %v22_v16  ;;  %v31_v23 = vadd.f32 %v30_v20, %v29_v17  ;;  %p213_p3 = por %p212_p2, %p211_p1 }
   0xf   :  { %182 = vmatprep.subr.mxu0 %v228_v1 }
  0x10   :  { %183 = vmatpush3.msra.mxu0 %v44_v18  ;;  %v25_v25 = vrot.slane %v24_v22, 1  ;;  %v32_v26 = vrot.slane %v31_v23, 1  ;;  %p214_p4 = pnand %p213_p3, %p207_p0 }
  0x11   :  { %184 = vmatprep.subr.mxu0 %v228_v1 }
  0x12   :  { %185 = vmatpush3.msra.mxu0 %v43_v21  ;;  %v26_v29 = vadd.f32 %v25_v25, %v24_v22  ;;  %v33_v30 = vadd.f32 %v32_v26, %v31_v23 }
  0x13   :  { %186 = vmatprep.subr.mxu0 %v228_v1 }
  0x14   :  { %187 = vmatpush3.msra.mxu0 %v42_v24  ;;  %v34_v33 = vmul.f32 0.25, %v26_v29  ;;  %v35_v34 = vmul.f32 0.25, %v33_v30 }
  0x15   :  { %188 = vmatprep.subr.mxu0 %v228_v1 }
  0x16   :  { %189 = vmatpush3.msra.mxu0 %v41_v27  ;;  %v62_v37 = vsel %vm61_vm2, %v35_v34, %v34_v33 }
  0x17   :  { %190 = vmatprep.subr.mxu0 %v228_v1 }
  0x18   :  { %191 = vmatpush3.msra.mxu0 %v40_v28 }
  0x19   :  { %192 = vmatprep.subr.mxu0 %v228_v1 }
  0x1a   :  { %193 = vmatpush3.msra.mxu0 %v39_v31 }
  0x1b   :  { %194 = vmatprep.subr.mxu0 %v228_v1 }
  0x1c   :  { %195 = vmatpush3.msra.mxu0 %v38_v32 }
  0x1d   :  { %196 = vmatprep.subr.mxu0 %v228_v1 }
  0x1e   :  { %197 = vmatpush3.msra.mxu0 %v37_v35 }
  0x1f   :  { %198 = vmatprep.subr.mxu0 %v228_v1 }
  0x20   :  { %199 = vmatpush3.msra.mxu0 %v36_v36 }
  0x21   :  { %201 = vmatmul.mubr.f32.vlgmr.msra.gmra.mxu0 %v62_v37 }
  0xe1   :  { %v130_v39 = vpop.f32.mrf.mxu0 }
  0xe2   :  { %v131_v40 = vadd.f32 %v150_v38, %v130_v39 }
  0xe3   :  { %v202_v41 = vpop.f32.mrf.mxu0 }
  0xe4   :  { %135 = vst.msk [vmem:[#allocation2] sm:$0x3] %vm134_vm3, %v131_v40 }
  0xe5   :  { %217 = shalt.err (!%p214_p4)
}
  0xe6   :  { %145 = dma.vmem_to_hbm [thread:$0]  %s143_s23, 32, %s331_s3, [#allocation3]  }
  0xe7   :  { %226 = dma.done.wait [#allocation3], 32  }
  0xe8   :  { %227 = vsyncadd [#allocation3], 4294967264 }
  0xe9   :  { %149 = vsyncpa [#allocation3], 1 }

// kernel: byobnet_forward.16
= control target key start
LH: loop header
LB: loop body
LE: loop exit
PB: predicated region body
PF: predicated region fallthrough
CT: control target
= control target key end

     0   :  { %vm1125_vm0 = vmmov 0   ;;  %s1383_s1 = inlined_call_operand.vmem [shape: bf16[1152,128], index: 1, kind: input, shape index: {}]   ;;  %s1384_s0 = inlined_call_operand.vmem [shape: bf16[8,1152], index: 0, kind: input, shape index: {}]   ;;  %s1385_s2 = inlined_call_operand.vmem [shape: f32[1,128], index: 2, kind: input, shape index: {}]   ;;  %s1386_s3 = inlined_call_operand.vmem [shape: bf16[8,128], index: 3, kind: output, shape index: {}]  }
   0x1   :  { %v1043_v0 = vld [vmem:[%s1383_s1 + $0x78] sm:$0xff]   ;;  %v1047_v4 = vld [vmem:[%s1383_s1 + $0x70] sm:$0xff]   ;;  %v1051_v8 = vld [vmem:[%s1383_s1 + $0x68] sm:$0xff]  }
   0x2   :  { %v1044_v1 = vld [vmem:[%s1383_s1 + $0x38] sm:$0xff]   ;;  %924 = vmatprep.subr.bf16.mxu0 %v1043_v0  ;;  %v1048_v5 = vld [vmem:[%s1383_s1 + $0x30] sm:$0xff]   ;;  %v1052_v9 = vld [vmem:[%s1383_s1 + $0x28] sm:$0xff]  }
   0x3   :  { %v1045_v2 = vld [vmem:[%s1383_s1 + $0xf8] sm:$0xff]   ;;  %925 = vmatpush3.bf16.msra.mxu0 %v1044_v1  ;;  %v1049_v6 = vld [vmem:[%s1383_s1 + $0xf0] sm:$0xff]   ;;  %v1053_v10 = vld [vmem:[%s1383_s1 + $0xe8] sm:$0xff]  }
   0x4   :  { %v1046_v3 = vld [vmem:[%s1383_s1 + $0xb8] sm:$0xff]   ;;  %946 = vmatprep.subr.bf16.mxu1 %v1045_v2  ;;  %926 = vmatprep.subr.bf16.mxu0 %v1047_v4  ;;  %v1050_v7 = vld [vmem:[%s1383_s1 + $0xb0] sm:$0xff]   ;;  %v1054_v11 = vld [vmem:[%s1383_s1 + $0xa8] sm:$0xff]  }
   0x5   :  { %947 = vmatpush3.bf16.msra.mxu1 %v1046_v3  ;;  %v1055_v12 = vld [vmem:[%s1383_s1 + $0x60] sm:$0xff]   ;;  %v1059_v16 = vld [vmem:[%s1383_s1 + $0x58] sm:$0xff]   ;;  %v1063_v20 = vld [vmem:[%s1383_s1 + $0x50] sm:$0xff]  }
   0x6   :  { %948 = vmatprep.subr.bf16.mxu1 %v1049_v6  ;;  %v1056_v13 = vld [vmem:[%s1383_s1 + $0x20] sm:$0xff]   ;;  %v1060_v17 = vld [vmem:[%s1383_s1 + $0x18] sm:$0xff]   ;;  %v1064_v21 = vld [vmem:[%s1383_s1 + $0x10] sm:$0xff]  }
   0x7   :  { %927 = vmatpush3.bf16.msra.mxu0 %v1048_v5  ;;  %v1057_v14 = vld [vmem:[%s1383_s1 + $0xe0] sm:$0xff]   ;;  %v1061_v18 = vld [vmem:[%s1383_s1 + $0xd8] sm:$0xff]   ;;  %v1065_v22 = vld [vmem:[%s1383_s1 + $0xd0] sm:$0xff]  }
   0x8   :  { %928 = vmatprep.subr.bf16.mxu0 %v1051_v8  ;;  %v1058_v15 = vld [vmem:[%s1383_s1 + $0xa0] sm:$0xff]   ;;  %v1062_v19 = vld [vmem:[%s1383_s1 + $0x98] sm:$0xff]   ;;  %v1066_v23 = vld [vmem:[%s1383_s1 + $0x90] sm:$0xff]  }
   0x9   :  { %949 = vmatpush3.bf16.msra.mxu1 %v1050_v7  ;;  %v1067_v24 = vld [vmem:[%s1383_s1 + $0x48] sm:$0xff]   ;;  %v1071_v28 = vld [vmem:[%s1383_s1 + $0x40] sm:$0xff]   ;;  %v1077_v35 = vld [vmem:[%s1383_s1 + $0x178] sm:$0xff]  }
   0xa   :  { %950 = vmatprep.subr.bf16.mxu1 %v1053_v10  ;;  %v1068_v25 = vld [vmem:[%s1383_s1 + $0x8] sm:$0xff]   ;;  %v1072_v29 = vld [vmem:[%s1383_s1] sm:$0xff]   ;;  %v1080_v39 = vld [vmem:[%s1383_s1 + $0x138] sm:$0xff]  }
   0xb   :  { %929 = vmatpush3.bf16.msra.mxu0 %v1052_v9  ;;  %v1069_v26 = vld [vmem:[%s1383_s1 + $0xc8] sm:$0xff]   ;;  %v1073_v30 = vld [vmem:[%s1383_s1 + $0xc0] sm:$0xff]   ;;  %v1081_v40 = vld [vmem:[%s1383_s1 + $0x1f8] sm:$0xff]   ;;  %v1124_v9 = vmov 0.0  }
   0xc   :  { %930 = vmatprep.subr.bf16.mxu0 %v1055_v12  ;;  %v1070_v27 = vld [vmem:[%s1383_s1 + $0x88] sm:$0xff]   ;;  %v15_v31 = vld [vmem:[%s1384_s0] sm:$0xff]  ;;  %v1082_v41 = vld [vmem:[%s1383_s1 + $0x1b8] sm:$0xff]  }
   0xd   :  { %951 = vmatpush3.bf16.msra.mxu1 %v1054_v11  ;;  %v843_v32 = vcombine.low %v15_v31, %v15_v31  ;;  %v844_v33 = vcombine.high %v15_v31, %v15_v31  ;;  %v1076_v34 = vld [vmem:[%s1383_s1 + $0x80] sm:$0xff]   ;;  %v16_v36 = vld [vmem:[%s1384_s0 + $0x8] sm:$0xff]  ;;  %v1083_v42 = vld [vmem:[%s1383_s1 + $0x170] sm:$0xff]  }
   0xe   :  { %952 = vmatprep.subr.bf16.mxu1 %v1057_v14  ;;  %v845_v37 = vcombine.low %v16_v36, %v16_v36  ;;  %v846_v38 = vcombine.high %v16_v36, %v16_v36  ;;  %v1084_v43 = vld [vmem:[%s1383_s1 + $0x130] sm:$0xff]   ;;  %v1087_v46 = vld [vmem:[%s1383_s1 + $0x168] sm:$0xff]   ;;  %v1091_v50 = vld [vmem:[%s1383_s1 + $0x160] sm:$0xff]  }
   0xf   :  { %931 = vmatpush3.bf16.msra.mxu0 %v1056_v13  ;;  %667 = vmatprep.mubr.bf16.mxu0 %v844_v33  ;;  %v1085_v44 = vld [vmem:[%s1383_s1 + $0x1f0] sm:$0xff]   ;;  %v1088_v47 = vld [vmem:[%s1383_s1 + $0x128] sm:$0xff]   ;;  %v1092_v51 = vld [vmem:[%s1383_s1 + $0x120] sm:$0xff]  }
  0x10   :  { %932 = vmatprep.subr.bf16.mxu0 %v1059_v16  ;;  %707 = vmatprep.mubr.bf16.mxu1 %v846_v38  ;;  %v1086_v45 = vld [vmem:[%s1383_s1 + $0x1b0] sm:$0xff]   ;;  %v1089_v48 = vld [vmem:[%s1383_s1 + $0x1e8] sm:$0xff]   ;;  %v1093_v52 = vld [vmem:[%s1383_s1 + $0x1e0] sm:$0xff]  }
  0x11   :  { %953 = vmatpush3.bf16.msra.mxu1 %v1058_v15  ;;  %v1090_v49 = vld [vmem:[%s1383_s1 + $0x1a8] sm:$0xff]   ;;  %v1094_v53 = vld [vmem:[%s1383_s1 + $0x1a0] sm:$0xff]   ;;  %v1095_v54 = vld [vmem:[%s1383_s1 + $0x158] sm:$0xff]  }
  0x12   :  { %954 = vmatprep.subr.bf16.mxu1 %v1061_v18  ;;  %v1096_v55 = vld [vmem:[%s1383_s1 + $0x118] sm:$0xff]   ;;  %v1099_v58 = vld [vmem:[%s1383_s1 + $0x150] sm:$0xff]   ;;  %v1103_v62 = vld [vmem:[%s1383_s1 + $0x148] sm:$0xff]  }
  0x13   :  { %933 = vmatpush3.bf16.msra.mxu0 %v1060_v17  ;;  %v1097_v56 = vld [vmem:[%s1383_s1 + $0x1d8] sm:$0xff]   ;;  %v1100_v59 = vld [vmem:[%s1383_s1 + $0x110] sm:$0xff]   ;;  %v1104_v63 = vld [vmem:[%s1383_s1 + $0x108] sm:$0xff]  }
  0x14   :  { %934 = vmatprep.subr.bf16.mxu0 %v1063_v20  ;;  %v1098_v57 = vld [vmem:[%s1383_s1 + $0x198] sm:$0xff]   ;;  %v1101_v60 = vld [vmem:[%s1383_s1 + $0x1d0] sm:$0xff]   ;;  %v1105_v0 = vld [vmem:[%s1383_s1 + $0x1c8] sm:$0xff]  }
  0x15   :  { %955 = vmatpush3.bf16.msra.mxu1 %v1062_v19  ;;  %v1102_v61 = vld [vmem:[%s1383_s1 + $0x190] sm:$0xff]   ;;  %v1106_v1 = vld [vmem:[%s1383_s1 + $0x188] sm:$0xff]   ;;  %v1107_v2 = vld [vmem:[%s1383_s1 + $0x140] sm:$0xff]  }
  0x16   :  { %956 = vmatprep.subr.bf16.mxu1 %v1065_v22  ;;  %v1108_v3 = vld [vmem:[%s1383_s1 + $0x100] sm:$0xff]   ;;  %v17_v5 = vld [vmem:[%s1384_s0 + $0x10] sm:$0xff]  ;;  %v18_v10 = vld [vmem:[%s1384_s0 + $0x18] sm:$0xff] }
  0x17   :  { %935 = vmatpush3.bf16.msra.mxu0 %v1064_v21  ;;  %v1109_v4 = vld [vmem:[%s1383_s1 + $0x1c0] sm:$0xff]   ;;  %v847_v6 = vcombine.low %v17_v5, %v17_v5  ;;  %v848_v7 = vcombine.high %v17_v5, %v17_v5  ;;  %v849_v11 = vcombine.low %v18_v10, %v18_v10  ;;  %v850_v12 = vcombine.high %v18_v10, %v18_v10  ;;  %v1115_v13 = vld [vmem:[%s1383_s1 + $0x238] sm:$0xff]   ;;  %v1116_v14 = vld [vmem:[%s1383_s1 + $0x230] sm:$0xff]  }
  0x18   :  { %936 = vmatprep.subr.bf16.mxu0 %v1067_v24  ;;  %v1112_v8 = vld [vmem:[%s1383_s1 + $0x180] sm:$0xff]   ;;  %v1117_v15 = vld [vmem:[%s1383_s1 + $0x228] sm:$0xff]   ;;  %v1119_v17 = vld [vmem:[%s1383_s1 + $0x218] sm:$0xff]  }
  0x19   :  { %957 = vmatpush3.bf16.msra.mxu1 %v1066_v23  ;;  %v1118_v16 = vld [vmem:[%s1383_s1 + $0x220] sm:$0xff]   ;;  %v1120_v18 = vld [vmem:[%s1383_s1 + $0x210] sm:$0xff]   ;;  %v1121_v19 = vld [vmem:[%s1383_s1 + $0x208] sm:$0xff]  }
  0x1a   :  { %958 = vmatprep.subr.bf16.mxu1 %v1069_v26  ;;  %v1122_v20 = vld [vmem:[%s1383_s1 + $0x200] sm:$0xff]  }
  0x1b   :  { %937 = vmatpush3.bf16.msra.mxu0 %v1068_v25  ;;  %v1123_v21 = vld [vmem:[%s1384_s0 + $0x20] ss:$0 sps:$4 sm:$0xff]  }
  0x1c   :  { %938 = vmatprep.subr.bf16.mxu0 %v1071_v28 }
  0x1d   :  { %959 = vmatpush3.bf16.msra.mxu1 %v1070_v27 }
  0x1e   :  { %960 = vmatprep.subr.bf16.mxu1 %v1073_v30 }
  0x1f   :  { %939 = vmatpush3.bf16.msra.mxu0 %v1072_v29 }
  0x20   :  { %968 = vmatprep.subr.bf16.mxu0 %v1077_v35 }
  0x21   :  { %961 = vmatpush3.bf16.msra.mxu1 %v1076_v34 }
  0x22   :  { %668 = vmatmul.mubr.bf16.vlgmr.msra.gmra.mxu0 %v843_v32  ;;  %990 = vmatprep.subr.bf16.mxu1 %v1081_v40 }
  0x23   :  { %969 = vmatpush3.bf16.msra.mxu0 %v1080_v39  ;;  %747 = vmatprep.mubr.bf16.mxu0 %v848_v7  ;;  %v842_v39 = vld [vmem:[%s1385_s2] ss:$0 sm:$0xff] }
  0x24   :  { %708 = vmatmul.mubr.bf16.vlgmr.msra.gmra.mxu1 %v845_v37  ;;  %970 = vmatprep.subr.bf16.mxu0 %v1083_v42 }
  0x25   :  { %991 = vmatpush3.bf16.msra.mxu1 %v1082_v41  ;;  %787 = vmatprep.mubr.bf16.mxu1 %v850_v12 }
  0x26   :  { %992 = vmatprep.subr.bf16.mxu1 %v1085_v44 }
  0x27   :  { %971 = vmatpush3.bf16.msra.mxu0 %v1084_v43 }
  0x28   :  { %972 = vmatprep.subr.bf16.mxu0 %v1087_v46 }
  0x29   :  { %993 = vmatpush3.bf16.msra.mxu1 %v1086_v45 }
  0x2a   :  { %994 = vmatprep.subr.bf16.mxu1 %v1089_v48 }
  0x2b   :  { %973 = vmatpush3.bf16.msra.mxu0 %v1088_v47 }
  0x2c   :  { %974 = vmatprep.subr.bf16.mxu0 %v1091_v50 }
  0x2d   :  { %995 = vmatpush3.bf16.msra.mxu1 %v1090_v49 }
  0x2e   :  { %996 = vmatprep.subr.bf16.mxu1 %v1093_v52 }
  0x2f   :  { %975 = vmatpush3.bf16.msra.mxu0 %v1092_v51 }
  0x30   :  { %976 = vmatprep.subr.bf16.mxu0 %v1095_v54 }
  0x31   :  { %997 = vmatpush3.bf16.msra.mxu1 %v1094_v53 }
  0x32   :  { %998 = vmatprep.subr.bf16.mxu1 %v1097_v56 }
  0x33   :  { %977 = vmatpush3.bf16.msra.mxu0 %v1096_v55 }
  0x34   :  { %978 = vmatprep.subr.bf16.mxu0 %v1099_v58 }
  0x35   :  { %999 = vmatpush3.bf16.msra.mxu1 %v1098_v57 }
  0x36   :  { %1000 = vmatprep.subr.bf16.mxu1 %v1101_v60 }
  0x37   :  { %979 = vmatpush3.bf16.msra.mxu0 %v1100_v59 }
  0x38   :  { %980 = vmatprep.subr.bf16.mxu0 %v1103_v62 }
  0x39   :  { %1001 = vmatpush3.bf16.msra.mxu1 %v1102_v61 }
  0x3a   :  { %1002 = vmatprep.subr.bf16.mxu1 %v1105_v0 }
  0x3b   :  { %981 = vmatpush3.bf16.msra.mxu0 %v1104_v63 }
  0x3c   :  { %982 = vmatprep.subr.bf16.mxu0 %v1107_v2 }
  0x3d   :  { %1003 = vmatpush3.bf16.msra.mxu1 %v1106_v1 }
  0x3e   :  { %1004 = vmatprep.subr.bf16.mxu1 %v1109_v4 }
  0x3f   :  { %983 = vmatpush3.bf16.msra.mxu0 %v1108_v3 }
  0x40   :  { %1021 = vmatprep.subr.bf16.mxu0 %v1124_v9 }
  0x41   :  { %1005 = vmatpush3.bf16.msra.mxu1 %v1112_v8 }
  0x42   :  { %748 = vmatmul.mubr.bf16.vlgmr.msra.gmra.mxu0 %v847_v6 }
  0x43   :  { %1022 = vmatpush3.bf16.msra.mxu0 %v1115_v13  ;;  %1037 = vmatprep.mubr.msk.bf16.mxu0 %vm1125_vm0, %v1124_v9 }
  0x44   :  { %788 = vmatmul.mubr.bf16.vlgmr.msra.gmra.mxu1 %v849_v11  ;;  %1023 = vmatprep.subr.bf16.mxu0 %v1124_v9 }
  0x47   :  { %1024 = vmatpush3.bf16.msra.mxu0 %v1116_v14 }
  0x48   :  { %1025 = vmatprep.subr.bf16.mxu0 %v1124_v9 }
  0x4b   :  { %1026 = vmatpush3.bf16.msra.mxu0 %v1117_v15 }
  0x4c   :  { %1027 = vmatprep.subr.bf16.mxu0 %v1124_v9 }
  0x4f   :  { %1028 = vmatpush3.bf16.msra.mxu0 %v1118_v16 }
  0x50   :  { %1029 = vmatprep.subr.bf16.mxu0 %v1124_v9 }
  0x53   :  { %1030 = vmatpush3.bf16.msra.mxu0 %v1119_v17 }
  0x54   :  { %1031 = vmatprep.subr.bf16.mxu0 %v1124_v9 }
  0x57   :  { %1032 = vmatpush3.bf16.msra.mxu0 %v1120_v18 }
  0x58   :  { %1033 = vmatprep.subr.bf16.mxu0 %v1124_v9 }
  0x5b   :  { %1034 = vmatpush3.bf16.msra.mxu0 %v1121_v19 }
  0x5c   :  { %1035 = vmatprep.subr.bf16.mxu0 %v1124_v9 }
  0x5f   :  { %1036 = vmatpush3.bf16.msra.mxu0 %v1122_v20 }
  0x62   :  { %1038 = vmatmul.mubr.bf16.vlgmr.msra.gmra.mxu0 %v1123_v21 }
  0xe2   :  { %v940_v22 = vpop.f32.mrf.mxu0 }
  0xe4   :  { %v941_v23 = vpop.f32.mrf.mxu0  ;;  %v962_v24 = vpop.f32.mrf.mxu1 }
  0xe5   :  { %v942_v38 = vadd.f32 %v941_v23, %v940_v22 }
  0xe6   :  { %v943_v25 = vpop.f32.mrf.mxu0  ;;  %v963_v26 = vpop.f32.mrf.mxu1 }
  0xe7   :  { %v670_v40 = vadd.f32 %v942_v38, %v842_v39  ;;  %v964_v41 = vadd.f32 %v963_v26, %v962_v24 }
  0xe8   :  { %v944_v27 = vpop.f32.mrf.mxu0  ;;  %v965_v28 = vpop.f32.mrf.mxu1 }
  0xe9   :  { %v710_v43 = vadd.f32 %v964_v41, %v670_v40 }
  0xea   :  { %v966_v29 = vpop.f32.mrf.mxu1 }
 0x102   :  { %v984_v30 = vpop.f32.mrf.mxu0 }
 0x104   :  { %v985_v31 = vpop.f32.mrf.mxu0  ;;  %v1006_v32 = vpop.f32.mrf.mxu1 }
 0x105   :  { %v986_v42 = vadd.f32 %v985_v31, %v984_v30 }
 0x106   :  { %v987_v33 = vpop.f32.mrf.mxu0  ;;  %v1007_v34 = vpop.f32.mrf.mxu1 }
 0x107   :  { %v750_v44 = vadd.f32 %v986_v42, %v710_v43  ;;  %v1008_v45 = vadd.f32 %v1007_v34, %v1006_v32 }
 0x108   :  { %v988_v35 = vpop.f32.mrf.mxu0  ;;  %v1009_v36 = vpop.f32.mrf.mxu1 }
 0x109   :  { %v790_v46 = vadd.f32 %v1008_v45, %v750_v44 }
 0x10a   :  { %v1010_v37 = vpop.f32.mrf.mxu1 }
 0x122   :  { %v829_v47 = vpop.f32.mrf.mxu0 }
 0x123   :  { %v830_v48 = vadd.f32 %v829_v47, %v790_v46 }
 0x124   :  { %v1039_v49 = vpop.f32.mrf.mxu0 }
 0x125   :  { %v835_v50 = vmax.f32 %v830_v48, 0.0 }
 0x126   :  { %v832_v51 = vpop.f32.mrf.mxu0 }
 0x127   :  { %v836_v52 = vpack.c.bf16 %v835_v50, %v835_v50 }
 0x128   :  { %v1040_v53 = vpop.f32.mrf.mxu0 }
 0x129   :  { %837 = vst [vmem:[%s1386_s3] sm:$0xf] %v836_v52 }

</bundles_post_ra>
